<compile_context>
chip_gen: v7x
topology: tpu7x:2x2x1
jax: 0.10.0
libtpu: 0.0.40
codegen_flags: <defaults>
</compile_context>

<pallas_src>
import functools

import jax
import jax.numpy as jnp
from jax.experimental import pallas as pl
from jax.experimental.pallas import tpu as pltpu

# ----------------------------- model config ---------------------------------
PATCH = 8          # conv1 kernel == stride (ViT patch size, scaled down from 14)
WIDTH = 128        # transformer width (lane-dense; scaled down from 1024)
LAYERS = 2         # transformer depth (scaled down from 24)
HEADS = 4          # attention heads -> head_dim = 32
EMBED_DIM = 32     # CLIP image-feature dim (surrogate for CHANNELS['ViT-L/14']=768)
NUM_CLASSES = 1    # fc output


def _round_up(n, m):
    return ((n + m - 1) // m) * m


# ------------------------- fused ViT encoder kernel --------------------------
def _vit_encoder_kernel(patches_ref, conv_w_ref, cls_pos_ref,
                        ln_pre_g, ln_pre_b,
                        ln1_g, ln1_b, in_w, in_b, out_w, out_b,
                        ln2_g, ln2_b, fc_w, fc_b, pj_w, pj_b,
                        ln_post_g, ln_post_b,
                        o_ref, *, n_tokens, heads, b_blk):
    f32 = jnp.float32
    bf16 = jnp.bfloat16
    t_pad = cls_pos_ref.shape[0]
    width = conv_w_ref.shape[1]
    hd = width // heads
    m_rows = b_blk * t_pad

    def ln(v, g, b):
        mu = jnp.mean(v, axis=-1, keepdims=True)
        vc = v - mu
        var = jnp.mean(vc * vc, axis=-1, keepdims=True)
        return vc * jax.lax.rsqrt(var + 1e-5) * g + b

    # ---- patch embedding (conv1-as-matmul; bf16 operands, f32 accumulate) ----
    # CLS slot (row 0 of each batch element) and pad rows are zero in patches,
    # so their conv output is zero; cls_pos carries class_embedding + pos.
    patches = patches_ref[...].reshape(m_rows, patches_ref.shape[2])
    x = jnp.dot(patches.astype(bf16), conv_w_ref[...],
                preferred_element_type=f32)                        # (M, W)
    pos = cls_pos_ref[...]
    if b_blk > 1:
        pos = jnp.concatenate([pos] * b_blk, axis=0)
    x = x + pos
    x = ln(x, ln_pre_g[...], ln_pre_b[...])                        # ln_pre

    # ---- masks, hoisted out of the layer loop (computed once per step) ----
    # key-padding mask: only the first n_tokens key columns are real
    key_ids = jax.lax.broadcasted_iota(jnp.int32, (heads * t_pad, t_pad), 1)
    key_mask = key_ids < n_tokens
    # per-head lane selector stacked over head row-blocks: row block hh keeps
    # lanes [hh*hd, (hh+1)*hd).  Lets all per-head matmuls run un-sliced.
    lane_ids = jax.lax.broadcasted_iota(jnp.int32, (t_pad, width), 1)
    head_sel = jnp.concatenate(
        [jnp.where((lane_ids >= hh * hd) & (lane_ids < (hh + 1) * hd),
                   1.0, 0.0).astype(f32)
         for hh in range(heads)], axis=0)                          # (H*t_pad, W)

    for l in range(LAYERS):
        # ---------------- multi-head self-attention ----------------
        h = ln(x, ln1_g[l], ln1_b[l])
        qkv = jnp.dot(h.astype(bf16), in_w[l],
                      preferred_element_type=f32) + in_b[l]        # (M, 3W)
        u_parts = []
        for bb in range(b_blk):                                    # per batch element
            r0 = bb * t_pad
            q = qkv[r0:r0 + t_pad, 0:width]            # lane-aligned slices only
            k = qkv[r0:r0 + t_pad, width:2 * width]
            v = qkv[r0:r0 + t_pad, 2 * width:3 * width]
            # replicate q over head row-blocks, zero non-head lanes: all heads'
            # QK^T fall out of a single K=128 matmul (scale folded into Wq).
            q_stack = jnp.concatenate([q] * heads, axis=0) * head_sel
            s = jax.lax.dot_general(q_stack.astype(bf16), k.astype(bf16),
                                    (((1,), (1,)), ((), ())),
                                    preferred_element_type=f32)    # (H*t, t)
            s = jnp.where(key_mask, s, -1e30)
            s = s - jnp.max(s, axis=-1, keepdims=True)
            p = jnp.exp(s)
            p = p * pl.reciprocal(jnp.sum(p, axis=-1, keepdims=True), approx=True)
            z = jnp.dot(p.astype(bf16), v.astype(bf16),
                        preferred_element_type=f32)                # (H*t, W)
            z = z * head_sel                # keep each head's own lane block
            u = z[0:t_pad]                  # head-concat == masked sum of blocks
            for hh in range(1, heads):
                u = u + z[hh * t_pad:(hh + 1) * t_pad]
            u_parts.append(u)
        u_full = u_parts[0] if b_blk == 1 else jnp.concatenate(u_parts, axis=0)
        attn = jnp.dot(u_full.astype(bf16), out_w[l],
                       preferred_element_type=f32) + out_b[l]      # one K=128 matmul
        x = x + attn

        # ---------------- MLP (QuickGELU) ----------------
        h = ln(x, ln2_g[l], ln2_b[l])
        h = jnp.dot(h.astype(bf16), fc_w[l], preferred_element_type=f32) + fc_b[l]
        h = h * jax.nn.sigmoid(1.702 * h)                          # QuickGELU (f32)
        h = jnp.dot(h.astype(bf16), pj_w[l], preferred_element_type=f32) + pj_b[l]
        x = x + h

    # ln_post on the CLS rows only; only CLS rows are written back (lane-dense).
    for bb in range(b_blk):
        cls_row = x[bb * t_pad:bb * t_pad + 1, :]
        o_ref[bb] = ln(cls_row, ln_post_g[...], ln_post_b[...])


def vit_encoder(params, patches, cls_pos, n_tok, b_blk):
    """Fused transformer stack.  patches: (B, t_pad, cpp_pad), zero CLS/pad rows."""
    B, t_pad, cpp_pad = patches.shape
    W = WIDTH
    n_prog = B // b_blk

    def full(shape):
        return pl.BlockSpec(shape, lambda g, _n=len(shape): (0,) * _n)

    kern = functools.partial(_vit_encoder_kernel, n_tokens=n_tok,
                             heads=HEADS, b_blk=b_blk)
    return pl.pallas_call(
        kern,
        out_shape=jax.ShapeDtypeStruct((B, 1, W), jnp.float32),
        grid=(n_prog,),
        in_specs=[
            pl.BlockSpec((b_blk, t_pad, cpp_pad), lambda g: (g, 0, 0)),  # patches
            full((cpp_pad, W)),                                    # conv1 weight (bf16)
            full((t_pad, W)),                                      # cls + pos embed
            full((1, W)), full((1, W)),                            # ln_pre
            full((LAYERS, 1, W)), full((LAYERS, 1, W)),            # ln1
            full((LAYERS, W, 3 * W)), full((LAYERS, 1, 3 * W)),    # in_proj (bf16 / f32)
            full((LAYERS, W, W)), full((LAYERS, 1, W)),            # out_proj
            full((LAYERS, 1, W)), full((LAYERS, 1, W)),            # ln2
            full((LAYERS, W, 4 * W)), full((LAYERS, 1, 4 * W)),    # mlp fc
            full((LAYERS, 4 * W, W)), full((LAYERS, 1, W)),        # mlp proj
            full((1, W)), full((1, W)),                            # ln_post
        ],
        out_specs=pl.BlockSpec((b_blk, 1, W), lambda g: (g, 0, 0)),  # CLS rows only
        compiler_params=pltpu.CompilerParams(
            dimension_semantics=("parallel",)),   # 2 programs -> both v7x TCs busy
    )(patches, params['conv_w'], cls_pos,
      params['ln_pre_g'], params['ln_pre_b'],
      params['ln1_g'], params['ln1_b'],
      params['in_proj_w'], params['in_proj_b'],
      params['out_proj_w'], params['out_proj_b'],
      params['ln2_g'], params['ln2_b'],
      params['mlp_fc_w'], params['mlp_fc_b'],
      params['mlp_proj_w'], params['mlp_proj_b'],
      params['ln_post_g'], params['ln_post_b'])


# ------------------------------ parameter init -------------------------------
def init_params(key, in_ch, grid_hw):
    n_tok = grid_hw * grid_hw + 1
    cpp = in_ch * PATCH * PATCH
    cpp_pad = _round_up(cpp, 128)
    ks = iter(jax.random.split(key, 8 + 4 * LAYERS))
    s = WIDTH ** -0.5
    bf16 = jnp.bfloat16

    def nrm(k, shape, scale=0.02):
        return (scale * jax.random.normal(k, shape)).astype(jnp.float32)

    # conv1 as (in, out) matmul; rows >= cpp are zero (K padded 192 -> 256)
    conv_w = jnp.zeros((cpp_pad, WIDTH), jnp.float32)
    conv_w = conv_w.at[:cpp].set(nrm(next(ks), (cpp, WIDTH)))

    # fold 1/sqrt(head_dim) into the Q columns of in_proj (one-time transform)
    attn_scale = (WIDTH // HEADS) ** -0.5
    in_w = []
    for _ in range(LAYERS):
        w = nrm(next(ks), (WIDTH, 3 * WIDTH))
        w = w.at[:, :WIDTH].multiply(attn_scale)
        in_w.append(w)

    p = {
        'conv_w': conv_w.astype(bf16),
        'class_embedding': nrm(next(ks), (WIDTH,), s),
        'positional_embedding': nrm(next(ks), (n_tok, WIDTH), s),
        'ln_pre_g': jnp.ones((1, WIDTH), jnp.float32),
        'ln_pre_b': jnp.zeros((1, WIDTH), jnp.float32),
        'ln_post_g': jnp.ones((1, WIDTH), jnp.float32),
        'ln_post_b': jnp.zeros((1, WIDTH), jnp.float32),
        'proj': nrm(next(ks), (WIDTH, EMBED_DIM), s),
        'fc_w': nrm(next(ks), (EMBED_DIM, NUM_CLASSES)),
        'fc_b': jnp.zeros((NUM_CLASSES,), jnp.float32),
        # per-layer weights stacked on a leading LAYERS axis (loaded in-kernel)
        'ln1_g': jnp.ones((LAYERS, 1, WIDTH), jnp.float32),
        'ln1_b': jnp.zeros((LAYERS, 1, WIDTH), jnp.float32),
        'in_proj_w': jnp.stack(in_w).astype(bf16),
        'in_proj_b': jnp.zeros((LAYERS, 1, 3 * WIDTH), jnp.float32),
        'out_proj_w': jnp.stack([nrm(next(ks), (WIDTH, WIDTH))
                                 for _ in range(LAYERS)]).astype(bf16),
        'out_proj_b': jnp.zeros((LAYERS, 1, WIDTH), jnp.float32),
        'ln2_g': jnp.ones((LAYERS, 1, WIDTH), jnp.float32),
        'ln2_b': jnp.zeros((LAYERS, 1, WIDTH), jnp.float32),
        'mlp_fc_w': jnp.stack([nrm(next(ks), (WIDTH, 4 * WIDTH))
                               for _ in range(LAYERS)]).astype(bf16),
        'mlp_fc_b': jnp.zeros((LAYERS, 1, 4 * WIDTH), jnp.float32),
        'mlp_proj_w': jnp.stack([nrm(next(ks), (4 * WIDTH, WIDTH))
                                 for _ in range(LAYERS)]).astype(bf16),
        'mlp_proj_b': jnp.zeros((LAYERS, 1, WIDTH), jnp.float32),
    }
    return p


# ------------------------------ forward pass ---------------------------------
def encode_image(params, x):
    B, C, H, Wimg = x.shape
    gh, gw = H // PATCH, Wimg // PATCH
    n_patch = gh * gw
    n_tok = n_patch + 1
    t_pad = _round_up(n_tok, 8)            # 17 -> 24: (8,128)-aligned token dim
    cpp = C * PATCH * PATCH
    cpp_pad = _round_up(cpp, 128)          # 192 -> 256: clean MXU K passes

    # patchify (stride-PATCH conv with no bias), insert zero CLS row, pad tokens
    # to a multiple of 8 and the contraction dim to a multiple of 128.
    patches = (x.reshape(B, C, gh, PATCH, gw, PATCH)
                .transpose(0, 2, 4, 1, 3, 5)
                .reshape(B, n_patch, cpp))
    patches = jnp.pad(patches, ((0, 0), (1, t_pad - n_tok), (0, cpp_pad - cpp)))

    pos = params['positional_embedding']
    cls_row = (params['class_embedding'] + pos[0])[None, :]
    cls_pos = jnp.concatenate(
        [cls_row, pos[1:], jnp.zeros((t_pad - n_tok, WIDTH), jnp.float32)], axis=0)

    # batch merged into matmul M; keep 2 parallel programs when B is even (v7x)
    b_blk = B // 2 if (B % 2 == 0 and B >= 2) else B

    seq = vit_encoder(params, patches, cls_pos, n_tok, b_blk)   # (B, 1, WIDTH)
    cls = seq[:, 0, :]                                          # post-LN CLS token
    # Trivial tail (B x 128 @ 128 x 32): plain XLA dot, not a Pallas kernel.
    return jnp.dot(cls, params['proj'])


def clip_model_forward(params, x, return_feature=False):
    feats = encode_image(params, x)
    if return_feature:
        return feats
    # fc head (B x 32 @ 32 x 1): plain XLA dot.
    return jnp.dot(feats, params['fc_w']) + params['fc_b']


# ---------------------------------- main --------------------------------------
if __name__ == "__main__":
    key = jax.random.PRNGKey(0)
    k_param, k_data = jax.random.split(key)

    B, C, H, W = 4, 3, 32, 32             # small NCHW images (2 programs x 2 merged)
    x = jax.random.normal(k_data, (B, C, H, W), dtype=jnp.float32)

    params = init_params(k_param, in_ch=C, grid_hw=H // PATCH)

    fwd = jax.jit(functools.partial(clip_model_forward, params))
    logits = fwd(x)
    jax.block_until_ready(logits)
    assert logits.shape == (B, NUM_CLASSES)

    feats = jax.jit(functools.partial(clip_model_forward, params,
                                      return_feature=True))(x)
    jax.block_until_ready(feats)
    assert feats.shape == (B, EMBED_DIM)

    print("KERNEL_OK")
</pallas_src>

<mosaic_0001>
module attributes {stable_mosaic.version = 11 : i64} {
  func.func @_vit_encoder_kernel(%arg0: i32, %arg1: memref<2x24x256xf32, #tpu.memory_space<vmem>>, %arg2: memref<256x128xbf16, #tpu.memory_space<vmem>>, %arg3: memref<24x128xf32, #tpu.memory_space<vmem>>, %arg4: memref<1x128xf32, #tpu.memory_space<vmem>>, %arg5: memref<1x128xf32, #tpu.memory_space<vmem>>, %arg6: memref<2x1x128xf32, #tpu.memory_space<vmem>>, %arg7: memref<2x1x128xf32, #tpu.memory_space<vmem>>, %arg8: memref<2x128x384xbf16, #tpu.memory_space<vmem>>, %arg9: memref<2x1x384xf32, #tpu.memory_space<vmem>>, %arg10: memref<2x128x128xbf16, #tpu.memory_space<vmem>>, %arg11: memref<2x1x128xf32, #tpu.memory_space<vmem>>, %arg12: memref<2x1x128xf32, #tpu.memory_space<vmem>>, %arg13: memref<2x1x128xf32, #tpu.memory_space<vmem>>, %arg14: memref<2x128x512xbf16, #tpu.memory_space<vmem>>, %arg15: memref<2x1x512xf32, #tpu.memory_space<vmem>>, %arg16: memref<2x512x128xbf16, #tpu.memory_space<vmem>>, %arg17: memref<2x1x128xf32, #tpu.memory_space<vmem>>, %arg18: memref<1x128xf32, #tpu.memory_space<vmem>>, %arg19: memref<1x128xf32, #tpu.memory_space<vmem>>, %arg20: memref<2x1x128xf32, #tpu.memory_space<vmem>>) attributes {dimension_semantics = [#tpu.dimension_semantics<parallel>], iteration_bounds = array<i64: 2>, scalar_prefetch = 0 : i64, scratch_operands = 0 : i64, tpu.core_type = #tpu.core_type<tc>, window_params = [{transform_indices = @transform_0, window_bounds = array<i64: 2, 24, 256>}, {pipeline_mode = #tpu.pipeline_mode<synchronous>, transform_indices = @transform_1, window_bounds = array<i64: 256, 128>}, {pipeline_mode = #tpu.pipeline_mode<synchronous>, transform_indices = @transform_2, window_bounds = array<i64: 24, 128>}, {pipeline_mode = #tpu.pipeline_mode<synchronous>, transform_indices = @transform_3, window_bounds = array<i64: 1, 128>}, {pipeline_mode = #tpu.pipeline_mode<synchronous>, transform_indices = @transform_4, window_bounds = array<i64: 1, 128>}, {pipeline_mode = #tpu.pipeline_mode<synchronous>, transform_indices = @transform_5, window_bounds = array<i64: 2, 1, 128>}, {pipeline_mode = #tpu.pipeline_mode<synchronous>, transform_indices = @transform_6, window_bounds = array<i64: 2, 1, 128>}, {pipeline_mode = #tpu.pipeline_mode<synchronous>, transform_indices = @transform_7, window_bounds = array<i64: 2, 128, 384>}, {pipeline_mode = #tpu.pipeline_mode<synchronous>, transform_indices = @transform_8, window_bounds = array<i64: 2, 1, 384>}, {pipeline_mode = #tpu.pipeline_mode<synchronous>, transform_indices = @transform_9, window_bounds = array<i64: 2, 128, 128>}, {pipeline_mode = #tpu.pipeline_mode<synchronous>, transform_indices = @transform_10, window_bounds = array<i64: 2, 1, 128>}, {pipeline_mode = #tpu.pipeline_mode<synchronous>, transform_indices = @transform_11, window_bounds = array<i64: 2, 1, 128>}, {pipeline_mode = #tpu.pipeline_mode<synchronous>, transform_indices = @transform_12, window_bounds = array<i64: 2, 1, 128>}, {pipeline_mode = #tpu.pipeline_mode<synchronous>, transform_indices = @transform_13, window_bounds = array<i64: 2, 128, 512>}, {pipeline_mode = #tpu.pipeline_mode<synchronous>, transform_indices = @transform_14, window_bounds = array<i64: 2, 1, 512>}, {pipeline_mode = #tpu.pipeline_mode<synchronous>, transform_indices = @transform_15, window_bounds = array<i64: 2, 512, 128>}, {pipeline_mode = #tpu.pipeline_mode<synchronous>, transform_indices = @transform_16, window_bounds = array<i64: 2, 1, 128>}, {pipeline_mode = #tpu.pipeline_mode<synchronous>, transform_indices = @transform_17, window_bounds = array<i64: 1, 128>}, {pipeline_mode = #tpu.pipeline_mode<synchronous>, transform_indices = @transform_18, window_bounds = array<i64: 1, 128>}, {transform_indices = @transform_19, window_bounds = array<i64: 2, 1, 128>}]} {
    %c0 = arith.constant 0 : index
    %c0_0 = arith.constant 0 : index
    %c0_1 = arith.constant 0 : index
    %0 = vector.load %arg1[%c0, %c0_0, %c0_1] : memref<2x24x256xf32, #tpu.memory_space<vmem>>, vector<2x24x256xf32>
    %1 = vector.shape_cast %0 : vector<2x24x256xf32> to vector<48x256xf32>
    %2 = arith.truncf %1 : vector<48x256xf32> to vector<48x256xbf16>
    %c0_2 = arith.constant 0 : index
    %c0_3 = arith.constant 0 : index
    %3 = vector.load %arg2[%c0_2, %c0_3] : memref<256x128xbf16, #tpu.memory_space<vmem>>, vector<256x128xbf16>
    %cst = arith.constant dense<0.000000e+00> : vector<48x128xf32>
    %4 = tpu.matmul %2, %3, %cst {dimension_numbers = #tpu.dot_dimension_numbers<[1], [0], [0], [1], [0, 0, 1, 1], [], []>} : vector<48x256xbf16>, vector<256x128xbf16>, vector<48x128xf32> -> vector<48x128xf32>
    %c0_4 = arith.constant 0 : index
    %c0_5 = arith.constant 0 : index
    %5 = vector.load %arg3[%c0_4, %c0_5] : memref<24x128xf32, #tpu.memory_space<vmem>>, vector<24x128xf32>
    %6 = tpu.concatenate %5, %5 in 0 : vector<24x128xf32>, vector<24x128xf32> -> vector<48x128xf32>
    %7 = arith.addf %4, %6 : vector<48x128xf32>
    %c0_6 = arith.constant 0 : index
    %c0_7 = arith.constant 0 : index
    %8 = vector.load %arg4[%c0_6, %c0_7] : memref<1x128xf32, #tpu.memory_space<vmem>>, vector<1x128xf32>
    %c0_8 = arith.constant 0 : index
    %c0_9 = arith.constant 0 : index
    %9 = vector.load %arg5[%c0_8, %c0_9] : memref<1x128xf32, #tpu.memory_space<vmem>>, vector<1x128xf32>
    %cst_10 = arith.constant dense<0.000000e+00> : vector<48xf32>
    %10 = vector.multi_reduction <add>, %7, %cst_10 [1] : vector<48x128xf32> to vector<48xf32>
    %11 = vector.shape_cast %10 : vector<48xf32> to vector<48x1xf32>
    %cst_11 = arith.constant 1.280000e+02 : f32
    %12 = vector.broadcast %cst_11 : f32 to vector<48x1xf32>
    %13 = arith.divf %11, %12 : vector<48x1xf32>
    %14 = vector.broadcast %13 : vector<48x1xf32> to vector<48x128xf32>
    %15 = arith.subf %7, %14 : vector<48x128xf32>
    %16 = arith.mulf %15, %15 : vector<48x128xf32>
    %cst_12 = arith.constant dense<0.000000e+00> : vector<48xf32>
    %17 = vector.multi_reduction <add>, %16, %cst_12 [1] : vector<48x128xf32> to vector<48xf32>
    %18 = vector.shape_cast %17 : vector<48xf32> to vector<48x1xf32>
    %cst_13 = arith.constant 1.280000e+02 : f32
    %19 = vector.broadcast %cst_13 : f32 to vector<48x1xf32>
    %20 = arith.divf %18, %19 : vector<48x1xf32>
    %cst_14 = arith.constant 9.99999974E-6 : f32
    %21 = vector.broadcast %cst_14 : f32 to vector<48x1xf32>
    %22 = arith.addf %20, %21 : vector<48x1xf32>
    %23 = math.rsqrt %22 : vector<48x1xf32>
    %24 = vector.broadcast %23 : vector<48x1xf32> to vector<48x128xf32>
    %25 = arith.mulf %15, %24 : vector<48x128xf32>
    %26 = vector.broadcast %8 : vector<1x128xf32> to vector<48x128xf32>
    %27 = arith.mulf %25, %26 : vector<48x128xf32>
    %28 = vector.broadcast %9 : vector<1x128xf32> to vector<48x128xf32>
    %29 = arith.addf %27, %28 : vector<48x128xf32>
    %30 = tpu.iota {dimensions = array<i32: 1>} : vector<96x24xi32>
    %c17_i32 = arith.constant 17 : i32
    %31 = vector.broadcast %c17_i32 : i32 to vector<96x24xi32>
    %32 = arith.cmpi slt, %30, %31 : vector<96x24xi32>
    %33 = tpu.iota {dimensions = array<i32: 1>} : vector<24x128xi32>
    %c0_i32 = arith.constant 0 : i32
    %34 = vector.broadcast %c0_i32 : i32 to vector<24x128xi32>
    %35 = arith.cmpi sge, %33, %34 : vector<24x128xi32>
    %c32_i32 = arith.constant 32 : i32
    %36 = vector.broadcast %c32_i32 : i32 to vector<24x128xi32>
    %37 = arith.cmpi slt, %33, %36 : vector<24x128xi32>
    %38 = arith.andi %35, %37 : vector<24x128xi1>
    %cst_15 = arith.constant 1.000000e+00 : f32
    %cst_16 = arith.constant 0.000000e+00 : f32
    %39 = vector.broadcast %cst_15 : f32 to vector<24x128xf32>
    %40 = vector.broadcast %cst_16 : f32 to vector<24x128xf32>
    %41 = arith.select %38, %39, %40 : vector<24x128xi1>, vector<24x128xf32>
    %c32_i32_17 = arith.constant 32 : i32
    %42 = vector.broadcast %c32_i32_17 : i32 to vector<24x128xi32>
    %43 = arith.cmpi sge, %33, %42 : vector<24x128xi32>
    %c64_i32 = arith.constant 64 : i32
    %44 = vector.broadcast %c64_i32 : i32 to vector<24x128xi32>
    %45 = arith.cmpi slt, %33, %44 : vector<24x128xi32>
    %46 = arith.andi %43, %45 : vector<24x128xi1>
    %cst_18 = arith.constant 1.000000e+00 : f32
    %cst_19 = arith.constant 0.000000e+00 : f32
    %47 = vector.broadcast %cst_18 : f32 to vector<24x128xf32>
    %48 = vector.broadcast %cst_19 : f32 to vector<24x128xf32>
    %49 = arith.select %46, %47, %48 : vector<24x128xi1>, vector<24x128xf32>
    %c64_i32_20 = arith.constant 64 : i32
    %50 = vector.broadcast %c64_i32_20 : i32 to vector<24x128xi32>
    %51 = arith.cmpi sge, %33, %50 : vector<24x128xi32>
    %c96_i32 = arith.constant 96 : i32
    %52 = vector.broadcast %c96_i32 : i32 to vector<24x128xi32>
    %53 = arith.cmpi slt, %33, %52 : vector<24x128xi32>
    %54 = arith.andi %51, %53 : vector<24x128xi1>
    %cst_21 = arith.constant 1.000000e+00 : f32
    %cst_22 = arith.constant 0.000000e+00 : f32
    %55 = vector.broadcast %cst_21 : f32 to vector<24x128xf32>
    %56 = vector.broadcast %cst_22 : f32 to vector<24x128xf32>
    %57 = arith.select %54, %55, %56 : vector<24x128xi1>, vector<24x128xf32>
    %c96_i32_23 = arith.constant 96 : i32
    %58 = vector.broadcast %c96_i32_23 : i32 to vector<24x128xi32>
    %59 = arith.cmpi sge, %33, %58 : vector<24x128xi32>
    %c128_i32 = arith.constant 128 : i32
    %60 = vector.broadcast %c128_i32 : i32 to vector<24x128xi32>
    %61 = arith.cmpi slt, %33, %60 : vector<24x128xi32>
    %62 = arith.andi %59, %61 : vector<24x128xi1>
    %cst_24 = arith.constant 1.000000e+00 : f32
    %cst_25 = arith.constant 0.000000e+00 : f32
    %63 = vector.broadcast %cst_24 : f32 to vector<24x128xf32>
    %64 = vector.broadcast %cst_25 : f32 to vector<24x128xf32>
    %65 = arith.select %62, %63, %64 : vector<24x128xi1>, vector<24x128xf32>
    %66 = tpu.concatenate %41, %49, %57, %65 in 0 : vector<24x128xf32>, vector<24x128xf32>, vector<24x128xf32>, vector<24x128xf32> -> vector<96x128xf32>
    %c0_26 = arith.constant 0 : index
    %c0_27 = arith.constant 0 : index
    %c0_28 = arith.constant 0 : index
    %67 = vector.load %arg6[%c0_26, %c0_27, %c0_28] : memref<2x1x128xf32, #tpu.memory_space<vmem>>, vector<1x1x128xf32>
    %68 = vector.shape_cast %67 : vector<1x1x128xf32> to vector<1x128xf32>
    %c0_29 = arith.constant 0 : index
    %c0_30 = arith.constant 0 : index
    %c0_31 = arith.constant 0 : index
    %69 = vector.load %arg7[%c0_29, %c0_30, %c0_31] : memref<2x1x128xf32, #tpu.memory_space<vmem>>, vector<1x1x128xf32>
    %70 = vector.shape_cast %69 : vector<1x1x128xf32> to vector<1x128xf32>
    %cst_32 = arith.constant dense<0.000000e+00> : vector<48xf32>
    %71 = vector.multi_reduction <add>, %29, %cst_32 [1] : vector<48x128xf32> to vector<48xf32>
    %72 = vector.shape_cast %71 : vector<48xf32> to vector<48x1xf32>
    %cst_33 = arith.constant 1.280000e+02 : f32
    %73 = vector.broadcast %cst_33 : f32 to vector<48x1xf32>
    %74 = arith.divf %72, %73 : vector<48x1xf32>
    %75 = vector.broadcast %74 : vector<48x1xf32> to vector<48x128xf32>
    %76 = arith.subf %29, %75 : vector<48x128xf32>
    %77 = arith.mulf %76, %76 : vector<48x128xf32>
    %cst_34 = arith.constant dense<0.000000e+00> : vector<48xf32>
    %78 = vector.multi_reduction <add>, %77, %cst_34 [1] : vector<48x128xf32> to vector<48xf32>
    %79 = vector.shape_cast %78 : vector<48xf32> to vector<48x1xf32>
    %cst_35 = arith.constant 1.280000e+02 : f32
    %80 = vector.broadcast %cst_35 : f32 to vector<48x1xf32>
    %81 = arith.divf %79, %80 : vector<48x1xf32>
    %cst_36 = arith.constant 9.99999974E-6 : f32
    %82 = vector.broadcast %cst_36 : f32 to vector<48x1xf32>
    %83 = arith.addf %81, %82 : vector<48x1xf32>
    %84 = math.rsqrt %83 : vector<48x1xf32>
    %85 = vector.broadcast %84 : vector<48x1xf32> to vector<48x128xf32>
    %86 = arith.mulf %76, %85 : vector<48x128xf32>
    %87 = vector.broadcast %68 : vector<1x128xf32> to vector<48x128xf32>
    %88 = arith.mulf %86, %87 : vector<48x128xf32>
    %89 = vector.broadcast %70 : vector<1x128xf32> to vector<48x128xf32>
    %90 = arith.addf %88, %89 : vector<48x128xf32>
    %91 = arith.truncf %90 : vector<48x128xf32> to vector<48x128xbf16>
    %c0_37 = arith.constant 0 : index
    %c0_38 = arith.constant 0 : index
    %c0_39 = arith.constant 0 : index
    %92 = vector.load %arg8[%c0_37, %c0_38, %c0_39] : memref<2x128x384xbf16, #tpu.memory_space<vmem>>, vector<1x128x384xbf16>
    %93 = vector.shape_cast %92 : vector<1x128x384xbf16> to vector<128x384xbf16>
    %cst_40 = arith.constant dense<0.000000e+00> : vector<48x384xf32>
    %94 = tpu.matmul %91, %93, %cst_40 {dimension_numbers = #tpu.dot_dimension_numbers<[1], [0], [0], [1], [0, 0, 1, 1], [], []>} : vector<48x128xbf16>, vector<128x384xbf16>, vector<48x384xf32> -> vector<48x384xf32>
    %c0_41 = arith.constant 0 : index
    %c0_42 = arith.constant 0 : index
    %c0_43 = arith.constant 0 : index
    %95 = vector.load %arg9[%c0_41, %c0_42, %c0_43] : memref<2x1x384xf32, #tpu.memory_space<vmem>>, vector<1x1x384xf32>
    %96 = vector.shape_cast %95 : vector<1x1x384xf32> to vector<1x384xf32>
    %97 = vector.broadcast %96 : vector<1x384xf32> to vector<48x384xf32>
    %98 = arith.addf %94, %97 : vector<48x384xf32>
    %99 = vector.extract_strided_slice %98 {offsets = [0, 0], sizes = [24, 128], strides = [1, 1]} : vector<48x384xf32> to vector<24x128xf32>
    %100 = vector.extract_strided_slice %98 {offsets = [0, 128], sizes = [24, 128], strides = [1, 1]} : vector<48x384xf32> to vector<24x128xf32>
    %101 = vector.extract_strided_slice %98 {offsets = [0, 256], sizes = [24, 128], strides = [1, 1]} : vector<48x384xf32> to vector<24x128xf32>
    %102 = tpu.concatenate %99, %99, %99, %99 in 0 : vector<24x128xf32>, vector<24x128xf32>, vector<24x128xf32>, vector<24x128xf32> -> vector<96x128xf32>
    %103 = arith.mulf %102, %66 : vector<96x128xf32>
    %104 = arith.truncf %103 : vector<96x128xf32> to vector<96x128xbf16>
    %105 = arith.truncf %100 : vector<24x128xf32> to vector<24x128xbf16>
    %cst_44 = arith.constant dense<0.000000e+00> : vector<96x24xf32>
    %106 = tpu.matmul %104, %105, %cst_44 {dimension_numbers = #tpu.dot_dimension_numbers<[1], [1], [0], [0], [0, 0, 1, 0], [], []>} : vector<96x128xbf16>, vector<24x128xbf16>, vector<96x24xf32> -> vector<96x24xf32>
    %cst_45 = arith.constant -1.000000e+30 : f32
    %107 = vector.broadcast %cst_45 : f32 to vector<96x24xf32>
    %108 = arith.select %32, %106, %107 : vector<96x24xi1>, vector<96x24xf32>
    %cst_46 = arith.constant dense<0xFF800000> : vector<96xf32>
    %109 = vector.multi_reduction <maximumf>, %108, %cst_46 [1] : vector<96x24xf32> to vector<96xf32>
    %110 = vector.shape_cast %109 : vector<96xf32> to vector<96x1xf32>
    %111 = vector.broadcast %110 : vector<96x1xf32> to vector<96x24xf32>
    %112 = arith.subf %108, %111 : vector<96x24xf32>
    %113 = math.exp %112 : vector<96x24xf32>
    %cst_47 = arith.constant dense<0.000000e+00> : vector<96xf32>
    %114 = vector.multi_reduction <add>, %113, %cst_47 [1] : vector<96x24xf32> to vector<96xf32>
    %115 = vector.shape_cast %114 : vector<96xf32> to vector<96x1xf32>
    %116 = tpu.reciprocal %115 {approx = true} : vector<96x1xf32> -> vector<96x1xf32>
    %117 = vector.broadcast %116 : vector<96x1xf32> to vector<96x24xf32>
    %118 = arith.mulf %113, %117 : vector<96x24xf32>
    %119 = arith.truncf %118 : vector<96x24xf32> to vector<96x24xbf16>
    %120 = arith.truncf %101 : vector<24x128xf32> to vector<24x128xbf16>
    %cst_48 = arith.constant dense<0.000000e+00> : vector<96x128xf32>
    %121 = tpu.matmul %119, %120, %cst_48 {dimension_numbers = #tpu.dot_dimension_numbers<[1], [0], [0], [1], [0, 0, 1, 1], [], []>} : vector<96x24xbf16>, vector<24x128xbf16>, vector<96x128xf32> -> vector<96x128xf32>
    %122 = arith.mulf %121, %66 : vector<96x128xf32>
    %123 = vector.extract_strided_slice %122 {offsets = [0, 0], sizes = [24, 128], strides = [1, 1]} : vector<96x128xf32> to vector<24x128xf32>
    %124 = vector.extract_strided_slice %122 {offsets = [24, 0], sizes = [24, 128], strides = [1, 1]} : vector<96x128xf32> to vector<24x128xf32>
    %125 = arith.addf %123, %124 : vector<24x128xf32>
    %126 = vector.extract_strided_slice %122 {offsets = [48, 0], sizes = [24, 128], strides = [1, 1]} : vector<96x128xf32> to vector<24x128xf32>
    %127 = arith.addf %125, %126 : vector<24x128xf32>
    %128 = vector.extract_strided_slice %122 {offsets = [72, 0], sizes = [24, 128], strides = [1, 1]} : vector<96x128xf32> to vector<24x128xf32>
    %129 = arith.addf %127, %128 : vector<24x128xf32>
    %130 = vector.extract_strided_slice %98 {offsets = [24, 0], sizes = [24, 128], strides = [1, 1]} : vector<48x384xf32> to vector<24x128xf32>
    %131 = vector.extract_strided_slice %98 {offsets = [24, 128], sizes = [24, 128], strides = [1, 1]} : vector<48x384xf32> to vector<24x128xf32>
    %132 = vector.extract_strided_slice %98 {offsets = [24, 256], sizes = [24, 128], strides = [1, 1]} : vector<48x384xf32> to vector<24x128xf32>
    %133 = tpu.concatenate %130, %130, %130, %130 in 0 : vector<24x128xf32>, vector<24x128xf32>, vector<24x128xf32>, vector<24x128xf32> -> vector<96x128xf32>
    %134 = arith.mulf %133, %66 : vector<96x128xf32>
    %135 = arith.truncf %134 : vector<96x128xf32> to vector<96x128xbf16>
    %136 = arith.truncf %131 : vector<24x128xf32> to vector<24x128xbf16>
    %cst_49 = arith.constant dense<0.000000e+00> : vector<96x24xf32>
    %137 = tpu.matmul %135, %136, %cst_49 {dimension_numbers = #tpu.dot_dimension_numbers<[1], [1], [0], [0], [0, 0, 1, 0], [], []>} : vector<96x128xbf16>, vector<24x128xbf16>, vector<96x24xf32> -> vector<96x24xf32>
    %cst_50 = arith.constant -1.000000e+30 : f32
    %138 = vector.broadcast %cst_50 : f32 to vector<96x24xf32>
    %139 = arith.select %32, %137, %138 : vector<96x24xi1>, vector<96x24xf32>
    %cst_51 = arith.constant dense<0xFF800000> : vector<96xf32>
    %140 = vector.multi_reduction <maximumf>, %139, %cst_51 [1] : vector<96x24xf32> to vector<96xf32>
    %141 = vector.shape_cast %140 : vector<96xf32> to vector<96x1xf32>
    %142 = vector.broadcast %141 : vector<96x1xf32> to vector<96x24xf32>
    %143 = arith.subf %139, %142 : vector<96x24xf32>
    %144 = math.exp %143 : vector<96x24xf32>
    %cst_52 = arith.constant dense<0.000000e+00> : vector<96xf32>
    %145 = vector.multi_reduction <add>, %144, %cst_52 [1] : vector<96x24xf32> to vector<96xf32>
    %146 = vector.shape_cast %145 : vector<96xf32> to vector<96x1xf32>
    %147 = tpu.reciprocal %146 {approx = true} : vector<96x1xf32> -> vector<96x1xf32>
    %148 = vector.broadcast %147 : vector<96x1xf32> to vector<96x24xf32>
    %149 = arith.mulf %144, %148 : vector<96x24xf32>
    %150 = arith.truncf %149 : vector<96x24xf32> to vector<96x24xbf16>
    %151 = arith.truncf %132 : vector<24x128xf32> to vector<24x128xbf16>
    %cst_53 = arith.constant dense<0.000000e+00> : vector<96x128xf32>
    %152 = tpu.matmul %150, %151, %cst_53 {dimension_numbers = #tpu.dot_dimension_numbers<[1], [0], [0], [1], [0, 0, 1, 1], [], []>} : vector<96x24xbf16>, vector<24x128xbf16>, vector<96x128xf32> -> vector<96x128xf32>
    %153 = arith.mulf %152, %66 : vector<96x128xf32>
    %154 = vector.extract_strided_slice %153 {offsets = [0, 0], sizes = [24, 128], strides = [1, 1]} : vector<96x128xf32> to vector<24x128xf32>
    %155 = vector.extract_strided_slice %153 {offsets = [24, 0], sizes = [24, 128], strides = [1, 1]} : vector<96x128xf32> to vector<24x128xf32>
    %156 = arith.addf %154, %155 : vector<24x128xf32>
    %157 = vector.extract_strided_slice %153 {offsets = [48, 0], sizes = [24, 128], strides = [1, 1]} : vector<96x128xf32> to vector<24x128xf32>
    %158 = arith.addf %156, %157 : vector<24x128xf32>
    %159 = vector.extract_strided_slice %153 {offsets = [72, 0], sizes = [24, 128], strides = [1, 1]} : vector<96x128xf32> to vector<24x128xf32>
    %160 = arith.addf %158, %159 : vector<24x128xf32>
    %161 = tpu.concatenate %129, %160 in 0 : vector<24x128xf32>, vector<24x128xf32> -> vector<48x128xf32>
    %162 = arith.truncf %161 : vector<48x128xf32> to vector<48x128xbf16>
    %c0_54 = arith.constant 0 : index
    %c0_55 = arith.constant 0 : index
    %c0_56 = arith.constant 0 : index
    %163 = vector.load %arg10[%c0_54, %c0_55, %c0_56] : memref<2x128x128xbf16, #tpu.memory_space<vmem>>, vector<1x128x128xbf16>
    %164 = vector.shape_cast %163 : vector<1x128x128xbf16> to vector<128x128xbf16>
    %cst_57 = arith.constant dense<0.000000e+00> : vector<48x128xf32>
    %165 = tpu.matmul %162, %164, %cst_57 {dimension_numbers = #tpu.dot_dimension_numbers<[1], [0], [0], [1], [0, 0, 1, 1], [], []>} : vector<48x128xbf16>, vector<128x128xbf16>, vector<48x128xf32> -> vector<48x128xf32>
    %c0_58 = arith.constant 0 : index
    %c0_59 = arith.constant 0 : index
    %c0_60 = arith.constant 0 : index
    %166 = vector.load %arg11[%c0_58, %c0_59, %c0_60] : memref<2x1x128xf32, #tpu.memory_space<vmem>>, vector<1x1x128xf32>
    %167 = vector.shape_cast %166 : vector<1x1x128xf32> to vector<1x128xf32>
    %168 = vector.broadcast %167 : vector<1x128xf32> to vector<48x128xf32>
    %169 = arith.addf %165, %168 : vector<48x128xf32>
    %170 = arith.addf %29, %169 : vector<48x128xf32>
    %c0_61 = arith.constant 0 : index
    %c0_62 = arith.constant 0 : index
    %c0_63 = arith.constant 0 : index
    %171 = vector.load %arg12[%c0_61, %c0_62, %c0_63] : memref<2x1x128xf32, #tpu.memory_space<vmem>>, vector<1x1x128xf32>
    %172 = vector.shape_cast %171 : vector<1x1x128xf32> to vector<1x128xf32>
    %c0_64 = arith.constant 0 : index
    %c0_65 = arith.constant 0 : index
    %c0_66 = arith.constant 0 : index
    %173 = vector.load %arg13[%c0_64, %c0_65, %c0_66] : memref<2x1x128xf32, #tpu.memory_space<vmem>>, vector<1x1x128xf32>
    %174 = vector.shape_cast %173 : vector<1x1x128xf32> to vector<1x128xf32>
    %cst_67 = arith.constant dense<0.000000e+00> : vector<48xf32>
    %175 = vector.multi_reduction <add>, %170, %cst_67 [1] : vector<48x128xf32> to vector<48xf32>
    %176 = vector.shape_cast %175 : vector<48xf32> to vector<48x1xf32>
    %cst_68 = arith.constant 1.280000e+02 : f32
    %177 = vector.broadcast %cst_68 : f32 to vector<48x1xf32>
    %178 = arith.divf %176, %177 : vector<48x1xf32>
    %179 = vector.broadcast %178 : vector<48x1xf32> to vector<48x128xf32>
    %180 = arith.subf %170, %179 : vector<48x128xf32>
    %181 = arith.mulf %180, %180 : vector<48x128xf32>
    %cst_69 = arith.constant dense<0.000000e+00> : vector<48xf32>
    %182 = vector.multi_reduction <add>, %181, %cst_69 [1] : vector<48x128xf32> to vector<48xf32>
    %183 = vector.shape_cast %182 : vector<48xf32> to vector<48x1xf32>
    %cst_70 = arith.constant 1.280000e+02 : f32
    %184 = vector.broadcast %cst_70 : f32 to vector<48x1xf32>
    %185 = arith.divf %183, %184 : vector<48x1xf32>
    %cst_71 = arith.constant 9.99999974E-6 : f32
    %186 = vector.broadcast %cst_71 : f32 to vector<48x1xf32>
    %187 = arith.addf %185, %186 : vector<48x1xf32>
    %188 = math.rsqrt %187 : vector<48x1xf32>
    %189 = vector.broadcast %188 : vector<48x1xf32> to vector<48x128xf32>
    %190 = arith.mulf %180, %189 : vector<48x128xf32>
    %191 = vector.broadcast %172 : vector<1x128xf32> to vector<48x128xf32>
    %192 = arith.mulf %190, %191 : vector<48x128xf32>
    %193 = vector.broadcast %174 : vector<1x128xf32> to vector<48x128xf32>
    %194 = arith.addf %192, %193 : vector<48x128xf32>
    %195 = arith.truncf %194 : vector<48x128xf32> to vector<48x128xbf16>
    %c0_72 = arith.constant 0 : index
    %c0_73 = arith.constant 0 : index
    %c0_74 = arith.constant 0 : index
    %196 = vector.load %arg14[%c0_72, %c0_73, %c0_74] : memref<2x128x512xbf16, #tpu.memory_space<vmem>>, vector<1x128x512xbf16>
    %197 = vector.shape_cast %196 : vector<1x128x512xbf16> to vector<128x512xbf16>
    %cst_75 = arith.constant dense<0.000000e+00> : vector<48x512xf32>
    %198 = tpu.matmul %195, %197, %cst_75 {dimension_numbers = #tpu.dot_dimension_numbers<[1], [0], [0], [1], [0, 0, 1, 1], [], []>} : vector<48x128xbf16>, vector<128x512xbf16>, vector<48x512xf32> -> vector<48x512xf32>
    %c0_76 = arith.constant 0 : index
    %c0_77 = arith.constant 0 : index
    %c0_78 = arith.constant 0 : index
    %199 = vector.load %arg15[%c0_76, %c0_77, %c0_78] : memref<2x1x512xf32, #tpu.memory_space<vmem>>, vector<1x1x512xf32>
    %200 = vector.shape_cast %199 : vector<1x1x512xf32> to vector<1x512xf32>
    %201 = vector.broadcast %200 : vector<1x512xf32> to vector<48x512xf32>
    %202 = arith.addf %198, %201 : vector<48x512xf32>
    %cst_79 = arith.constant 1.702000e+00 : f32
    %203 = vector.broadcast %cst_79 : f32 to vector<48x512xf32>
    %204 = arith.mulf %203, %202 : vector<48x512xf32>
    %205 = arith.negf %204 : vector<48x512xf32>
    %206 = math.exp %205 : vector<48x512xf32>
    %cst_80 = arith.constant 1.000000e+00 : f32
    %207 = vector.broadcast %cst_80 : f32 to vector<48x512xf32>
    %208 = arith.addf %207, %206 : vector<48x512xf32>
    %209 = arith.divf %207, %208 : vector<48x512xf32>
    %210 = arith.mulf %202, %209 : vector<48x512xf32>
    %211 = arith.truncf %210 : vector<48x512xf32> to vector<48x512xbf16>
    %c0_81 = arith.constant 0 : index
    %c0_82 = arith.constant 0 : index
    %c0_83 = arith.constant 0 : index
    %212 = vector.load %arg16[%c0_81, %c0_82, %c0_83] : memref<2x512x128xbf16, #tpu.memory_space<vmem>>, vector<1x512x128xbf16>
    %213 = vector.shape_cast %212 : vector<1x512x128xbf16> to vector<512x128xbf16>
    %cst_84 = arith.constant dense<0.000000e+00> : vector<48x128xf32>
    %214 = tpu.matmul %211, %213, %cst_84 {dimension_numbers = #tpu.dot_dimension_numbers<[1], [0], [0], [1], [0, 0, 1, 1], [], []>} : vector<48x512xbf16>, vector<512x128xbf16>, vector<48x128xf32> -> vector<48x128xf32>
    %c0_85 = arith.constant 0 : index
    %c0_86 = arith.constant 0 : index
    %c0_87 = arith.constant 0 : index
    %215 = vector.load %arg17[%c0_85, %c0_86, %c0_87] : memref<2x1x128xf32, #tpu.memory_space<vmem>>, vector<1x1x128xf32>
    %216 = vector.shape_cast %215 : vector<1x1x128xf32> to vector<1x128xf32>
    %217 = vector.broadcast %216 : vector<1x128xf32> to vector<48x128xf32>
    %218 = arith.addf %214, %217 : vector<48x128xf32>
    %219 = arith.addf %170, %218 : vector<48x128xf32>
    %c1 = arith.constant 1 : index
    %c0_88 = arith.constant 0 : index
    %c0_89 = arith.constant 0 : index
    %220 = vector.load %arg6[%c1, %c0_88, %c0_89] : memref<2x1x128xf32, #tpu.memory_space<vmem>>, vector<1x1x128xf32>
    %221 = vector.shape_cast %220 : vector<1x1x128xf32> to vector<1x128xf32>
    %c1_90 = arith.constant 1 : index
    %c0_91 = arith.constant 0 : index
    %c0_92 = arith.constant 0 : index
    %222 = vector.load %arg7[%c1_90, %c0_91, %c0_92] : memref<2x1x128xf32, #tpu.memory_space<vmem>>, vector<1x1x128xf32>
    %223 = vector.shape_cast %222 : vector<1x1x128xf32> to vector<1x128xf32>
    %cst_93 = arith.constant dense<0.000000e+00> : vector<48xf32>
    %224 = vector.multi_reduction <add>, %219, %cst_93 [1] : vector<48x128xf32> to vector<48xf32>
    %225 = vector.shape_cast %224 : vector<48xf32> to vector<48x1xf32>
    %cst_94 = arith.constant 1.280000e+02 : f32
    %226 = vector.broadcast %cst_94 : f32 to vector<48x1xf32>
    %227 = arith.divf %225, %226 : vector<48x1xf32>
    %228 = vector.broadcast %227 : vector<48x1xf32> to vector<48x128xf32>
    %229 = arith.subf %219, %228 : vector<48x128xf32>
    %230 = arith.mulf %229, %229 : vector<48x128xf32>
    %cst_95 = arith.constant dense<0.000000e+00> : vector<48xf32>
    %231 = vector.multi_reduction <add>, %230, %cst_95 [1] : vector<48x128xf32> to vector<48xf32>
    %232 = vector.shape_cast %231 : vector<48xf32> to vector<48x1xf32>
    %cst_96 = arith.constant 1.280000e+02 : f32
    %233 = vector.broadcast %cst_96 : f32 to vector<48x1xf32>
    %234 = arith.divf %232, %233 : vector<48x1xf32>
    %cst_97 = arith.constant 9.99999974E-6 : f32
    %235 = vector.broadcast %cst_97 : f32 to vector<48x1xf32>
    %236 = arith.addf %234, %235 : vector<48x1xf32>
    %237 = math.rsqrt %236 : vector<48x1xf32>
    %238 = vector.broadcast %237 : vector<48x1xf32> to vector<48x128xf32>
    %239 = arith.mulf %229, %238 : vector<48x128xf32>
    %240 = vector.broadcast %221 : vector<1x128xf32> to vector<48x128xf32>
    %241 = arith.mulf %239, %240 : vector<48x128xf32>
    %242 = vector.broadcast %223 : vector<1x128xf32> to vector<48x128xf32>
    %243 = arith.addf %241, %242 : vector<48x128xf32>
    %244 = arith.truncf %243 : vector<48x128xf32> to vector<48x128xbf16>
    %c1_98 = arith.constant 1 : index
    %c0_99 = arith.constant 0 : index
    %c0_100 = arith.constant 0 : index
    %245 = vector.load %arg8[%c1_98, %c0_99, %c0_100] : memref<2x128x384xbf16, #tpu.memory_space<vmem>>, vector<1x128x384xbf16>
    %246 = vector.shape_cast %245 : vector<1x128x384xbf16> to vector<128x384xbf16>
    %cst_101 = arith.constant dense<0.000000e+00> : vector<48x384xf32>
    %247 = tpu.matmul %244, %246, %cst_101 {dimension_numbers = #tpu.dot_dimension_numbers<[1], [0], [0], [1], [0, 0, 1, 1], [], []>} : vector<48x128xbf16>, vector<128x384xbf16>, vector<48x384xf32> -> vector<48x384xf32>
    %c1_102 = arith.constant 1 : index
    %c0_103 = arith.constant 0 : index
    %c0_104 = arith.constant 0 : index
    %248 = vector.load %arg9[%c1_102, %c0_103, %c0_104] : memref<2x1x384xf32, #tpu.memory_space<vmem>>, vector<1x1x384xf32>
    %249 = vector.shape_cast %248 : vector<1x1x384xf32> to vector<1x384xf32>
    %250 = vector.broadcast %249 : vector<1x384xf32> to vector<48x384xf32>
    %251 = arith.addf %247, %250 : vector<48x384xf32>
    %252 = vector.extract_strided_slice %251 {offsets = [0, 0], sizes = [24, 128], strides = [1, 1]} : vector<48x384xf32> to vector<24x128xf32>
    %253 = vector.extract_strided_slice %251 {offsets = [0, 128], sizes = [24, 128], strides = [1, 1]} : vector<48x384xf32> to vector<24x128xf32>
    %254 = vector.extract_strided_slice %251 {offsets = [0, 256], sizes = [24, 128], strides = [1, 1]} : vector<48x384xf32> to vector<24x128xf32>
    %255 = tpu.concatenate %252, %252, %252, %252 in 0 : vector<24x128xf32>, vector<24x128xf32>, vector<24x128xf32>, vector<24x128xf32> -> vector<96x128xf32>
    %256 = arith.mulf %255, %66 : vector<96x128xf32>
    %257 = arith.truncf %256 : vector<96x128xf32> to vector<96x128xbf16>
    %258 = arith.truncf %253 : vector<24x128xf32> to vector<24x128xbf16>
    %cst_105 = arith.constant dense<0.000000e+00> : vector<96x24xf32>
    %259 = tpu.matmul %257, %258, %cst_105 {dimension_numbers = #tpu.dot_dimension_numbers<[1], [1], [0], [0], [0, 0, 1, 0], [], []>} : vector<96x128xbf16>, vector<24x128xbf16>, vector<96x24xf32> -> vector<96x24xf32>
    %cst_106 = arith.constant -1.000000e+30 : f32
    %260 = vector.broadcast %cst_106 : f32 to vector<96x24xf32>
    %261 = arith.select %32, %259, %260 : vector<96x24xi1>, vector<96x24xf32>
    %cst_107 = arith.constant dense<0xFF800000> : vector<96xf32>
    %262 = vector.multi_reduction <maximumf>, %261, %cst_107 [1] : vector<96x24xf32> to vector<96xf32>
    %263 = vector.shape_cast %262 : vector<96xf32> to vector<96x1xf32>
    %264 = vector.broadcast %263 : vector<96x1xf32> to vector<96x24xf32>
    %265 = arith.subf %261, %264 : vector<96x24xf32>
    %266 = math.exp %265 : vector<96x24xf32>
    %cst_108 = arith.constant dense<0.000000e+00> : vector<96xf32>
    %267 = vector.multi_reduction <add>, %266, %cst_108 [1] : vector<96x24xf32> to vector<96xf32>
    %268 = vector.shape_cast %267 : vector<96xf32> to vector<96x1xf32>
    %269 = tpu.reciprocal %268 {approx = true} : vector<96x1xf32> -> vector<96x1xf32>
    %270 = vector.broadcast %269 : vector<96x1xf32> to vector<96x24xf32>
    %271 = arith.mulf %266, %270 : vector<96x24xf32>
    %272 = arith.truncf %271 : vector<96x24xf32> to vector<96x24xbf16>
    %273 = arith.truncf %254 : vector<24x128xf32> to vector<24x128xbf16>
    %cst_109 = arith.constant dense<0.000000e+00> : vector<96x128xf32>
    %274 = tpu.matmul %272, %273, %cst_109 {dimension_numbers = #tpu.dot_dimension_numbers<[1], [0], [0], [1], [0, 0, 1, 1], [], []>} : vector<96x24xbf16>, vector<24x128xbf16>, vector<96x128xf32> -> vector<96x128xf32>
    %275 = arith.mulf %274, %66 : vector<96x128xf32>
    %276 = vector.extract_strided_slice %275 {offsets = [0, 0], sizes = [24, 128], strides = [1, 1]} : vector<96x128xf32> to vector<24x128xf32>
    %277 = vector.extract_strided_slice %275 {offsets = [24, 0], sizes = [24, 128], strides = [1, 1]} : vector<96x128xf32> to vector<24x128xf32>
    %278 = arith.addf %276, %277 : vector<24x128xf32>
    %279 = vector.extract_strided_slice %275 {offsets = [48, 0], sizes = [24, 128], strides = [1, 1]} : vector<96x128xf32> to vector<24x128xf32>
    %280 = arith.addf %278, %279 : vector<24x128xf32>
    %281 = vector.extract_strided_slice %275 {offsets = [72, 0], sizes = [24, 128], strides = [1, 1]} : vector<96x128xf32> to vector<24x128xf32>
    %282 = arith.addf %280, %281 : vector<24x128xf32>
    %283 = vector.extract_strided_slice %251 {offsets = [24, 0], sizes = [24, 128], strides = [1, 1]} : vector<48x384xf32> to vector<24x128xf32>
    %284 = vector.extract_strided_slice %251 {offsets = [24, 128], sizes = [24, 128], strides = [1, 1]} : vector<48x384xf32> to vector<24x128xf32>
    %285 = vector.extract_strided_slice %251 {offsets = [24, 256], sizes = [24, 128], strides = [1, 1]} : vector<48x384xf32> to vector<24x128xf32>
    %286 = tpu.concatenate %283, %283, %283, %283 in 0 : vector<24x128xf32>, vector<24x128xf32>, vector<24x128xf32>, vector<24x128xf32> -> vector<96x128xf32>
    %287 = arith.mulf %286, %66 : vector<96x128xf32>
    %288 = arith.truncf %287 : vector<96x128xf32> to vector<96x128xbf16>
    %289 = arith.truncf %284 : vector<24x128xf32> to vector<24x128xbf16>
    %cst_110 = arith.constant dense<0.000000e+00> : vector<96x24xf32>
    %290 = tpu.matmul %288, %289, %cst_110 {dimension_numbers = #tpu.dot_dimension_numbers<[1], [1], [0], [0], [0, 0, 1, 0], [], []>} : vector<96x128xbf16>, vector<24x128xbf16>, vector<96x24xf32> -> vector<96x24xf32>
    %cst_111 = arith.constant -1.000000e+30 : f32
    %291 = vector.broadcast %cst_111 : f32 to vector<96x24xf32>
    %292 = arith.select %32, %290, %291 : vector<96x24xi1>, vector<96x24xf32>
    %cst_112 = arith.constant dense<0xFF800000> : vector<96xf32>
    %293 = vector.multi_reduction <maximumf>, %292, %cst_112 [1] : vector<96x24xf32> to vector<96xf32>
    %294 = vector.shape_cast %293 : vector<96xf32> to vector<96x1xf32>
    %295 = vector.broadcast %294 : vector<96x1xf32> to vector<96x24xf32>
    %296 = arith.subf %292, %295 : vector<96x24xf32>
    %297 = math.exp %296 : vector<96x24xf32>
    %cst_113 = arith.constant dense<0.000000e+00> : vector<96xf32>
    %298 = vector.multi_reduction <add>, %297, %cst_113 [1] : vector<96x24xf32> to vector<96xf32>
    %299 = vector.shape_cast %298 : vector<96xf32> to vector<96x1xf32>
    %300 = tpu.reciprocal %299 {approx = true} : vector<96x1xf32> -> vector<96x1xf32>
    %301 = vector.broadcast %300 : vector<96x1xf32> to vector<96x24xf32>
    %302 = arith.mulf %297, %301 : vector<96x24xf32>
    %303 = arith.truncf %302 : vector<96x24xf32> to vector<96x24xbf16>
    %304 = arith.truncf %285 : vector<24x128xf32> to vector<24x128xbf16>
    %cst_114 = arith.constant dense<0.000000e+00> : vector<96x128xf32>
    %305 = tpu.matmul %303, %304, %cst_114 {dimension_numbers = #tpu.dot_dimension_numbers<[1], [0], [0], [1], [0, 0, 1, 1], [], []>} : vector<96x24xbf16>, vector<24x128xbf16>, vector<96x128xf32> -> vector<96x128xf32>
    %306 = arith.mulf %305, %66 : vector<96x128xf32>
    %307 = vector.extract_strided_slice %306 {offsets = [0, 0], sizes = [24, 128], strides = [1, 1]} : vector<96x128xf32> to vector<24x128xf32>
    %308 = vector.extract_strided_slice %306 {offsets = [24, 0], sizes = [24, 128], strides = [1, 1]} : vector<96x128xf32> to vector<24x128xf32>
    %309 = arith.addf %307, %308 : vector<24x128xf32>
    %310 = vector.extract_strided_slice %306 {offsets = [48, 0], sizes = [24, 128], strides = [1, 1]} : vector<96x128xf32> to vector<24x128xf32>
    %311 = arith.addf %309, %310 : vector<24x128xf32>
    %312 = vector.extract_strided_slice %306 {offsets = [72, 0], sizes = [24, 128], strides = [1, 1]} : vector<96x128xf32> to vector<24x128xf32>
    %313 = arith.addf %311, %312 : vector<24x128xf32>
    %314 = tpu.concatenate %282, %313 in 0 : vector<24x128xf32>, vector<24x128xf32> -> vector<48x128xf32>
    %315 = arith.truncf %314 : vector<48x128xf32> to vector<48x128xbf16>
    %c1_115 = arith.constant 1 : index
    %c0_116 = arith.constant 0 : index
    %c0_117 = arith.constant 0 : index
    %316 = vector.load %arg10[%c1_115, %c0_116, %c0_117] : memref<2x128x128xbf16, #tpu.memory_space<vmem>>, vector<1x128x128xbf16>
    %317 = vector.shape_cast %316 : vector<1x128x128xbf16> to vector<128x128xbf16>
    %cst_118 = arith.constant dense<0.000000e+00> : vector<48x128xf32>
    %318 = tpu.matmul %315, %317, %cst_118 {dimension_numbers = #tpu.dot_dimension_numbers<[1], [0], [0], [1], [0, 0, 1, 1], [], []>} : vector<48x128xbf16>, vector<128x128xbf16>, vector<48x128xf32> -> vector<48x128xf32>
    %c1_119 = arith.constant 1 : index
    %c0_120 = arith.constant 0 : index
    %c0_121 = arith.constant 0 : index
    %319 = vector.load %arg11[%c1_119, %c0_120, %c0_121] : memref<2x1x128xf32, #tpu.memory_space<vmem>>, vector<1x1x128xf32>
    %320 = vector.shape_cast %319 : vector<1x1x128xf32> to vector<1x128xf32>
    %321 = vector.broadcast %320 : vector<1x128xf32> to vector<48x128xf32>
    %322 = arith.addf %318, %321 : vector<48x128xf32>
    %323 = arith.addf %219, %322 : vector<48x128xf32>
    %c1_122 = arith.constant 1 : index
    %c0_123 = arith.constant 0 : index
    %c0_124 = arith.constant 0 : index
    %324 = vector.load %arg12[%c1_122, %c0_123, %c0_124] : memref<2x1x128xf32, #tpu.memory_space<vmem>>, vector<1x1x128xf32>
    %325 = vector.shape_cast %324 : vector<1x1x128xf32> to vector<1x128xf32>
    %c1_125 = arith.constant 1 : index
    %c0_126 = arith.constant 0 : index
    %c0_127 = arith.constant 0 : index
    %326 = vector.load %arg13[%c1_125, %c0_126, %c0_127] : memref<2x1x128xf32, #tpu.memory_space<vmem>>, vector<1x1x128xf32>
    %327 = vector.shape_cast %326 : vector<1x1x128xf32> to vector<1x128xf32>
    %cst_128 = arith.constant dense<0.000000e+00> : vector<48xf32>
    %328 = vector.multi_reduction <add>, %323, %cst_128 [1] : vector<48x128xf32> to vector<48xf32>
    %329 = vector.shape_cast %328 : vector<48xf32> to vector<48x1xf32>
    %cst_129 = arith.constant 1.280000e+02 : f32
    %330 = vector.broadcast %cst_129 : f32 to vector<48x1xf32>
    %331 = arith.divf %329, %330 : vector<48x1xf32>
    %332 = vector.broadcast %331 : vector<48x1xf32> to vector<48x128xf32>
    %333 = arith.subf %323, %332 : vector<48x128xf32>
    %334 = arith.mulf %333, %333 : vector<48x128xf32>
    %cst_130 = arith.constant dense<0.000000e+00> : vector<48xf32>
    %335 = vector.multi_reduction <add>, %334, %cst_130 [1] : vector<48x128xf32> to vector<48xf32>
    %336 = vector.shape_cast %335 : vector<48xf32> to vector<48x1xf32>
    %cst_131 = arith.constant 1.280000e+02 : f32
    %337 = vector.broadcast %cst_131 : f32 to vector<48x1xf32>
    %338 = arith.divf %336, %337 : vector<48x1xf32>
    %cst_132 = arith.constant 9.99999974E-6 : f32
    %339 = vector.broadcast %cst_132 : f32 to vector<48x1xf32>
    %340 = arith.addf %338, %339 : vector<48x1xf32>
    %341 = math.rsqrt %340 : vector<48x1xf32>
    %342 = vector.broadcast %341 : vector<48x1xf32> to vector<48x128xf32>
    %343 = arith.mulf %333, %342 : vector<48x128xf32>
    %344 = vector.broadcast %325 : vector<1x128xf32> to vector<48x128xf32>
    %345 = arith.mulf %343, %344 : vector<48x128xf32>
    %346 = vector.broadcast %327 : vector<1x128xf32> to vector<48x128xf32>
    %347 = arith.addf %345, %346 : vector<48x128xf32>
    %348 = arith.truncf %347 : vector<48x128xf32> to vector<48x128xbf16>
    %c1_133 = arith.constant 1 : index
    %c0_134 = arith.constant 0 : index
    %c0_135 = arith.constant 0 : index
    %349 = vector.load %arg14[%c1_133, %c0_134, %c0_135] : memref<2x128x512xbf16, #tpu.memory_space<vmem>>, vector<1x128x512xbf16>
    %350 = vector.shape_cast %349 : vector<1x128x512xbf16> to vector<128x512xbf16>
    %cst_136 = arith.constant dense<0.000000e+00> : vector<48x512xf32>
    %351 = tpu.matmul %348, %350, %cst_136 {dimension_numbers = #tpu.dot_dimension_numbers<[1], [0], [0], [1], [0, 0, 1, 1], [], []>} : vector<48x128xbf16>, vector<128x512xbf16>, vector<48x512xf32> -> vector<48x512xf32>
    %c1_137 = arith.constant 1 : index
    %c0_138 = arith.constant 0 : index
    %c0_139 = arith.constant 0 : index
    %352 = vector.load %arg15[%c1_137, %c0_138, %c0_139] : memref<2x1x512xf32, #tpu.memory_space<vmem>>, vector<1x1x512xf32>
    %353 = vector.shape_cast %352 : vector<1x1x512xf32> to vector<1x512xf32>
    %354 = vector.broadcast %353 : vector<1x512xf32> to vector<48x512xf32>
    %355 = arith.addf %351, %354 : vector<48x512xf32>
    %cst_140 = arith.constant 1.702000e+00 : f32
    %356 = vector.broadcast %cst_140 : f32 to vector<48x512xf32>
    %357 = arith.mulf %356, %355 : vector<48x512xf32>
    %358 = arith.negf %357 : vector<48x512xf32>
    %359 = math.exp %358 : vector<48x512xf32>
    %cst_141 = arith.constant 1.000000e+00 : f32
    %360 = vector.broadcast %cst_141 : f32 to vector<48x512xf32>
    %361 = arith.addf %360, %359 : vector<48x512xf32>
    %362 = arith.divf %360, %361 : vector<48x512xf32>
    %363 = arith.mulf %355, %362 : vector<48x512xf32>
    %364 = arith.truncf %363 : vector<48x512xf32> to vector<48x512xbf16>
    %c1_142 = arith.constant 1 : index
    %c0_143 = arith.constant 0 : index
    %c0_144 = arith.constant 0 : index
    %365 = vector.load %arg16[%c1_142, %c0_143, %c0_144] : memref<2x512x128xbf16, #tpu.memory_space<vmem>>, vector<1x512x128xbf16>
    %366 = vector.shape_cast %365 : vector<1x512x128xbf16> to vector<512x128xbf16>
    %cst_145 = arith.constant dense<0.000000e+00> : vector<48x128xf32>
    %367 = tpu.matmul %364, %366, %cst_145 {dimension_numbers = #tpu.dot_dimension_numbers<[1], [0], [0], [1], [0, 0, 1, 1], [], []>} : vector<48x512xbf16>, vector<512x128xbf16>, vector<48x128xf32> -> vector<48x128xf32>
    %c1_146 = arith.constant 1 : index
    %c0_147 = arith.constant 0 : index
    %c0_148 = arith.constant 0 : index
    %368 = vector.load %arg17[%c1_146, %c0_147, %c0_148] : memref<2x1x128xf32, #tpu.memory_space<vmem>>, vector<1x1x128xf32>
    %369 = vector.shape_cast %368 : vector<1x1x128xf32> to vector<1x128xf32>
    %370 = vector.broadcast %369 : vector<1x128xf32> to vector<48x128xf32>
    %371 = arith.addf %367, %370 : vector<48x128xf32>
    %372 = arith.addf %323, %371 : vector<48x128xf32>
    %373 = vector.extract_strided_slice %372 {offsets = [0, 0], sizes = [1, 128], strides = [1, 1]} : vector<48x128xf32> to vector<1x128xf32>
    %c0_149 = arith.constant 0 : index
    %c0_150 = arith.constant 0 : index
    %374 = vector.load %arg18[%c0_149, %c0_150] : memref<1x128xf32, #tpu.memory_space<vmem>>, vector<1x128xf32>
    %c0_151 = arith.constant 0 : index
    %c0_152 = arith.constant 0 : index
    %375 = vector.load %arg19[%c0_151, %c0_152] : memref<1x128xf32, #tpu.memory_space<vmem>>, vector<1x128xf32>
    %cst_153 = arith.constant dense<0.000000e+00> : vector<1xf32>
    %376 = vector.multi_reduction <add>, %373, %cst_153 [1] : vector<1x128xf32> to vector<1xf32>
    %377 = vector.shape_cast %376 : vector<1xf32> to vector<1x1xf32>
    %cst_154 = arith.constant 1.280000e+02 : f32
    %378 = vector.broadcast %cst_154 : f32 to vector<1x1xf32>
    %379 = arith.divf %377, %378 : vector<1x1xf32>
    %380 = vector.broadcast %379 : vector<1x1xf32> to vector<1x128xf32>
    %381 = arith.subf %373, %380 : vector<1x128xf32>
    %382 = arith.mulf %381, %381 : vector<1x128xf32>
    %cst_155 = arith.constant dense<0.000000e+00> : vector<1xf32>
    %383 = vector.multi_reduction <add>, %382, %cst_155 [1] : vector<1x128xf32> to vector<1xf32>
    %384 = vector.shape_cast %383 : vector<1xf32> to vector<1x1xf32>
    %cst_156 = arith.constant 1.280000e+02 : f32
    %385 = vector.broadcast %cst_156 : f32 to vector<1x1xf32>
    %386 = arith.divf %384, %385 : vector<1x1xf32>
    %cst_157 = arith.constant 9.99999974E-6 : f32
    %387 = vector.broadcast %cst_157 : f32 to vector<1x1xf32>
    %388 = arith.addf %386, %387 : vector<1x1xf32>
    %389 = math.rsqrt %388 : vector<1x1xf32>
    %390 = vector.broadcast %389 : vector<1x1xf32> to vector<1x128xf32>
    %391 = arith.mulf %381, %390 : vector<1x128xf32>
    %392 = arith.mulf %391, %374 : vector<1x128xf32>
    %393 = arith.addf %392, %375 : vector<1x128xf32>
    %c0_158 = arith.constant 0 : index
    %c0_159 = arith.constant 0 : index
    %c0_160 = arith.constant 0 : index
    %394 = vector.load %arg20[%c0_158, %c0_159, %c0_160] : memref<2x1x128xf32, #tpu.memory_space<vmem>>, vector<1x1x128xf32>
    %395 = vector.shape_cast %394 : vector<1x1x128xf32> to vector<1x128xf32>
    %396 = vector.shape_cast %393 : vector<1x128xf32> to vector<1x1x128xf32>
    tpu.vector_store %arg20[%c0_158, %c0_159, %c0_160], %396 {strides = array<i32>} : memref<2x1x128xf32, #tpu.memory_space<vmem>>, vector<1x1x128xf32>,
    %397 = vector.extract_strided_slice %372 {offsets = [24, 0], sizes = [1, 128], strides = [1, 1]} : vector<48x128xf32> to vector<1x128xf32>
    %c0_161 = arith.constant 0 : index
    %c0_162 = arith.constant 0 : index
    %398 = vector.load %arg18[%c0_161, %c0_162] : memref<1x128xf32, #tpu.memory_space<vmem>>, vector<1x128xf32>
    %c0_163 = arith.constant 0 : index
    %c0_164 = arith.constant 0 : index
    %399 = vector.load %arg19[%c0_163, %c0_164] : memref<1x128xf32, #tpu.memory_space<vmem>>, vector<1x128xf32>
    %cst_165 = arith.constant dense<0.000000e+00> : vector<1xf32>
    %400 = vector.multi_reduction <add>, %397, %cst_165 [1] : vector<1x128xf32> to vector<1xf32>
    %401 = vector.shape_cast %400 : vector<1xf32> to vector<1x1xf32>
    %cst_166 = arith.constant 1.280000e+02 : f32
    %402 = vector.broadcast %cst_166 : f32 to vector<1x1xf32>
    %403 = arith.divf %401, %402 : vector<1x1xf32>
    %404 = vector.broadcast %403 : vector<1x1xf32> to vector<1x128xf32>
    %405 = arith.subf %397, %404 : vector<1x128xf32>
    %406 = arith.mulf %405, %405 : vector<1x128xf32>
    %cst_167 = arith.constant dense<0.000000e+00> : vector<1xf32>
    %407 = vector.multi_reduction <add>, %406, %cst_167 [1] : vector<1x128xf32> to vector<1xf32>
    %408 = vector.shape_cast %407 : vector<1xf32> to vector<1x1xf32>
    %cst_168 = arith.constant 1.280000e+02 : f32
    %409 = vector.broadcast %cst_168 : f32 to vector<1x1xf32>
    %410 = arith.divf %408, %409 : vector<1x1xf32>
    %cst_169 = arith.constant 9.99999974E-6 : f32
    %411 = vector.broadcast %cst_169 : f32 to vector<1x1xf32>
    %412 = arith.addf %410, %411 : vector<1x1xf32>
    %413 = math.rsqrt %412 : vector<1x1xf32>
    %414 = vector.broadcast %413 : vector<1x1xf32> to vector<1x128xf32>
    %415 = arith.mulf %405, %414 : vector<1x128xf32>
    %416 = arith.mulf %415, %398 : vector<1x128xf32>
    %417 = arith.addf %416, %399 : vector<1x128xf32>
    %c1_170 = arith.constant 1 : index
    %c0_171 = arith.constant 0 : index
    %c0_172 = arith.constant 0 : index
    %418 = vector.load %arg20[%c1_170, %c0_171, %c0_172] : memref<2x1x128xf32, #tpu.memory_space<vmem>>, vector<1x1x128xf32>
    %419 = vector.shape_cast %418 : vector<1x1x128xf32> to vector<1x128xf32>
    %420 = vector.shape_cast %417 : vector<1x128xf32> to vector<1x1x128xf32>
    tpu.vector_store %arg20[%c1_170, %c0_171, %c0_172], %420 {strides = array<i32>} : memref<2x1x128xf32, #tpu.memory_space<vmem>>, vector<1x1x128xf32>,
    return
  }
  func.func @transform_0(%arg0: i32) -> (i32, i32, i32) {
    %c0_i32 = arith.constant 0 : i32
    %c0_i32_0 = arith.constant 0 : i32
    %c0_i32_1 = arith.constant 0 : i32
    return %arg0, %c0_i32, %c0_i32_0 : i32, i32, i32
  }
  func.func @transform_1(%arg0: i32) -> (i32, i32) {
    %c0_i32 = arith.constant 0 : i32
    %c0_i32_0 = arith.constant 0 : i32
    %c0_i32_1 = arith.constant 0 : i32
    return %c0_i32, %c0_i32_0 : i32, i32
  }
  func.func @transform_2(%arg0: i32) -> (i32, i32) {
    %c0_i32 = arith.constant 0 : i32
    %c0_i32_0 = arith.constant 0 : i32
    %c0_i32_1 = arith.constant 0 : i32
    return %c0_i32, %c0_i32_0 : i32, i32
  }
  func.func @transform_3(%arg0: i32) -> (i32, i32) {
    %c0_i32 = arith.constant 0 : i32
    %c0_i32_0 = arith.constant 0 : i32
    %c0_i32_1 = arith.constant 0 : i32
    return %c0_i32, %c0_i32_0 : i32, i32
  }
  func.func @transform_4(%arg0: i32) -> (i32, i32) {
    %c0_i32 = arith.constant 0 : i32
    %c0_i32_0 = arith.constant 0 : i32
    %c0_i32_1 = arith.constant 0 : i32
    return %c0_i32, %c0_i32_0 : i32, i32
  }
  func.func @transform_5(%arg0: i32) -> (i32, i32, i32) {
    %c0_i32 = arith.constant 0 : i32
    %c0_i32_0 = arith.constant 0 : i32
    %c0_i32_1 = arith.constant 0 : i32
    %c0_i32_2 = arith.constant 0 : i32
    return %c0_i32, %c0_i32_0, %c0_i32_1 : i32, i32, i32
  }
  func.func @transform_6(%arg0: i32) -> (i32, i32, i32) {
    %c0_i32 = arith.constant 0 : i32
    %c0_i32_0 = arith.constant 0 : i32
    %c0_i32_1 = arith.constant 0 : i32
    %c0_i32_2 = arith.constant 0 : i32
    return %c0_i32, %c0_i32_0, %c0_i32_1 : i32, i32, i32
  }
  func.func @transform_7(%arg0: i32) -> (i32, i32, i32) {
    %c0_i32 = arith.constant 0 : i32
    %c0_i32_0 = arith.constant 0 : i32
    %c0_i32_1 = arith.constant 0 : i32
    %c0_i32_2 = arith.constant 0 : i32
    return %c0_i32, %c0_i32_0, %c0_i32_1 : i32, i32, i32
  }
  func.func @transform_8(%arg0: i32) -> (i32, i32, i32) {
    %c0_i32 = arith.constant 0 : i32
    %c0_i32_0 = arith.constant 0 : i32
    %c0_i32_1 = arith.constant 0 : i32
    %c0_i32_2 = arith.constant 0 : i32
    return %c0_i32, %c0_i32_0, %c0_i32_1 : i32, i32, i32
  }
  func.func @transform_9(%arg0: i32) -> (i32, i32, i32) {
    %c0_i32 = arith.constant 0 : i32
    %c0_i32_0 = arith.constant 0 : i32
    %c0_i32_1 = arith.constant 0 : i32
    %c0_i32_2 = arith.constant 0 : i32
    return %c0_i32, %c0_i32_0, %c0_i32_1 : i32, i32, i32
  }
  func.func @transform_10(%arg0: i32) -> (i32, i32, i32) {
    %c0_i32 = arith.constant 0 : i32
    %c0_i32_0 = arith.constant 0 : i32
    %c0_i32_1 = arith.constant 0 : i32
    %c0_i32_2 = arith.constant 0 : i32
    return %c0_i32, %c0_i32_0, %c0_i32_1 : i32, i32, i32
  }
  func.func @transform_11(%arg0: i32) -> (i32, i32, i32) {
    %c0_i32 = arith.constant 0 : i32
    %c0_i32_0 = arith.constant 0 : i32
    %c0_i32_1 = arith.constant 0 : i32
    %c0_i32_2 = arith.constant 0 : i32
    return %c0_i32, %c0_i32_0, %c0_i32_1 : i32, i32, i32
  }
  func.func @transform_12(%arg0: i32) -> (i32, i32, i32) {
    %c0_i32 = arith.constant 0 : i32
    %c0_i32_0 = arith.constant 0 : i32
    %c0_i32_1 = arith.constant 0 : i32
    %c0_i32_2 = arith.constant 0 : i32
    return %c0_i32, %c0_i32_0, %c0_i32_1 : i32, i32, i32
  }
  func.func @transform_13(%arg0: i32) -> (i32, i32, i32) {
    %c0_i32 = arith.constant 0 : i32
    %c0_i32_0 = arith.constant 0 : i32
    %c0_i32_1 = arith.constant 0 : i32
    %c0_i32_2 = arith.constant 0 : i32
    return %c0_i32, %c0_i32_0, %c0_i32_1 : i32, i32, i32
  }
  func.func @transform_14(%arg0: i32) -> (i32, i32, i32) {
    %c0_i32 = arith.constant 0 : i32
    %c0_i32_0 = arith.constant 0 : i32
    %c0_i32_1 = arith.constant 0 : i32
    %c0_i32_2 = arith.constant 0 : i32
    return %c0_i32, %c0_i32_0, %c0_i32_1 : i32, i32, i32
  }
  func.func @transform_15(%arg0: i32) -> (i32, i32, i32) {
    %c0_i32 = arith.constant 0 : i32
    %c0_i32_0 = arith.constant 0 : i32
    %c0_i32_1 = arith.constant 0 : i32
    %c0_i32_2 = arith.constant 0 : i32
    return %c0_i32, %c0_i32_0, %c0_i32_1 : i32, i32, i32
  }
  func.func @transform_16(%arg0: i32) -> (i32, i32, i32) {
    %c0_i32 = arith.constant 0 : i32
    %c0_i32_0 = arith.constant 0 : i32
    %c0_i32_1 = arith.constant 0 : i32
    %c0_i32_2 = arith.constant 0 : i32
    return %c0_i32, %c0_i32_0, %c0_i32_1 : i32, i32, i32
  }
  func.func @transform_17(%arg0: i32) -> (i32, i32) {
    %c0_i32 = arith.constant 0 : i32
    %c0_i32_0 = arith.constant 0 : i32
    %c0_i32_1 = arith.constant 0 : i32
    return %c0_i32, %c0_i32_0 : i32, i32
  }
  func.func @transform_18(%arg0: i32) -> (i32, i32) {
    %c0_i32 = arith.constant 0 : i32
    %c0_i32_0 = arith.constant 0 : i32
    %c0_i32_1 = arith.constant 0 : i32
    return %c0_i32, %c0_i32_0 : i32, i32
  }
  func.func @transform_19(%arg0: i32) -> (i32, i32, i32) {
    %c0_i32 = arith.constant 0 : i32
    %c0_i32_0 = arith.constant 0 : i32
    %c0_i32_1 = arith.constant 0 : i32
    return %arg0, %c0_i32, %c0_i32_0 : i32, i32, i32
  }
}

</mosaic_0001>

<bundles_post_ra>
// kernel: clip_model_forward.1
= control target key start
LH: loop header
LB: loop body
LE: loop exit
PB: predicated region body
PF: predicated region fallthrough
CT: control target
= control target key end

     0   :  { %s9563_s0 = inlined_call_operand.vmem [shape: f32[4,24,256], index: 0, kind: input, shape index: {}]   ;;  %s9564_s1 = inlined_call_operand.vmem [shape: bf16[256,128], index: 1, kind: input, shape index: {}]   ;;  %s9565_s2 = inlined_call_operand.vmem [shape: f32[24,128], index: 2, kind: input, shape index: {}]   ;;  %s9566_s3 = inlined_call_operand.vmem [shape: f32[1,128], index: 3, kind: input, shape index: {}, may-alias: {3,17}]   ;;  %s9567_s4 = inlined_call_operand.vmem [shape: f32[1,128], index: 4, kind: input, shape index: {}, may-alias: {4,18}]   ;;  %s9568_s5 = inlined_call_operand.vmem [shape: f32[2,1,128], index: 5, kind: input, shape index: {}, may-alias: {5,11}]   ;;  %s9569_s6 = inlined_call_operand.vmem [shape: f32[2,1,128], index: 6, kind: input, shape index: {}, may-alias: {6,10,12,16}]   ;;  %s9570_s7 = inlined_call_operand.vmem [shape: bf16[2,128,384], index: 7, kind: input, shape index: {}]   ;;  %s9571_s8 = inlined_call_operand.vmem [shape: f32[2,1,384], index: 8, kind: input, shape index: {}]   ;;  %s9572_s9 = inlined_call_operand.vmem [shape: bf16[2,128,128], index: 9, kind: input, shape index: {}]   ;;  %s9573_s10 = inlined_call_operand.vmem [shape: f32[2,1,128], index: 10, kind: input, shape index: {}, may-alias: {6,10,12,16}]   ;;  %s9574_s11 = inlined_call_operand.vmem [shape: f32[2,1,128], index: 11, kind: input, shape index: {}, may-alias: {5,11}]   ;;  %s9575_s12 = inlined_call_operand.vmem [shape: f32[2,1,128], index: 12, kind: input, shape index: {}, may-alias: {6,10,12,16}]   ;;  %s9576_s13 = inlined_call_operand.vmem [shape: bf16[2,128,512], index: 13, kind: input, shape index: {}]   ;;  %s9577_s14 = inlined_call_operand.vmem [shape: f32[2,1,512], index: 14, kind: input, shape index: {}]   ;;  %s9578_s15 = inlined_call_operand.vmem [shape: bf16[2,512,128], index: 15, kind: input, shape index: {}]   ;;  %s9579_s16 = inlined_call_operand.vmem [shape: f32[2,1,128], index: 16, kind: input, shape index: {}, may-alias: {6,10,12,16}]   ;;  %s9580_s17 = inlined_call_operand.vmem [shape: f32[1,128], index: 17, kind: input, shape index: {}, may-alias: {3,17}]   ;;  %s9581_s18 = inlined_call_operand.vmem [shape: f32[1,128], index: 18, kind: input, shape index: {}, may-alias: {4,18}]   ;;  %s9582_s19 = inlined_call_operand.vmem [shape: f32[4,1,128], index: 19, kind: output, shape index: {}]  }
   0x1   :  { %9588 = sst [smem:[#allocation2_spill]] %s9563_s0  ;;  %s7432_s0 = smov 0  }
   0x2   :  { %9589 = sst [smem:[#allocation3_spill]] %s9564_s1 }
   0x3   :  { %9590 = sst [smem:[#allocation4_spill]] %s9565_s2 }
   0x4   :  { %9591 = sst [smem:[#allocation5_spill]] %s9566_s3 }
   0x5 LB: > { %s5622_s30 = sadd.s32 4294967295, %s7327_s0   ;;  %p5626_p0 = scmp.ge.s32.totalorder %s7327_s0, 1  ;;  %s7327_s0 = sphi %s7432_s0, %s29_s0  }
   0x6   : > { %p539_p1 = scmp.lt.s32.totalorder %s7327_s0, 3 }
   0x8   : > { %p540_p2 = pnand %p5626_p0, %p539_p1 }
   0x9   : > { %s9592_s1 = sld [smem:[#allocation3_spill]] (!%p540_p2)  ;;  %s5627_s22 = sshll.u32 (!%p540_p2), %s5622_s30, 1  ;;  %vm7331_vm0 = vmmov (!%p540_p2), 0   ;;  %vm1590_vm9 = vcmask (!%p540_p2), 1043456   ;;  %vm1431_vm11 = vcmask (!%p540_p2), 195584   ;;  %vm5536_vm12 = vcmask (!%p540_p2), 1040384  }
   0xa   : > { %543 = sbr.rel (%p540_p2) target bundleno = 5591 (0x15d7), region = 96  ;;  %p596_p3 = scmp.lt.s32.totalorder (!%p540_p2), %s5627_s22, 3 }
   0xb   : > { %s9593_s28 = sld [smem:[#allocation2_spill]] (!%p540_p2)  ;;  %s9594_s24 = sld [smem:[#allocation4_spill]] (!%p540_p2) }
   0xc   : > { %s9595_s30 = sld [smem:[#allocation5_spill]] (!%p540_p2) }
   0xf   : > { %v6617_v0 = vld [vmem:[%s9592_s1 + $0x40] sm:$0xff] (!%p540_p2)   ;;  %v6619_v2 = vld [vmem:[%s9592_s1 + $0x48] sm:$0xff] (!%p540_p2)   ;;  %v6621_v4 = vld [vmem:[%s9592_s1 + $0x50] sm:$0xff] (!%p540_p2)  }
  0x10   : > { %v6618_v1 = vld [vmem:[%s9592_s1] sm:$0xff] (!%p540_p2)   ;;  %6079 = vmatprep.subr.bf16.mxu0 (!%p540_p2), %v6617_v0  ;;  %v6620_v3 = vld [vmem:[%s9592_s1 + $0x8] sm:$0xff] (!%p540_p2)   ;;  %v6622_v5 = vld [vmem:[%s9592_s1 + $0x10] sm:$0xff] (!%p540_p2)  }
  0x11   : > { %6080 = vmatpush3.bf16.msra.mxu0 %v6618_v1  ;;  %s9599_s22 = smov (!%p596_p3, %s5627_s22), 3  ;;  %v6623_v6 = vld [vmem:[%s9592_s1 + $0x58] sm:$0xff]   ;;  %v6625_v8 = vld [vmem:[%s9592_s1 + $0x60] sm:$0xff]   ;;  %v6627_v10 = vld [vmem:[%s9592_s1 + $0x68] sm:$0xff]  }
  0x12   : > { %6081 = vmatprep.subr.bf16.mxu0 %v6619_v2  ;;  %s6605_s2 = smul.u32 48, %s9599_s22  ;;  %v6624_v7 = vld [vmem:[%s9592_s1 + $0x18] sm:$0xff]   ;;  %v6626_v9 = vld [vmem:[%s9592_s1 + $0x20] sm:$0xff]   ;;  %v6628_v14 = vld [vmem:[%s9592_s1 + $0x28] sm:$0xff]  }
  0x13   : > { %v6629_v15 = vld [vmem:[%s9592_s1 + $0x70] sm:$0xff]   ;;  %v6631_v17 = vld [vmem:[%s9592_s1 + $0x78] sm:$0xff]   ;;  %v658_v36 = vld [vmem:[%s9594_s24] sm:$0xff] }
  0x14   : > { %s7473_s29 = scalar_lea.vmem %s9593_s28, %s6605_s2  ;;  %v6630_v16 = vld [vmem:[%s9592_s1 + $0x30] sm:$0xff]   ;;  %v6632_v18 = vld [vmem:[%s9592_s1 + $0x38] sm:$0xff]   ;;  %v659_v42 = vld [vmem:[%s9594_s24 + $0x8] sm:$0xff] }
  0x15   : > { %6082 = vmatpush3.bf16.msra.mxu0 %v6620_v3  ;;  %v609_v11 = vld [vmem:[%s7473_s29 + $0x8] sm:$0xff]  ;;  %v611_v12 = vld [vmem:[%s7473_s29 + $0x18] sm:$0xff]  ;;  %v608_v19 = vld [vmem:[%s7473_s29] sm:$0xff] }
  0x16   : > { %6083 = vmatprep.subr.bf16.mxu0 %v6621_v4  ;;  %v621_v13 = vpack.c.bf16 %v611_v12, %v609_v11  ;;  %v610_v20 = vld [vmem:[%s7473_s29 + $0x10] sm:$0xff]  ;;  %v613_v21 = vld [vmem:[%s7473_s29 + $0x28] sm:$0xff]  ;;  %v615_v22 = vld [vmem:[%s7473_s29 + $0x38] sm:$0xff] }
  0x17   : > { %v620_v23 = vpack.c.bf16 %v610_v20, %v608_v19  ;;  %v623_v24 = vpack.c.bf16 %v615_v22, %v613_v21  ;;  %v612_v25 = vld [vmem:[%s7473_s29 + $0x20] sm:$0xff]  ;;  %v614_v26 = vld [vmem:[%s7473_s29 + $0x30] sm:$0xff]  ;;  %v617_v27 = vld [vmem:[%s7473_s29 + $0x48] sm:$0xff] }
  0x18   : > { %789 = vmatprep.mubr.bf16.mxu0 %v621_v13  ;;  %v619_v28 = vld [vmem:[%s7473_s29 + $0x58] sm:$0xff]  ;;  %v622_v29 = vpack.c.bf16 %v614_v26, %v612_v25  ;;  %v616_v31 = vld [vmem:[%s7473_s29 + $0x40] sm:$0xff]  ;;  %v618_v32 = vld [vmem:[%s7473_s29 + $0x50] sm:$0xff]  ;;  %s605_s29 = scalar_lea.vmem %s9582_s19, %s9599_s22 }
  0x19   : > { %6084 = vmatpush3.bf16.msra.mxu0 %v6622_v5  ;;  %v625_v30 = vpack.c.bf16 %v619_v28, %v617_v27  ;;  %v624_v33 = vpack.c.bf16 %v618_v32, %v616_v31  ;;  %v660_v46 = vld [vmem:[%s9594_s24 + $0x10] sm:$0xff] }
  0x1a   : > { %6085 = vmatprep.subr.bf16.mxu0 %v6623_v6 }
  0x1d   : > { %6086 = vmatpush3.bf16.msra.mxu0 %v6624_v7 }
  0x1e   : > { %6087 = vmatprep.subr.bf16.mxu0 %v6625_v8 }
  0x21   : > { %6088 = vmatpush3.bf16.msra.mxu0 %v6626_v9 }
  0x22   : > { %6089 = vmatprep.subr.bf16.mxu0 %v6627_v10 }
  0x25   : > { %6090 = vmatpush3.bf16.msra.mxu0 %v6628_v14 }
  0x26   : > { %6091 = vmatprep.subr.bf16.mxu0 %v6629_v15 }
  0x29   : > { %6092 = vmatpush3.bf16.msra.mxu0 %v6630_v16 }
  0x2a   : > { %6093 = vmatprep.subr.bf16.mxu0 %v6631_v17 }
  0x2d   : > { %6094 = vmatpush3.bf16.msra.mxu0 %v6632_v18 }
  0x30   : > { %790 = vmatmul.mubr.bf16.vlgmr.msra.gmra.mrb[0].mxu0 %v620_v23 }
  0x31   : > { %797 = vmatprep.mubr.bf16.mxu0 %v623_v24 }
  0x38   : > { %798 = vmatmul.mubr.bf16.gmra.mrb[4].mxu0 %v622_v29 }
  0x39   : > { %805 = vmatprep.mubr.bf16.mxu0 %v625_v30 }
  0x40   : > { %806 = vmatmul.mubr.bf16.gmra.mrb[8].mxu0 %v624_v33 }
 0x103   : > { %v6095_v34 = vpop.f32.mrb[0].mxu0 }
 0x104   : > { %v6096_v35 = vpop.f32.mrb[1].mxu0 }
 0x105   : > { %v6097_v37 = vadd.f32 %v6096_v35, %v6095_v34  ;;  %v6098_v38 = vpop.f32.mrb[2].mxu0  ;;  %v5646_v34 = vld [vmem:[%s9595_s30] ss:$0 sm:$0xff] }
 0x106   : > { %v6099_v39 = vpop.f32.mrb[3].mxu0 }
 0x107   : > { %v6100_v40 = vadd.f32 %v6099_v39, %v6098_v38  ;;  %v792_v41 = vadd.f32 %v6097_v37, %v658_v36  ;;  %v5647_v38 = vld [vmem:[%s9567_s4] ss:$0 sm:$0xff] }
 0x109   : > { %816 = vadd.xlane.f32.xlu0 %v792_v41  ;;  %v795_v44 = vadd.f32 %v6100_v40, %v659_v42 }
 0x10b   : > { %v6101_v43 = vpop.f32.mrb[4].mxu0 }
 0x10c   : > { %v6102_v45 = vpop.f32.mrb[5].mxu0 }
 0x10d   : > { %v6103_v47 = vadd.f32 %v6102_v45, %v6101_v43  ;;  %818 = vadd.xlane.f32.xlu0 %v795_v44  ;;  %v6104_v48 = vpop.f32.mrb[6].mxu0 }
 0x10e   : > { %v6105_v49 = vpop.f32.mrb[7].mxu0 }
 0x10f   : > { %v6106_v50 = vadd.f32 %v6105_v49, %v6104_v48  ;;  %v800_v51 = vadd.f32 %v6103_v47, %v660_v46 }
 0x111   : > { %820 = vadd.xlane.f32.xlu1 %v800_v51  ;;  %v803_v53 = vadd.f32 %v6106_v50, %v658_v36 }
 0x113   : > { %v6107_v52 = vpop.f32.mrb[8].mxu0 }
 0x114   : > { %v6108_v54 = vpop.f32.mrb[9].mxu0 }
 0x115   : > { %v6109_v55 = vadd.f32 %v6108_v54, %v6107_v52  ;;  %v6110_v56 = vpop.f32.mrb[10].mxu0  ;;  %822 = vadd.xlane.f32.xlu1 %v803_v53 }
 0x116   : > { %v6111_v57 = vpop.f32.mrb[11].mxu0 }
 0x117   : > { %v6112_v58 = vadd.f32 %v6111_v57, %v6110_v56  ;;  %v808_v59 = vadd.f32 %v6109_v55, %v659_v42 }
 0x119   : > { %824 = vadd.xlane.f32.xlu0 %v808_v59  ;;  %v811_v60 = vadd.f32 %v6112_v58, %v660_v46 }
 0x11b   : > { %826 = vadd.xlane.f32.xlu1 %v811_v60 }
 0x196   : > { %v817_v61 = vpop.xlane.xlu0 %816 }
 0x197   : > { %v829_v62 = vmul.f32 0.0078125, %v817_v61 }
 0x199   : > { %v835_v63 = vsub.f32 %v792_v41, %v829_v62 }
 0x19a   : > { %v819_v0 = vpop.xlane.xlu0 %818 }
 0x19b   : > { %v830_v1 = vmul.f32 0.0078125, %v819_v0  ;;  %v841_v2 = vmul.f32 %v835_v63, %v835_v63 }
 0x19d   : > { %847 = vadd.xlane.f32.xlu0 %v841_v2  ;;  %v836_v3 = vsub.f32 %v795_v44, %v830_v1  ;;  %v6633_v1 = vld [vmem:[%s9570_s7 + $0x4] ss:$12 sps:$4 sm:$0xff]   ;;  %v6635_v2 = vld [vmem:[%s9570_s7] ss:$12 sps:$4 sm:$0xff]  }
 0x19e   : > { %v821_v4 = vpop.xlane.xlu1 %820  ;;  %1198 = vmatprep.subr.bf16.mxu1 %v6633_v1 }
 0x19f   : > { %v831_v5 = vmul.f32 0.0078125, %v821_v4  ;;  %v842_v6 = vmul.f32 %v836_v3, %v836_v3  ;;  %v6636_v4 = vld [vmem:[%s9570_s7 + $0x8] ss:$12 sps:$4 sm:$0xff]   ;;  %1199 = vmatpush1.bf16.msra.mxu1 %v6635_v2 }
 0x1a1   : > { %849 = vadd.xlane.f32.xlu1 %v842_v6  ;;  %v837_v7 = vsub.f32 %v800_v51, %v831_v5  ;;  %v6637_v5 = vld [vmem:[%s9570_s7 + $0x1c] ss:$12 sps:$4 sm:$0xff]  }
 0x1a2   : > { %v823_v8 = vpop.xlane.xlu1 %822  ;;  %1200 = vmatprep.subr.bf16.mxu1 %v6637_v5 }
 0x1a3   : > { %v832_v9 = vmul.f32 0.0078125, %v823_v8  ;;  %v843_v10 = vmul.f32 %v837_v7, %v837_v7 }
 0x1a5   : > { %851 = vadd.xlane.f32.xlu0 %v843_v10  ;;  %v838_v11 = vsub.f32 %v803_v53, %v832_v9 }
 0x1a6   : > { %v825_v12 = vpop.xlane.xlu0 %824 }
 0x1a7   : > { %v833_v13 = vmul.f32 0.0078125, %v825_v12  ;;  %v844_v14 = vmul.f32 %v838_v11, %v838_v11 }
 0x1a8   : > { %v827_v15 = vpop.xlane.xlu1 %826 }
 0x1a9   : > { %v834_v16 = vmul.f32 0.0078125, %v827_v15  ;;  %853 = vadd.xlane.f32.xlu1 %v844_v14  ;;  %v839_v17 = vsub.f32 %v808_v59, %v833_v13 }
 0x1ab   : > { %v845_v18 = vmul.f32 %v839_v17, %v839_v17  ;;  %v840_v19 = vsub.f32 %v811_v60, %v834_v16 }
 0x1ad   : > { %855 = vadd.xlane.f32.xlu0 %v845_v18  ;;  %v846_v20 = vmul.f32 %v840_v19, %v840_v19 }
 0x1af   : > { %857 = vadd.xlane.f32.xlu1 %v846_v20 }
 0x22a   : > { %v848_v21 = vpop.xlane.xlu0 %847 }
 0x22b   : > { %v859_v22 = vmul.f32 0.0078125, %v848_v21 }
 0x22d   : > { %v865_v23 = vadd.f32 1e-05, %v859_v22 }
 0x22e   : > { %v850_v24 = vpop.xlane.xlu1 %849 }
 0x22f   : > { %6873 = vrsqrt.f32 %v865_v23  ;;  %v860_v25 = vmul.f32 0.0078125, %v850_v24 }
 0x231   : > { %v866_v26 = vadd.f32 1e-05, %v860_v25 }
 0x232   : > { %v852_v27 = vpop.xlane.xlu0 %851 }
 0x233   : > { %6875 = vrsqrt.f32 %v866_v26  ;;  %v861_v28 = vmul.f32 0.0078125, %v852_v27  ;;  %v6639_v27 = vld [vmem:[%s9570_s7 + $0x18] ss:$12 sps:$4 sm:$0xff]  }
 0x234   : > { %1201 = vmatpush1.bf16.msra.mxu1 %v6639_v27 }
 0x235   : > { %v867_v29 = vadd.f32 1e-05, %v861_v28  ;;  %v6640_v28 = vld [vmem:[%s9570_s7 + $0x20] ss:$12 sps:$4 sm:$0xff]  }
 0x236   : > { %v854_v30 = vpop.xlane.xlu1 %853 }
 0x237   : > { %6877 = vrsqrt.f32 %v867_v29  ;;  %v862_v31 = vmul.f32 0.0078125, %v854_v30 }
 0x239   : > { %v6874_v32 = vpop.eup %6873  ;;  %v868_v33 = vadd.f32 1e-05, %v862_v31  ;;  %v6641_v31 = vld [vmem:[%s9570_s7 + $0x34] ss:$12 sps:$4 sm:$0xff]  }
 0x23a   : > { %v856_v35 = vpop.xlane.xlu0 %855  ;;  %v877_v36 = vmul.f32 %v6874_v32, %v835_v63  ;;  %1202 = vmatprep.subr.bf16.mxu1 %v6641_v31 }
 0x23b   : > { %6879 = vrsqrt.f32 %v868_v33  ;;  %v863_v37 = vmul.f32 0.0078125, %v856_v35  ;;  %v6643_v33 = vld [vmem:[%s9570_s7 + $0x30] ss:$12 sps:$4 sm:$0xff]   ;;  %v6645_v35 = vld [vmem:[%s9570_s7 + $0x4c] ss:$12 sps:$4 sm:$0xff]  }
 0x23c   : > { %v858_v39 = vpop.xlane.xlu1 %857  ;;  %v889_v40 = vmul.f32 %v5646_v34, %v877_v36  ;;  %1203 = vmatpush1.bf16.msra.mxu1 %v6643_v33  ;;  %v6647_v36 = vld [vmem:[%s9570_s7 + $0x48] ss:$12 sps:$4 sm:$0xff]  }
 0x23d   : > { %v6876_v41 = vpop.eup %6875  ;;  %v869_v42 = vadd.f32 1e-05, %v863_v37  ;;  %v864_v43 = vmul.f32 0.0078125, %v858_v39  ;;  %v6648_v37 = vld [vmem:[%s9570_s7 + $0x50] ss:$12 sps:$4 sm:$0xff]   ;;  %1204 = vmatprep.subr.bf16.mxu1 %v6645_v35 }
 0x23e   : > { %v7523_v44 = vadd.f32 %v5647_v38, %v889_v40  ;;  %v878_v45 = vmul.f32 %v6876_v41, %v836_v3  ;;  %v9586_v3 = vmov 0.0   ;;  %v6651_v39 = vld [vmem:[%s9570_s7 + $0x60] ss:$12 sps:$4 sm:$0xff]   ;;  %v6652_v40 = vld [vmem:[%s9570_s7 + $0x68] ss:$12 sps:$4 sm:$0xff]  }
 0x23f   : > { %6881 = vrsqrt.f32 %v869_v42  ;;  %v870_v46 = vadd.f32 1e-05, %v864_v43  ;;  %6357 = vmatprep.subr.bf16.mxu0 %v9586_v3  ;;  %v6653_v41 = vld [vmem:[%s9570_s7 + $0x7c] ss:$12 sps:$4 sm:$0xff]   ;;  %v6655_v42 = vld [vmem:[%s9570_s7 + $0x78] ss:$12 sps:$4 sm:$0xff]   ;;  %6373 = vmatprep.mubr.msk.bf16.mxu0 %vm7331_vm0, %v9586_v3 }
 0x240   : > { %928 = vadd.xlane.f32.xlu0 %v7523_v44  ;;  %v890_v47 = vmul.f32 %v5646_v34, %v878_v45  ;;  %6358 = vmatpush3.bf16.msra.mxu0 %v6636_v4  ;;  %v6656_v43 = vld [vmem:[%s9570_s7 + $0x80] ss:$12 sps:$4 sm:$0xff]  }
 0x241   : > { %v6878_v48 = vpop.eup %6877  ;;  %6883 = vrsqrt.f32 %v870_v46  ;;  %6359 = vmatprep.subr.bf16.mxu0 %v9586_v3  ;;  %1205 = vmatpush1.bf16.msra.mxu1 %v6647_v36  ;;  %v6657_v45 = vld [vmem:[%s9570_s7 + $0x94] ss:$12 sps:$4 sm:$0xff]   ;;  %v6659_v46 = vld [vmem:[%s9570_s7 + $0x90] ss:$12 sps:$4 sm:$0xff]  }
 0x242   : > { %v7526_v49 = vadd.f32 %v5647_v38, %v890_v47  ;;  %v879_v50 = vmul.f32 %v6878_v48, %v837_v7  ;;  %v6660_v47 = vld [vmem:[%s9570_s7 + $0x98] ss:$12 sps:$4 sm:$0xff]  }
 0x243   : > { %v6661_v48 = vld [vmem:[%s9570_s7 + $0xac] ss:$12 sps:$4 sm:$0xff]  }
 0x244   : > { %930 = vadd.xlane.f32.xlu1 %v7526_v49  ;;  %v891_v51 = vmul.f32 %v5646_v34, %v879_v50  ;;  %6360 = vmatpush3.bf16.msra.mxu0 %v6640_v28  ;;  %v6663_v50 = vld [vmem:[%s9570_s7 + $0xa8] ss:$12 sps:$4 sm:$0xff]  }
 0x245   : > { %v6880_v52 = vpop.eup %6879  ;;  %6361 = vmatprep.subr.bf16.mxu0 %v9586_v3 }
 0x246   : > { %v7529_v53 = vadd.f32 %v5647_v38, %v891_v51  ;;  %v880_v54 = vmul.f32 %v6880_v52, %v838_v11  ;;  %v6664_v51 = vld [vmem:[%s9570_s7 + $0xb0] ss:$12 sps:$4 sm:$0xff]   ;;  %v7330_v52 = vmov 0  }
 0x247   : > { %1230 = vmatprep.mubr.bf16.mxu1 %v7330_v52 }
 0x248   : > { %932 = vadd.xlane.f32.xlu0 %v7529_v53  ;;  %v892_v55 = vmul.f32 %v5646_v34, %v880_v54 }
 0x249   : > { %v6882_v56 = vpop.eup %6881 }
 0x24a   : > { %v7532_v57 = vadd.f32 %v5647_v38, %v892_v55  ;;  %v881_v58 = vmul.f32 %v6882_v56, %v839_v17 }
 0x24b   : > { %v6884_v59 = vpop.eup %6883 }
 0x24c   : > { %934 = vadd.xlane.f32.xlu1 %v7532_v57  ;;  %v893_v60 = vmul.f32 %v5646_v34, %v881_v58  ;;  %v882_v61 = vmul.f32 %v6884_v59, %v840_v19 }
 0x24e   : > { %v7535_v62 = vadd.f32 %v5647_v38, %v893_v60  ;;  %v894_v63 = vmul.f32 %v5646_v34, %v882_v61  ;;  %v6644_v34 = vld [vmem:[%s9570_s7 + $0x38] ss:$12 sps:$4 sm:$0xff]  }
 0x24f   : > { %6362 = vmatpush3.bf16.msra.mxu0 %v6644_v34 }
 0x250   : > { %936 = vadd.xlane.f32.xlu0 %v7535_v62  ;;  %v7538_v0 = vadd.f32 %v5647_v38, %v894_v63  ;;  %6363 = vmatprep.subr.bf16.mxu0 %v9586_v3  ;;  %v6649_v38 = vld [vmem:[%s9570_s7 + $0x64] ss:$12 sps:$4 sm:$0xff]  }
 0x251   : > { %1206 = vmatprep.subr.bf16.mxu1 %v6649_v38 }
 0x252   : > { %938 = vadd.xlane.f32.xlu1 %v7538_v0  ;;  %1207 = vmatpush1.bf16.msra.mxu1 %v6651_v39 }
 0x253   : > { %6364 = vmatpush3.bf16.msra.mxu0 %v6648_v37  ;;  %1208 = vmatprep.subr.bf16.mxu1 %v6653_v41 }
 0x254   : > { %6365 = vmatprep.subr.bf16.mxu0 %v9586_v3 }
 0x256   : > { %1209 = vmatpush1.bf16.msra.mxu1 %v6655_v42 }
 0x257   : > { %6366 = vmatpush3.bf16.msra.mxu0 %v6652_v40  ;;  %1210 = vmatprep.subr.bf16.mxu1 %v6657_v45 }
 0x258   : > { %6367 = vmatprep.subr.bf16.mxu0 %v9586_v3 }
 0x25a   : > { %1211 = vmatpush1.bf16.msra.mxu1 %v6659_v46  ;;  %v1053_v46 = vld [vmem:[%s9571_s8] sm:$0x7] }
 0x25b   : > { %6368 = vmatpush3.bf16.msra.mxu0 %v6656_v43  ;;  %1212 = vmatprep.subr.bf16.mxu1 %v6661_v48  ;;  %v907_v43 = vlaneseq }
 0x25c   : > { %6369 = vmatprep.subr.bf16.mxu0 %v9586_v3 }
 0x25d   : > { %v7674_v45 = vand.u32 127, %v907_v43 }
 0x25e   : > { %1213 = vmatpush1.bf16.msra.mxu1 %v6663_v50 }
 0x25f   : > { %6370 = vmatpush3.bf16.msra.mxu0 %v6660_v47  ;;  %vm918_vm1 = vcmp.ge.s32.totalorder %v7674_v45, 64  ;;  %vm919_vm2 = vcmp.lt.s32.totalorder %v7674_v45, 96  ;;  %vm911_vm3 = vcmp.lt.s32.totalorder %v7674_v45, 32  ;;  %vm914_vm5 = vcmp.ge.s32.totalorder %v7674_v45, 32 }
 0x260   : > { %6371 = vmatprep.subr.bf16.mxu0 %v9586_v3  ;;  %vm920_vm4 = vmand %vm918_vm1, %vm919_vm2  ;;  %vm915_vm6 = vcmp.lt.s32.totalorder %v7674_v45, 64  ;;  %vm922_vm7 = vcmp.ge.s32.totalorder %v7674_v45, 96  ;;  %vm909_vm10 = vcmp.lt.s32.totalorder %v7674_v45, 17 }
 0x261   : > { %vm916_vm8 = vmand %vm914_vm5, %vm915_vm6 }
 0x263   : > { %6372 = vmatpush3.bf16.msra.mxu0 %v6664_v51 }
 0x2cd   : > { %v929_v6 = vpop.xlane.xlu0 %928 }
 0x2ce   : > { %v940_v7 = vmul.f32 0.0078125, %v929_v6 }
 0x2d0   : > { %v7556_v8 = vsub.f32 %v7523_v44, %v940_v7 }
 0x2d1   : > { %v931_v9 = vpop.xlane.xlu1 %930 }
 0x2d2   : > { %v941_v10 = vmul.f32 0.0078125, %v931_v9  ;;  %v952_v11 = vmul.f32 %v7556_v8, %v7556_v8 }
 0x2d4   : > { %958 = vadd.xlane.f32.xlu0 %v952_v11  ;;  %v7561_v12 = vsub.f32 %v7526_v49, %v941_v10  ;;  %v5648_v11 = vld [vmem:[%s9568_s5] ss:$0 sm:$0xff] }
 0x2d5   : > { %v933_v13 = vpop.xlane.xlu0 %932 }
 0x2d6   : > { %v942_v14 = vmul.f32 0.0078125, %v933_v13  ;;  %v953_v15 = vmul.f32 %v7561_v12, %v7561_v12 }
 0x2d8   : > { %960 = vadd.xlane.f32.xlu1 %v953_v15  ;;  %v7566_v16 = vsub.f32 %v7529_v53, %v942_v14 }
 0x2d9   : > { %v935_v17 = vpop.xlane.xlu1 %934 }
 0x2da   : > { %v943_v18 = vmul.f32 0.0078125, %v935_v17  ;;  %v954_v19 = vmul.f32 %v7566_v16, %v7566_v16 }
 0x2dc   : > { %962 = vadd.xlane.f32.xlu0 %v954_v19  ;;  %v7571_v20 = vsub.f32 %v7532_v57, %v943_v18 }
 0x2dd   : > { %v937_v21 = vpop.xlane.xlu0 %936 }
 0x2de   : > { %v944_v22 = vmul.f32 0.0078125, %v937_v21  ;;  %v955_v23 = vmul.f32 %v7571_v20, %v7571_v20 }
 0x2df   : > { %v939_v24 = vpop.xlane.xlu1 %938 }
 0x2e0   : > { %v945_v25 = vmul.f32 0.0078125, %v939_v24  ;;  %964 = vadd.xlane.f32.xlu1 %v955_v23  ;;  %v7576_v26 = vsub.f32 %v7535_v62, %v944_v22  ;;  %v5649_v22 = vld [vmem:[%s9569_s6] ss:$0 sm:$0xff] }
 0x2e2   : > { %v956_v29 = vmul.f32 %v7576_v26, %v7576_v26  ;;  %v7587_v30 = vsub.f32 %v7538_v0, %v945_v25 }
 0x2e4   : > { %966 = vadd.xlane.f32.xlu0 %v956_v29  ;;  %v957_v32 = vmul.f32 %v7587_v30, %v7587_v30 }
 0x2e6   : > { %968 = vadd.xlane.f32.xlu1 %v957_v32 }
 0x361   : > { %v959_v54 = vpop.xlane.xlu0 %958 }
 0x362   : > { %v970_v55 = vmul.f32 0.0078125, %v959_v54 }
 0x364   : > { %v976_v56 = vadd.f32 1e-05, %v970_v55 }
 0x365   : > { %v961_v58 = vpop.xlane.xlu1 %960 }
 0x366   : > { %6885 = vrsqrt.f32 %v976_v56  ;;  %v971_v59 = vmul.f32 0.0078125, %v961_v58  ;;  %v7701_v58 = vsel %vm911_vm3, 1.0, %v9586_v3 }
 0x368   : > { %v977_v60 = vadd.f32 1e-05, %v971_v59 }
 0x369   : > { %v963_v61 = vpop.xlane.xlu0 %962 }
 0x36a   : > { %6887 = vrsqrt.f32 %v977_v60  ;;  %v972_v63 = vmul.f32 0.0078125, %v963_v61 }
 0x36c   : > { %v978_v1 = vadd.f32 1e-05, %v972_v63  ;;  %v7707_v63 = vsel %vm920_vm4, 1.0, %v9586_v3 }
 0x36d   : > { %v965_v2 = vpop.xlane.xlu1 %964 }
 0x36e   : > { %6889 = vrsqrt.f32 %v978_v1  ;;  %v973_v4 = vmul.f32 0.0078125, %v965_v2 }
 0x370   : > { %v6886_v5 = vpop.eup %6885  ;;  %v979_v6 = vadd.f32 1e-05, %v973_v4 }
 0x371   : > { %v967_v7 = vpop.xlane.xlu0 %966  ;;  %v988_v9 = vmul.f32 %v6886_v5, %v7556_v8 }
 0x372   : > { %6891 = vrsqrt.f32 %v979_v6  ;;  %v974_v10 = vmul.f32 0.0078125, %v967_v7 }
 0x373   : > { %v969_v13 = vpop.xlane.xlu1 %968  ;;  %v1000_v19 = vmul.f32 %v5648_v11, %v988_v9 }
 0x374   : > { %v6888_v14 = vpop.eup %6887  ;;  %v980_v15 = vadd.f32 1e-05, %v974_v10  ;;  %v975_v17 = vmul.f32 0.0078125, %v969_v13 }
 0x375   : > { %v989_v18 = vmul.f32 %v6888_v14, %v7561_v12  ;;  %v1012_v24 = vadd.f32 %v5649_v22, %v1000_v19 }
 0x376   : > { %6893 = vrsqrt.f32 %v980_v15  ;;  %v981_v21 = vadd.f32 1e-05, %v975_v17 }
 0x377   : > { %v1001_v8 = vmul.f32 %v5648_v11, %v989_v18 }
 0x378   : > { %v6890_v23 = vpop.eup %6889  ;;  %6895 = vrsqrt.f32 %v981_v21 }
 0x379   : > { %v1013_v25 = vadd.f32 %v5649_v22, %v1001_v8  ;;  %v990_v27 = vmul.f32 %v6890_v23, %v7566_v16  ;;  %v7728_v8 = vsel %vm916_vm8, 1.0, %v9586_v3  ;;  %v7731_v23 = vsel %vm922_vm7, 1.0, %v9586_v3 }
 0x37b   : > { %v1018_v28 = vpack.c.bf16 %v1013_v25, %v1012_v24  ;;  %v1002_v31 = vmul.f32 %v5648_v11, %v990_v27 }
 0x37c   : > { %v6892_v29 = vpop.eup %6891 }
 0x37d   : > { %1231 = vmatmul.mubr.bf16.vlgmr.msra.gmra.mrb[0].mxu1 %v1018_v28  ;;  %6374 = vmatmul.mubr.bf16.vlgmr.msra.gmra.mrb[12].mxu0 %v1018_v28  ;;  %v991_v12 = vmul.f32 %v6892_v29, %v7571_v20  ;;  %v1014_v34 = vadd.f32 %v5649_v22, %v1002_v31 }
 0x37e   : > { %1240 = vmatprep.mubr.bf16.mxu1 %v7330_v52  ;;  %6377 = vmatprep.mubr.msk.bf16.mxu0 %vm7331_vm0, %v9586_v3 }
 0x37f   : > { %v1003_v32 = vmul.f32 %v5648_v11, %v991_v12 }
 0x380   : > { %v6894_v33 = vpop.eup %6893 }
 0x381   : > { %v1015_v35 = vadd.f32 %v5649_v22, %v1003_v32  ;;  %v992_v36 = vmul.f32 %v6894_v33, %v7576_v26  ;;  %v7672_v26 = vshrl.u32 %v907_v43, 7 }
 0x382   : > { %v6896_v37 = vpop.eup %6895 }
 0x383   : > { %v1019_v16 = vpack.c.bf16 %v1015_v35, %v1014_v34  ;;  %v993_v38 = vmul.f32 %v6896_v37, %v7587_v30  ;;  %v1004_v39 = vmul.f32 %v5648_v11, %v992_v36  ;;  %v7677_v30 = vsub.s32 0, %v7672_v26 }
 0x384   : > { %v7683_v47 = vsub.s32 2, %v7672_v26  ;;  %v7688_v48 = vsub.s32 1, %v7672_v26 }
 0x385   : > { %1241 = vmatmul.mubr.bf16.gmra.mrb[4].mxu1 %v1019_v16  ;;  %6378 = vmatmul.mubr.bf16.gmra.mrb[16].mxu0 %v1019_v16  ;;  %v1005_v20 = vmul.f32 %v5648_v11, %v993_v38  ;;  %v1016_v41 = vadd.f32 %v5649_v22, %v1004_v39  ;;  %v7691_v50 = vrot.slane %v1053_v46, %v7677_v30 }
 0x386   : > { %1250 = vmatprep.mubr.bf16.mxu1 %v7330_v52  ;;  %6381 = vmatprep.mubr.msk.bf16.mxu0 %vm7331_vm0, %v9586_v3  ;;  %v7695_v51 = vrot.slane %v1053_v46, %v7683_v47  ;;  %v7698_v56 = vrot.slane %v1053_v46, %v7688_v48 }
 0x387   : > { %v1017_v40 = vadd.f32 %v5649_v22, %v1005_v20 }
 0x389   : > { %v1020_v42 = vpack.c.bf16 %v1017_v40, %v1016_v41 }
 0x38d   : > { %1251 = vmatmul.mubr.bf16.gmra.mrb[8].mxu1 %v1020_v42  ;;  %6382 = vmatmul.mubr.bf16.gmra.mrb[20].mxu0 %v1020_v42 }
 0x450   : > { %v1232_v54 = vpop.f32.mrb[0].mxu1  ;;  %v1295_v55 = vpop.f32.mrb[12].mxu0 }
 0x451   : > { %v1233_v59 = vadd.f32 %v1232_v54, %v7691_v50  ;;  %v1234_v60 = vpop.f32.mrb[1].mxu1  ;;  %v6375_v61 = vpop.f32.mrb[13].mxu0  ;;  %v1296_v4 = vadd.f32 %v1295_v55, %v7695_v51 }
 0x452   : > { %v1236_v1 = vpop.f32.mrb[2].mxu1  ;;  %v1298_v2 = vpop.f32.mrb[14].mxu0  ;;  %v1235_v10 = vadd.f32 %v1234_v60, %v7698_v56 }
 0x453   : > { %v1237_v5 = vadd.f32 %v1236_v1, %v7691_v50  ;;  %v1299_v6 = vadd.f32 %v1298_v2, %v7695_v51  ;;  %v1238_v7 = vpop.f32.mrb[3].mxu1  ;;  %v6376_v9 = vpop.f32.mrb[15].mxu0  ;;  %v1318_v13 = vmul.f32 %v1233_v59, %v7701_v58  ;;  %v7720_v17 = vmul.f32 %v1233_v59, %v7707_v63 }
 0x454   : > { %v1239_v11 = vadd.f32 %v1238_v7, %v7698_v56  ;;  %v1321_v33 = vmul.f32 %v1233_v59, %v7728_v8  ;;  %v7738_v37 = vmul.f32 %v1233_v59, %v7731_v23 }
 0x455   : > { %v7716_v14 = vpack.c.bf16 %v1299_v6, %v1296_v4  ;;  %v1319_v15 = vmul.f32 %v1237_v5, %v7701_v58  ;;  %v7723_v18 = vmul.f32 %v1237_v5, %v7707_v63  ;;  %v1322_v38 = vmul.f32 %v1237_v5, %v7728_v8 }
 0x456   : > { %v1336_v19 = vpack.c.bf16 %v1239_v11, %v1235_v10  ;;  %v7746_v41 = vmul.f32 %v1237_v5, %v7731_v23 }
 0x457   : > { %v1330_v21 = vpack.c.bf16 %v1319_v15, %v1318_v13  ;;  %v1333_v22 = vpack.c.bf16 %v7723_v18, %v7720_v17 }
 0x458   : > { %v1242_v24 = vpop.f32.mrb[4].mxu1  ;;  %v1303_v25 = vpop.f32.mrb[16].mxu0  ;;  %6385 = vmatprep.subr.bf16.mxu1 %v1336_v19 }
 0x459   : > { %v1243_v27 = vadd.f32 %v1242_v24, %v7691_v50  ;;  %v1244_v28 = vpop.f32.mrb[5].mxu1  ;;  %v6379_v29 = vpop.f32.mrb[17].mxu0  ;;  %6386 = vmatpush3.bf16.xpose.msra.mxu1 %v1336_v19  ;;  %6389 = vmatprep.mubr.bf16.mxu1 %v1330_v21  ;;  %v1304_v55 = vadd.f32 %v1303_v25, %v7695_v51 }
 0x45a   : > { %v1245_v12 = vadd.f32 %v1244_v28, %v7698_v56  ;;  %v1246_v31 = vpop.f32.mrb[6].mxu1  ;;  %v1306_v32 = vpop.f32.mrb[18].mxu0 }
 0x45b   : > { %v1320_v34 = vmul.f32 %v1243_v27, %v7701_v58  ;;  %v1248_v35 = vpop.f32.mrb[7].mxu1  ;;  %v6380_v36 = vpop.f32.mrb[19].mxu0  ;;  %v1323_v39 = vmul.f32 %v1243_v27, %v7728_v8  ;;  %v7743_v20 = vmul.f32 %v1243_v27, %v7707_v63  ;;  %v1247_v42 = vadd.f32 %v1246_v31, %v7691_v50 }
 0x45c   : > { %v1337_v16 = vpack.c.bf16 %v1245_v12, %v1245_v12  ;;  %v1329_v54 = vmul.f32 %v1243_v27, %v7731_v23  ;;  %v1307_v1 = vadd.f32 %v1306_v32, %v7695_v51  ;;  %v1249_v2 = vadd.f32 %v1248_v35, %v7698_v56 }
 0x45d   : > { %v1331_v40 = vpack.c.bf16 %v1321_v33, %v1320_v34  ;;  %v1332_v43 = vpack.c.bf16 %v1323_v39, %v1322_v38  ;;  %v1334_v46 = vpack.c.bf16 %v7738_v37, %v7743_v20  ;;  %v1699_v9 = vmul.f32 %v1247_v42, %v7728_v8 }
 0x45e   : > { %6387 = vmatprep.subr.bf16.mxu1 %v1337_v16  ;;  %v1335_v61 = vpack.c.bf16 %v1329_v54, %v7746_v41  ;;  %v1696_v15 = vmul.f32 %v1247_v42, %v7701_v58  ;;  %v1702_v19 = vmul.f32 %v1247_v42, %v7707_v63  ;;  %v1705_v33 = vmul.f32 %v1247_v42, %v7731_v23 }
 0x45f   : > { %v1571_v41 = vpack.c.bf16 %v1304_v55, %v1304_v55 }
 0x460   : > { %v1252_v59 = vpop.f32.mrb[8].mxu1  ;;  %v1311_v60 = vpop.f32.mrb[20].mxu0 }
 0x461   : > { %v1253_v4 = vadd.f32 %v1252_v59, %v7691_v50  ;;  %v1312_v5 = vadd.f32 %v1311_v60, %v7695_v51  ;;  %v1254_v6 = vpop.f32.mrb[9].mxu1  ;;  %v6383_v7 = vpop.f32.mrb[21].mxu0  ;;  %6388 = vmatpush3.bf16.xpose.msra.mxu1 %v1337_v16  ;;  %v1592_v59 = vsel %vm1590_vm9, %v1571_v41, 0 }
 0x462   : > { %v1255_v10 = vadd.f32 %v1254_v6, %v7698_v56  ;;  %v1256_v11 = vpop.f32.mrb[10].mxu1  ;;  %v1314_v13 = vpop.f32.mrb[22].mxu0  ;;  %6401 = vmatprep.subr.bf16.mxu1 %v7716_v14 }
 0x463   : > { %v7763_v21 = vpack.c.bf16 %v1312_v5, %v1307_v1  ;;  %v1257_v24 = vadd.f32 %v1256_v11, %v7691_v50  ;;  %v7767_v25 = vadd.f32 %v1314_v13, %v7695_v51  ;;  %v1258_v27 = vpop.f32.mrb[11].mxu1  ;;  %v6384_v28 = vpop.f32.mrb[23].mxu0  ;;  %v1697_v29 = vmul.f32 %v1253_v4, %v7701_v58 }
 0x464   : > { %v1714_v12 = vpack.c.bf16 %v1255_v10, %v1249_v2  ;;  %v1259_v31 = vadd.f32 %v1258_v27, %v7698_v56  ;;  %v1703_v32 = vmul.f32 %v1253_v4, %v7707_v63  ;;  %v1700_v36 = vmul.f32 %v1253_v4, %v7728_v8 }
 0x465   : > { %v1698_v34 = vmul.f32 %v1257_v24, %v7701_v58  ;;  %v1708_v35 = vpack.c.bf16 %v1697_v29, %v1696_v15  ;;  %v1701_v50 = vmul.f32 %v1257_v24, %v7728_v8  ;;  %v1704_v16 = vmul.f32 %v1257_v24, %v7707_v63 }
 0x466   : > { %v1715_v51 = vpack.c.bf16 %v1259_v31, %v1259_v31  ;;  %6417 = vmatprep.subr.bf16.mxu0 %v1714_v12  ;;  %v1711_v37 = vpack.c.bf16 %v1703_v32, %v1702_v19  ;;  %v1706_v38 = vmul.f32 %v1253_v4, %v7731_v23  ;;  %v1707_v20 = vmul.f32 %v1257_v24, %v7731_v23 }
 0x467   : > { %v1709_v39 = vpack.c.bf16 %v1699_v9, %v1698_v34  ;;  %6418 = vmatpush3.bf16.xpose.msra.mxu0 %v1714_v12  ;;  %6421 = vmatprep.mubr.bf16.mxu0 %v1708_v35  ;;  %v1710_v56 = vpack.c.bf16 %v1701_v50, %v1700_v36  ;;  %v1712_v42 = vpack.c.bf16 %v1705_v33, %v1704_v16 }
 0x468   : > { %6390 = vmatmul.mubr.bf16.vlgmr.msra.gmra.mrb[12].mxu1 %v1331_v40  ;;  %6419 = vmatprep.subr.bf16.mxu0 %v1715_v51  ;;  %v1713_v54 = vpack.c.bf16 %v1707_v20, %v1706_v38 }
 0x469   : > { %6393 = vmatprep.mubr.bf16.mxu1 %v1332_v43  ;;  %6402 = vmatpush3.bf16.msra.mxu1 %v7716_v14 }
 0x46a   : > { %6601 = vmatprep.subr.msk.bf16.mxu1 %vm1590_vm9, %v1571_v41 }
 0x46d   : > { %6404 = vmatpush3.bf16.msra.mxu1 %v1592_v59 }
 0x46e   : > { %6433 = vmatprep.subr.bf16.mxu1 %v7763_v21 }
 0x46f   : > { %6420 = vmatpush3.bf16.xpose.msra.mxu0 %v1715_v51 }
 0x470   : > { %6394 = vmatmul.mubr.bf16.gmra.mrb[16].mxu1 %v1333_v22  ;;  %6449 = vmatprep.subr.bf16.mxu0 %v9586_v3 }
 0x471   : > { %6397 = vmatprep.mubr.bf16.mxu1 %v1334_v46 }
 0x476   : > { %6422 = vmatmul.mubr.bf16.vlgmr.msra.gmra.mrb[24].mxu0 %v1709_v39 }
 0x477   : > { %6425 = vmatprep.mubr.bf16.mxu0 %v1710_v56 }
 0x478   : > { %6398 = vmatmul.mubr.bf16.gmra.mrb[20].mxu1 %v1335_v61 }
 0x47e   : > { %6426 = vmatmul.mubr.bf16.gmra.mrb[28].mxu0 %v1711_v37 }
 0x47f   : > { %6429 = vmatprep.mubr.bf16.mxu0 %v1712_v42 }
 0x486   : > { %6430 = vmatmul.mubr.bf16.gmra.mrb[32].mxu0 %v1713_v54 }
 0x487   : > { %6465 = vmatprep.mubr.msk.bf16.mxu0 %vm7331_vm0, %v9586_v3 }
 0x53b   : > { %v6391_v14 = vpop.f32.mrb[12].mxu1 }
 0x53c   : > { %v1372_v40 = vpop.f32.mrb[13].mxu1  ;;  %v7798_v46 = vsel %vm909_vm10, %v6391_v14, -1e+30 }
 0x53d   : > { %v7792_v17 = vsel %vm909_vm10, %v1372_v40, -1e+30  ;;  %v6392_v18 = vpop.f32.mrb[14].mxu1  ;;  %v1438_v1 = vsel %vm1431_vm11, %v7798_v46, -inf }
 0x53e   : > { %v1375_v22 = vpop.f32.mrb[15].mxu1  ;;  %v1432_v43 = vsel %vm1431_vm11, %v7792_v17, -inf  ;;  %v7808_v61 = vsel %vm909_vm10, %v6392_v18, -1e+30 }
 0x53f   : > { %v7802_v55 = vsel %vm909_vm10, %v1375_v22, -1e+30  ;;  %1433 = vmax.xlane.f32.xlu0 %v1432_v43  ;;  %v1441_v5 = vsel %vm1431_vm11, %v7808_v61, -inf }
 0x540   : > { %v1435_v60 = vsel %vm1431_vm11, %v7802_v55, -inf }
 0x541   : > { %1436 = vmax.xlane.f32.xlu1 %v1435_v60 }
 0x543   : > { %1439 = vmax.xlane.f32.xlu0 %v1438_v1  ;;  %v6395_v2 = vpop.f32.mrb[16].mxu1 }
 0x544   : > { %v1388_v4 = vpop.f32.mrb[17].mxu1  ;;  %v7822_v11 = vsel %vm909_vm10, %v6395_v2, -1e+30 }
 0x545   : > { %v7816_v6 = vsel %vm909_vm10, %v1388_v4, -1e+30  ;;  %1442 = vmax.xlane.f32.xlu1 %v1441_v5  ;;  %v6396_v7 = vpop.f32.mrb[18].mxu1  ;;  %v1450_v28 = vsel %vm1431_vm11, %v7822_v11, -inf }
 0x546   : > { %v1391_v9 = vpop.f32.mrb[19].mxu1  ;;  %v1444_v10 = vsel %vm1431_vm11, %v7816_v6, -inf  ;;  %v7832_v19 = vsel %vm909_vm10, %v6396_v7, -1e+30 }
 0x547   : > { %v7826_v13 = vsel %vm909_vm10, %v1391_v9, -1e+30  ;;  %1445 = vmax.xlane.f32.xlu0 %v1444_v10  ;;  %v1453_v33 = vsel %vm1431_vm11, %v7832_v19, -inf }
 0x548   : > { %v1447_v15 = vsel %vm1431_vm11, %v7826_v13, -inf }
 0x549   : > { %1448 = vmax.xlane.f32.xlu1 %v1447_v15  ;;  %v6423_v24 = vpop.f32.mrb[24].mxu0 }
 0x54a   : > { %v1750_v27 = vpop.f32.mrb[25].mxu0  ;;  %v7874_v18 = vsel %vm909_vm10, %v6423_v24, -1e+30 }
 0x54b   : > { %1451 = vmax.xlane.f32.xlu0 %v1450_v28  ;;  %v6399_v29 = vpop.f32.mrb[20].mxu1  ;;  %v6424_v12 = vpop.f32.mrb[26].mxu0  ;;  %v7862_v41 = vsel %vm909_vm10, %v1750_v27, -1e+30  ;;  %v1815_v2 = vsel %vm1431_vm11, %v7874_v18, -inf }
 0x54c   : > { %v1404_v31 = vpop.f32.mrb[21].mxu1  ;;  %v1753_v32 = vpop.f32.mrb[27].mxu0  ;;  %v7846_v51 = vsel %vm909_vm10, %v6399_v29, -1e+30  ;;  %v1809_v40 = vsel %vm1431_vm11, %v7862_v41, -inf }
 0x54d   : > { %v7840_v34 = vsel %vm909_vm10, %v1404_v31, -1e+30  ;;  %1454 = vmax.xlane.f32.xlu1 %v1453_v33  ;;  %v6400_v35 = vpop.f32.mrb[22].mxu1  ;;  %v1462_v20 = vsel %vm1431_vm11, %v7846_v51, -inf  ;;  %v7868_v14 = vsel %vm909_vm10, %v1753_v32, -1e+30 }
 0x54e   : > { %v1407_v36 = vpop.f32.mrb[23].mxu1  ;;  %v1456_v50 = vsel %vm1431_vm11, %v7840_v34, -inf  ;;  %v7856_v38 = vsel %vm909_vm10, %v6400_v35, -1e+30  ;;  %v1812_v22 = vsel %vm1431_vm11, %v7868_v14, -inf }
 0x54f   : > { %v7850_v37 = vsel %vm909_vm10, %v1407_v36, -1e+30  ;;  %1457 = vmax.xlane.f32.xlu0 %v1456_v50  ;;  %v1465_v59 = vsel %vm1431_vm11, %v7856_v38, -inf  ;;  %v7880_v43 = vsel %vm909_vm10, %v6424_v12, -1e+30 }
 0x550   : > { %v1459_v16 = vsel %vm1431_vm11, %v7850_v37, -inf  ;;  %v1818_v9 = vsel %vm1431_vm11, %v7880_v43, -inf }
 0x551   : > { %1460 = vmax.xlane.f32.xlu1 %v1459_v16  ;;  %v6427_v39 = vpop.f32.mrb[28].mxu0 }
 0x552   : > { %v1766_v56 = vpop.f32.mrb[29].mxu0  ;;  %v7898_v24 = vsel %vm909_vm10, %v6427_v39, -1e+30 }
 0x553   : > { %1463 = vmax.xlane.f32.xlu0 %v1462_v20  ;;  %v6428_v42 = vpop.f32.mrb[30].mxu0  ;;  %v7886_v4 = vsel %vm909_vm10, %v1766_v56, -1e+30  ;;  %v1827_v29 = vsel %vm1431_vm11, %v7898_v24, -inf }
 0x554   : > { %v1769_v54 = vpop.f32.mrb[31].mxu0  ;;  %v1821_v15 = vsel %vm1431_vm11, %v7886_v4, -inf  ;;  %v7904_v28 = vsel %vm909_vm10, %v6428_v42, -1e+30 }
 0x555   : > { %1466 = vmax.xlane.f32.xlu1 %v1465_v59  ;;  %v7892_v10 = vsel %vm909_vm10, %v1769_v54, -1e+30  ;;  %v1830_v31 = vsel %vm1431_vm11, %v7904_v28, -inf }
 0x556   : > { %v1824_v27 = vsel %vm1431_vm11, %v7892_v10, -inf }
 0x557   : > { %1810 = vmax.xlane.f32.xlu0 %v1809_v40 }
 0x559   : > { %1813 = vmax.xlane.f32.xlu1 %v1812_v22  ;;  %v6431_v60 = vpop.f32.mrb[32].mxu0 }
 0x55a   : > { %v1782_v1 = vpop.f32.mrb[33].mxu0  ;;  %v7922_v35 = vsel %vm909_vm10, %v6431_v60, -1e+30 }
 0x55b   : > { %1816 = vmax.xlane.f32.xlu0 %v1815_v2  ;;  %v6432_v5 = vpop.f32.mrb[34].mxu0  ;;  %v7910_v12 = vsel %vm909_vm10, %v1782_v1, -1e+30  ;;  %v1839_v16 = vsel %vm1431_vm11, %v7922_v35, -inf }
 0x55c   : > { %v1785_v7 = vpop.f32.mrb[35].mxu0  ;;  %v1833_v33 = vsel %vm1431_vm11, %v7910_v12, -inf  ;;  %v7928_v50 = vsel %vm909_vm10, %v6432_v5, -1e+30 }
 0x55d   : > { %1819 = vmax.xlane.f32.xlu1 %v1818_v9  ;;  %v7916_v32 = vsel %vm909_vm10, %v1785_v7, -1e+30  ;;  %v1842_v39 = vsel %vm1431_vm11, %v7928_v50, -inf }
 0x55e   : > { %v1836_v36 = vsel %vm1431_vm11, %v7916_v32, -inf }
 0x55f   : > { %1822 = vmax.xlane.f32.xlu0 %v1821_v15 }
 0x561   : > { %1825 = vmax.xlane.f32.xlu1 %v1824_v27 }
 0x563   : > { %1828 = vmax.xlane.f32.xlu0 %v1827_v29 }
 0x565   : > { %1831 = vmax.xlane.f32.xlu1 %v1830_v31 }
 0x567   : > { %1834 = vmax.xlane.f32.xlu0 %v1833_v33 }
 0x569   : > { %1837 = vmax.xlane.f32.xlu1 %v1836_v36 }
 0x56b   : > { %1840 = vmax.xlane.f32.xlu0 %v1839_v16 }
 0x56d   : > { %1843 = vmax.xlane.f32.xlu1 %v1842_v39 }
 0x5cc   : > { %v1434_v56 = vpop.xlane.xlu0 %1433 }
 0x5cd   : > { %v1468_v20 = vsub.f32 %v7792_v17, %v1434_v56 }
 0x5ce   : > { %v1437_v42 = vpop.xlane.xlu1 %1436 }
 0x5cf   : > { %v1480_v54 = vmul.f32 1.442695, %v1468_v20  ;;  %v1469_v59 = vsub.f32 %v7802_v55, %v1437_v42 }
 0x5d0   : > { %v1440_v40 = vpop.xlane.xlu0 %1439 }
 0x5d1   : > { %6897 = vpow2.f32 %v1480_v54  ;;  %v1482_v22 = vmul.f32 1.442695, %v1469_v59  ;;  %v1470_v60 = vsub.f32 %v7798_v46, %v1440_v40 }
 0x5d2   : > { %v1443_v1 = vpop.xlane.xlu1 %1442 }
 0x5d3   : > { %6899 = vpow2.f32 %v1482_v22  ;;  %v1484_v2 = vmul.f32 1.442695, %v1470_v60  ;;  %v1471_v5 = vsub.f32 %v7808_v61, %v1443_v1 }
 0x5d4   : > { %v1446_v7 = vpop.xlane.xlu0 %1445 }
 0x5d5   : > { %6901 = vpow2.f32 %v1484_v2  ;;  %v1486_v9 = vmul.f32 1.442695, %v1471_v5  ;;  %v1472_v15 = vsub.f32 %v7816_v6, %v1446_v7 }
 0x5d6   : > { %v1449_v17 = vpop.xlane.xlu1 %1448 }
 0x5d7   : > { %6903 = vpow2.f32 %v1486_v9  ;;  %v1488_v27 = vmul.f32 1.442695, %v1472_v15  ;;  %v1473_v55 = vsub.f32 %v7826_v13, %v1449_v17 }
 0x5d8   : > { %v1452_v29 = vpop.xlane.xlu0 %1451 }
 0x5d9   : > { %6905 = vpow2.f32 %v1488_v27  ;;  %v1490_v31 = vmul.f32 1.442695, %v1473_v55  ;;  %v1474_v46 = vsub.f32 %v7822_v11, %v1452_v29 }
 0x5da   : > { %v1455_v33 = vpop.xlane.xlu1 %1454 }
 0x5db   : > { %v7941_v36 = vpop.eup %6897  ;;  %6907 = vpow2.f32 %v1490_v31  ;;  %v1492_v61 = vmul.f32 1.442695, %v1474_v46  ;;  %v1475_v16 = vsub.f32 %v7832_v19, %v1455_v33 }
 0x5dc   : > { %v1458_v39 = vpop.xlane.xlu0 %1457  ;;  %v1504_v6 = vsel %vm1431_vm11, %v7941_v36, 0.0 }
 0x5dd   : > { %v7946_v56 = vpop.eup %6899  ;;  %6909 = vpow2.f32 %v1492_v61  ;;  %v1494_v13 = vmul.f32 1.442695, %v1475_v16  ;;  %v1476_v20 = vsub.f32 %v7840_v34, %v1458_v39  ;;  %1505 = vadd.xlane.f32.xlu0 %v1504_v6 }
 0x5de   : > { %v1461_v42 = vpop.xlane.xlu1 %1460  ;;  %v1507_v11 = vsel %vm1431_vm11, %v7946_v56, 0.0 }
 0x5df   : > { %v7951_v54 = vpop.eup %6901  ;;  %6911 = vpow2.f32 %v1494_v13  ;;  %v1496_v59 = vmul.f32 1.442695, %v1476_v20  ;;  %v1477_v19 = vsub.f32 %v7850_v37, %v1461_v42  ;;  %1508 = vadd.xlane.f32.xlu1 %v1507_v11 }
 0x5e0   : > { %v1464_v40 = vpop.xlane.xlu0 %1463  ;;  %v1510_v22 = vsel %vm1431_vm11, %v7951_v54, 0.0 }
 0x5e1   : > { %v7956_v60 = vpop.eup %6903  ;;  %6913 = vpow2.f32 %v1496_v59  ;;  %v1498_v34 = vmul.f32 1.442695, %v1477_v19  ;;  %v1478_v1 = vsub.f32 %v7846_v51, %v1464_v40  ;;  %1511 = vadd.xlane.f32.xlu0 %v1510_v22 }
 0x5e2   : > { %v1467_v2 = vpop.xlane.xlu1 %1466  ;;  %v1513_v5 = vsel %vm1431_vm11, %v7956_v60, 0.0 }
 0x5e3   : > { %v7961_v7 = vpop.eup %6905  ;;  %6915 = vpow2.f32 %v1498_v34  ;;  %v1500_v37 = vmul.f32 1.442695, %v1478_v1  ;;  %v1479_v9 = vsub.f32 %v7856_v38, %v1467_v2  ;;  %1514 = vadd.xlane.f32.xlu1 %v1513_v5 }
 0x5e4   : > { %v1811_v15 = vpop.xlane.xlu0 %1810  ;;  %v1516_v17 = vsel %vm1431_vm11, %v7961_v7, 0.0 }
 0x5e5   : > { %v7966_v27 = vpop.eup %6907  ;;  %6917 = vpow2.f32 %v1500_v37  ;;  %v1502_v51 = vmul.f32 1.442695, %v1479_v9  ;;  %v1845_v55 = vsub.f32 %v7862_v41, %v1811_v15  ;;  %1517 = vadd.xlane.f32.xlu0 %v1516_v17 }
 0x5e6   : > { %v1814_v29 = vpop.xlane.xlu1 %1813  ;;  %v1519_v31 = vsel %vm1431_vm11, %v7966_v27, 0.0 }
 0x5e7   : > { %v7971_v46 = vpop.eup %6909  ;;  %6919 = vpow2.f32 %v1502_v51  ;;  %v1857_v38 = vmul.f32 1.442695, %v1845_v55  ;;  %v1846_v33 = vsub.f32 %v7868_v14, %v1814_v29  ;;  %1520 = vadd.xlane.f32.xlu1 %v1519_v31 }
 0x5e8   : > { %v1817_v61 = vpop.xlane.xlu0 %1816  ;;  %v1522_v16 = vsel %vm1431_vm11, %v7971_v46, 0.0 }
 0x5e9   : > { %v7976_v39 = vpop.eup %6911  ;;  %6921 = vpow2.f32 %v1857_v38  ;;  %v1859_v41 = vmul.f32 1.442695, %v1846_v33  ;;  %v1847_v6 = vsub.f32 %v7874_v18, %v1817_v61  ;;  %1523 = vadd.xlane.f32.xlu0 %v1522_v16 }
 0x5ea   : > { %v1820_v13 = vpop.xlane.xlu1 %1819  ;;  %v1525_v20 = vsel %vm1431_vm11, %v7976_v39, 0.0 }
 0x5eb   : > { %v7981_v42 = vpop.eup %6913  ;;  %6923 = vpow2.f32 %v1859_v41  ;;  %v1861_v14 = vmul.f32 1.442695, %v1847_v6  ;;  %v1848_v11 = vsub.f32 %v7880_v43, %v1820_v13  ;;  %1526 = vadd.xlane.f32.xlu1 %v1525_v20 }
 0x5ec   : > { %v1823_v59 = vpop.xlane.xlu0 %1822  ;;  %v1528_v19 = vsel %vm1431_vm11, %v7981_v42, 0.0 }
 0x5ed   : > { %v7986_v40 = vpop.eup %6915  ;;  %6925 = vpow2.f32 %v1861_v14  ;;  %v1863_v18 = vmul.f32 1.442695, %v1848_v11  ;;  %v1849_v22 = vsub.f32 %v7886_v4, %v1823_v59  ;;  %1529 = vadd.xlane.f32.xlu0 %v1528_v19 }
 0x5ee   : > { %v1826_v34 = vpop.xlane.xlu1 %1825  ;;  %v1531_v1 = vsel %vm1431_vm11, %v7986_v40, 0.0 }
 0x5ef   : > { %v7991_v2 = vpop.eup %6917  ;;  %6927 = vpow2.f32 %v1863_v18  ;;  %v1865_v43 = vmul.f32 1.442695, %v1849_v22  ;;  %v1850_v5 = vsub.f32 %v7892_v10, %v1826_v34  ;;  %1532 = vadd.xlane.f32.xlu1 %v1531_v1 }
 0x5f0   : > { %v1829_v37 = vpop.xlane.xlu0 %1828  ;;  %v1534_v9 = vsel %vm1431_vm11, %v7991_v2, 0.0 }
 0x5f1   : > { %v7996_v15 = vpop.eup %6919  ;;  %6929 = vpow2.f32 %v1865_v43  ;;  %v1867_v4 = vmul.f32 1.442695, %v1850_v5  ;;  %v1851_v17 = vsub.f32 %v7898_v24, %v1829_v37  ;;  %1535 = vadd.xlane.f32.xlu0 %v1534_v9 }
 0x5f2   : > { %v1832_v51 = vpop.xlane.xlu1 %1831  ;;  %v1537_v55 = vsel %vm1431_vm11, %v7996_v15, 0.0 }
 0x5f3   : > { %v8001_v29 = vpop.eup %6921  ;;  %6931 = vpow2.f32 %v1867_v4  ;;  %v1869_v10 = vmul.f32 1.442695, %v1851_v17  ;;  %v1852_v31 = vsub.f32 %v7904_v28, %v1832_v51  ;;  %1538 = vadd.xlane.f32.xlu1 %v1537_v55 }
 0x5f4   : > { %v1835_v38 = vpop.xlane.xlu0 %1834  ;;  %v1881_v33 = vsel %vm1431_vm11, %v8001_v29, 0.0 }
 0x5f5   : > { %v8006_v61 = vpop.eup %6923  ;;  %6933 = vpow2.f32 %v1869_v10  ;;  %v1871_v24 = vmul.f32 1.442695, %v1852_v31  ;;  %v1853_v16 = vsub.f32 %v7910_v12, %v1835_v38  ;;  %1882 = vadd.xlane.f32.xlu0 %v1881_v33 }
 0x5f6   : > { %v1838_v41 = vpop.xlane.xlu1 %1837  ;;  %v1884_v6 = vsel %vm1431_vm11, %v8006_v61, 0.0 }
 0x5f7   : > { %v8011_v13 = vpop.eup %6925  ;;  %6935 = vpow2.f32 %v1871_v24  ;;  %v1873_v28 = vmul.f32 1.442695, %v1853_v16  ;;  %v1854_v20 = vsub.f32 %v7916_v32, %v1838_v41  ;;  %1885 = vadd.xlane.f32.xlu1 %v1884_v6  ;;  %v6665_v41 = vld [vmem:[%s9572_s9] sm:$0xff]   ;;  %v6666_v6 = vld [vmem:[%s9572_s9 + $0x8] sm:$0xff]  }
 0x5f8   : > { %v1841_v14 = vpop.xlane.xlu0 %1840  ;;  %v1887_v11 = vsel %vm1431_vm11, %v8011_v13, 0.0  ;;  %6450 = vmatpush3.bf16.msra.mxu0 %v6665_v41 }
 0x5f9   : > { %v8016_v59 = vpop.eup %6927  ;;  %6937 = vpow2.f32 %v1873_v28  ;;  %v1875_v12 = vmul.f32 1.442695, %v1854_v20  ;;  %v1855_v19 = vsub.f32 %v7922_v35, %v1841_v14  ;;  %1888 = vadd.xlane.f32.xlu0 %v1887_v11  ;;  %6451 = vmatprep.subr.bf16.mxu0 %v9586_v3 }
 0x5fa   : > { %v1844_v18 = vpop.xlane.xlu1 %1843  ;;  %v1890_v22 = vsel %vm1431_vm11, %v8016_v59, 0.0 }
 0x5fb   : > { %v8021_v34 = vpop.eup %6929  ;;  %6939 = vpow2.f32 %v1875_v12  ;;  %v1877_v32 = vmul.f32 1.442695, %v1855_v19  ;;  %v1856_v1 = vsub.f32 %v7928_v50, %v1844_v18  ;;  %1891 = vadd.xlane.f32.xlu1 %v1890_v22 }
 0x5fc   : > { %v1893_v43 = vsel %vm1431_vm11, %v8021_v34, 0.0  ;;  %6452 = vmatpush3.bf16.msra.mxu0 %v6666_v6 }
 0x5fd   : > { %v8026_v5 = vpop.eup %6931  ;;  %6941 = vpow2.f32 %v1877_v32  ;;  %v1879_v37 = vmul.f32 1.442695, %v1856_v1  ;;  %1894 = vadd.xlane.f32.xlu0 %v1893_v43  ;;  %6453 = vmatprep.subr.bf16.mxu0 %v9586_v3 }
 0x5fe   : > { %v1896_v35 = vsel %vm1431_vm11, %v8026_v5, 0.0 }
 0x5ff   : > { %v8030_v9 = vpop.eup %6933  ;;  %6943 = vpow2.f32 %v1879_v37  ;;  %1897 = vadd.xlane.f32.xlu1 %v1896_v35 }
 0x600   : > { %v1899_v4 = vsel %vm1431_vm11, %v8030_v9, 0.0 }
 0x601   : > { %v8034_v50 = vpop.eup %6935  ;;  %1900 = vadd.xlane.f32.xlu0 %v1899_v4 }
 0x602   : > { %v1902_v17 = vsel %vm1431_vm11, %v8034_v50, 0.0 }
 0x603   : > { %v8038_v51 = vpop.eup %6937  ;;  %1903 = vadd.xlane.f32.xlu1 %v1902_v17 }
 0x604   : > { %v1905_v55 = vsel %vm1431_vm11, %v8038_v51, 0.0 }
 0x605   : > { %v8042_v10 = vpop.eup %6939  ;;  %1906 = vadd.xlane.f32.xlu0 %v1905_v55 }
 0x606   : > { %v1908_v31 = vsel %vm1431_vm11, %v8042_v10, 0.0 }
 0x607   : > { %v8046_v38 = vpop.eup %6941  ;;  %1909 = vadd.xlane.f32.xlu1 %v1908_v31 }
 0x608   : > { %v1911_v33 = vsel %vm1431_vm11, %v8046_v38, 0.0 }
 0x609   : > { %v8050_v24 = vpop.eup %6943  ;;  %1912 = vadd.xlane.f32.xlu0 %v1911_v33 }
 0x60a   : > { %v1914_v16 = vsel %vm1431_vm11, %v8050_v24, 0.0 }
 0x60b   : > { %1915 = vadd.xlane.f32.xlu1 %v1914_v16 }
 0x66a   : > { %v1506_v28 = vpop.xlane.xlu0 %1505 }
 0x66b   : > { %6945 = vrcp.f32 %v1506_v28 }
 0x66c   : > { %v1509_v20 = vpop.xlane.xlu1 %1508 }
 0x66d   : > { %6947 = vrcp.f32 %v1509_v20 }
 0x66e   : > { %v1512_v14 = vpop.xlane.xlu0 %1511 }
 0x66f   : > { %6949 = vrcp.f32 %v1512_v14 }
 0x670   : > { %v1515_v11 = vpop.xlane.xlu1 %1514 }
 0x671   : > { %6951 = vrcp.f32 %v1515_v11 }
 0x672   : > { %v1518_v12 = vpop.xlane.xlu0 %1517 }
 0x673   : > { %6953 = vrcp.f32 %v1518_v12 }
 0x674   : > { %v1521_v19 = vpop.xlane.xlu1 %1520 }
 0x675   : > { %v6946_v18 = vpop.eup %6945  ;;  %6955 = vrcp.f32 %v1521_v19 }
 0x676   : > { %v1524_v22 = vpop.xlane.xlu0 %1523  ;;  %v1552_v43 = vmul.f32 %v6946_v18, %v7941_v36 }
 0x677   : > { %v6948_v32 = vpop.eup %6947  ;;  %6957 = vrcp.f32 %v1524_v22 }
 0x678   : > { %v1527_v1 = vpop.xlane.xlu1 %1526  ;;  %v1553_v37 = vmul.f32 %v6948_v32, %v7946_v56  ;;  %v1948_v56 = vpack.c.bf16 %v7767_v25, %v7767_v25 }
 0x679   : > { %v6950_v35 = vpop.eup %6949  ;;  %6959 = vrcp.f32 %v1527_v1 }
 0x67a   : > { %v1530_v4 = vpop.xlane.xlu0 %1529  ;;  %v1564_v17 = vpack.c.bf16 %v1553_v37, %v1552_v43  ;;  %v1554_v31 = vmul.f32 %v6950_v35, %v7951_v54  ;;  %v1968_v18 = vsel %vm1590_vm9, %v1948_v56, 0 }
 0x67b   : > { %v6952_v55 = vpop.eup %6951  ;;  %6961 = vrcp.f32 %v1530_v4 }
 0x67c   : > { %v1555_v33 = vmul.f32 %v6952_v55, %v7956_v60  ;;  %6405 = vmatprep.mubr.msk.bf16.mxu1 %vm1431_vm11, %v1564_v17  ;;  %v1533_v16 = vpop.xlane.xlu1 %1532 }
 0x67d   : > { %v6954_v41 = vpop.eup %6953  ;;  %6963 = vrcp.f32 %v1533_v16 }
 0x67e   : > { %v1565_v6 = vpack.c.bf16 %v1555_v33, %v1554_v31  ;;  %v1536_v28 = vpop.xlane.xlu0 %1535  ;;  %v1556_v14 = vmul.f32 %v6954_v41, %v7961_v7 }
 0x67f   : > { %v6956_v36 = vpop.eup %6955  ;;  %6965 = vrcp.f32 %v1536_v28 }
 0x680   : > { %6406 = vmatmul.mubr.msk.bf16.vlgmr.msra.gmra.mrb[24].mxu1 %vm1431_vm11, %v1565_v6  ;;  %v1539_v20 = vpop.xlane.xlu1 %1538  ;;  %v1557_v54 = vmul.f32 %v6956_v36, %v7966_v27 }
 0x681   : > { %v6958_v60 = vpop.eup %6957  ;;  %6434 = vmatpush3.bf16.msra.mxu1 %v7763_v21  ;;  %6967 = vrcp.f32 %v1539_v20 }
 0x682   : > { %6602 = vmatprep.subr.msk.bf16.mxu1 %vm1590_vm9, %v1948_v56  ;;  %v1883_v11 = vpop.xlane.xlu0 %1882  ;;  %v1566_v12 = vpack.c.bf16 %v1557_v54, %v1556_v14  ;;  %v1558_v22 = vmul.f32 %v6958_v60, %v7971_v46 }
 0x683   : > { %v6960_v19 = vpop.eup %6959  ;;  %6969 = vrcp.f32 %v1883_v11 }
 0x684   : > { %6409 = vmatprep.mubr.msk.bf16.mxu1 %vm1431_vm11, %v1566_v12  ;;  %v1886_v25 = vpop.xlane.xlu1 %1885  ;;  %v1559_v7 = vmul.f32 %v6960_v19, %v7976_v39 }
 0x685   : > { %v6962_v27 = vpop.eup %6961  ;;  %6436 = vmatpush3.bf16.msra.mxu1 %v1968_v18  ;;  %6971 = vrcp.f32 %v1886_v25 }
 0x686   : > { %v1889_v21 = vpop.xlane.xlu0 %1888  ;;  %v1567_v32 = vpack.c.bf16 %v1559_v7, %v1558_v22  ;;  %v1560_v37 = vmul.f32 %v6962_v27, %v7981_v42 }
 0x687   : > { %v6964_v1 = vpop.eup %6963  ;;  %6973 = vrcp.f32 %v1889_v21 }
 0x688   : > { %6410 = vmatmul.mubr.msk.bf16.gmra.mrb[28].mxu1 %vm1431_vm11, %v1567_v32  ;;  %v1892_v43 = vpop.xlane.xlu1 %1891  ;;  %v1561_v35 = vmul.f32 %v6964_v1, %v7986_v40 }
 0x689   : > { %v6966_v4 = vpop.eup %6965  ;;  %6975 = vrcp.f32 %v1892_v43 }
 0x68a   : > { %v1895_v17 = vpop.xlane.xlu0 %1894  ;;  %v1568_v46 = vpack.c.bf16 %v1561_v35, %v1560_v37  ;;  %v1562_v31 = vmul.f32 %v6966_v4, %v7991_v2 }
 0x68b   : > { %v6968_v55 = vpop.eup %6967  ;;  %6977 = vrcp.f32 %v1895_v17 }
 0x68c   : > { %6413 = vmatprep.mubr.msk.bf16.mxu1 %vm1431_vm11, %v1568_v46  ;;  %v1898_v39 = vpop.xlane.xlu1 %1897  ;;  %v1563_v33 = vmul.f32 %v6968_v55, %v7996_v15  ;;  %v6672_v46 = vld [vmem:[%s9572_s9 + $0x38] sm:$0xff]  }
 0x68d   : > { %v6970_v16 = vpop.eup %6969  ;;  %6979 = vrcp.f32 %v1898_v39 }
 0x68e   : > { %v1901_v41 = vpop.xlane.xlu0 %1900  ;;  %v1569_v6 = vpack.c.bf16 %v1563_v33, %v1562_v31  ;;  %v1929_v28 = vmul.f32 %v6970_v16, %v8001_v29 }
 0x68f   : > { %v6972_v42 = vpop.eup %6971  ;;  %6981 = vrcp.f32 %v1901_v41 }
 0x690   : > { %6414 = vmatmul.mubr.msk.bf16.gmra.mrb[32].mxu1 %vm1431_vm11, %v1569_v6  ;;  %v1904_v40 = vpop.xlane.xlu1 %1903  ;;  %v1930_v36 = vmul.f32 %v6972_v42, %v8006_v61 }
 0x691   : > { %v6974_v56 = vpop.eup %6973  ;;  %6983 = vrcp.f32 %v1904_v40 }
 0x692   : > { %v1907_v20 = vpop.xlane.xlu0 %1906  ;;  %v1941_v14 = vpack.c.bf16 %v1930_v36, %v1929_v28  ;;  %v1931_v15 = vmul.f32 %v6974_v56, %v8011_v13 }
 0x693   : > { %v6976_v2 = vpop.eup %6975  ;;  %6985 = vrcp.f32 %v1907_v20 }
 0x694   : > { %v1932_v54 = vmul.f32 %v6976_v2, %v8016_v59  ;;  %6437 = vmatprep.mubr.msk.bf16.mxu1 %vm1431_vm11, %v1941_v14  ;;  %v1910_v60 = vpop.xlane.xlu1 %1909 }
 0x695   : > { %v6978_v11 = vpop.eup %6977  ;;  %6987 = vrcp.f32 %v1910_v60 }
 0x696   : > { %v1942_v12 = vpack.c.bf16 %v1932_v54, %v1931_v15  ;;  %v1913_v19 = vpop.xlane.xlu0 %1912  ;;  %v1933_v18 = vmul.f32 %v6978_v11, %v8021_v34 }
 0x697   : > { %v6980_v29 = vpop.eup %6979  ;;  %6989 = vrcp.f32 %v1913_v19 }
 0x698   : > { %6438 = vmatmul.mubr.msk.bf16.vlgmr.msra.gmra.mrb[36].mxu1 %vm1431_vm11, %v1942_v12  ;;  %v1916_v61 = vpop.xlane.xlu1 %1915  ;;  %v1934_v25 = vmul.f32 %v6980_v29, %v8026_v5 }
 0x699   : > { %v6982_v22 = vpop.eup %6981  ;;  %6991 = vrcp.f32 %v1916_v61 }
 0x69a   : > { %v1943_v13 = vpack.c.bf16 %v1934_v25, %v1933_v18  ;;  %v1935_v7 = vmul.f32 %v6982_v22, %v8030_v9 }
 0x69b   : > { %v6984_v59 = vpop.eup %6983 }
 0x69c   : > { %6441 = vmatprep.mubr.msk.bf16.mxu1 %vm1431_vm11, %v1943_v13  ;;  %v1936_v27 = vmul.f32 %v6984_v59, %v8034_v50  ;;  %v6667_v50 = vld [vmem:[%s9572_s9 + $0x10] sm:$0xff]  }
 0x69d   : > { %v6986_v21 = vpop.eup %6985  ;;  %6454 = vmatpush3.bf16.msra.mxu0 %v6667_v50 }
 0x69e   : > { %v1944_v32 = vpack.c.bf16 %v1936_v27, %v1935_v7  ;;  %v1937_v43 = vmul.f32 %v6986_v21, %v8038_v51  ;;  %v6668_v51 = vld [vmem:[%s9572_s9 + $0x18] sm:$0xff]   ;;  %6455 = vmatprep.subr.bf16.mxu0 %v9586_v3 }
 0x69f   : > { %v6988_v1 = vpop.eup %6987 }
 0x6a0   : > { %6442 = vmatmul.mubr.msk.bf16.gmra.mrb[40].mxu1 %vm1431_vm11, %v1944_v32  ;;  %v1938_v34 = vmul.f32 %v6988_v1, %v8042_v10  ;;  %v6669_v10 = vld [vmem:[%s9572_s9 + $0x20] sm:$0xff]  }
 0x6a1   : > { %v6990_v5 = vpop.eup %6989  ;;  %6456 = vmatpush3.bf16.msra.mxu0 %v6668_v51 }
 0x6a2   : > { %v1945_v37 = vpack.c.bf16 %v1938_v34, %v1937_v43  ;;  %v1939_v4 = vmul.f32 %v6990_v5, %v8046_v38  ;;  %6457 = vmatprep.subr.bf16.mxu0 %v9586_v3  ;;  %v6670_v38 = vld [vmem:[%s9572_s9 + $0x28] sm:$0xff]  }
 0x6a3   : > { %v6992_v35 = vpop.eup %6991 }
 0x6a4   : > { %6445 = vmatprep.mubr.msk.bf16.mxu1 %vm1431_vm11, %v1945_v37  ;;  %v1940_v9 = vmul.f32 %v6992_v35, %v8050_v24  ;;  %v6671_v24 = vld [vmem:[%s9572_s9 + $0x30] sm:$0xff]  }
 0x6a5   : > { %6458 = vmatpush3.bf16.msra.mxu0 %v6669_v10 }
 0x6a6   : > { %v1946_v17 = vpack.c.bf16 %v1940_v9, %v1939_v4  ;;  %6459 = vmatprep.subr.bf16.mxu0 %v9586_v3 }
 0x6a8   : > { %6446 = vmatmul.mubr.msk.bf16.gmra.mrb[44].mxu1 %vm1431_vm11, %v1946_v17 }
 0x6a9   : > { %2550 = vmatprep.mubr.bf16.mxu1 %v7330_v52  ;;  %6460 = vmatpush3.bf16.msra.mxu0 %v6670_v38 }
 0x6aa   : > { %6461 = vmatprep.subr.bf16.mxu0 %v9586_v3 }
 0x6ad   : > { %6462 = vmatpush3.bf16.msra.mxu0 %v6671_v24 }
 0x6ae   : > { %6463 = vmatprep.subr.bf16.mxu0 %v9586_v3 }
 0x6b1   : > { %6464 = vmatpush3.bf16.msra.mxu0 %v6672_v46 }
 0x753   : > { %v6407_v55 = vpop.f32.mrb[24].mxu1 }
 0x754   : > { %v1628_v39 = vpop.f32.mrb[25].mxu1  ;;  %v1677_v54 = vmul.f32 %v6407_v55, %v7701_v58 }
 0x755   : > { %v1675_v31 = vmul.f32 %v1628_v39, %v7701_v58  ;;  %v6408_v33 = vpop.f32.mrb[26].mxu1 }
 0x756   : > { %v1678_v16 = vmul.f32 %v6408_v33, %v7728_v8  ;;  %v1631_v41 = vpop.f32.mrb[27].mxu1 }
 0x757   : > { %v1676_v36 = vmul.f32 %v1631_v41, %v7701_v58 }
 0x758   : > { %v1687_v6 = vadd.f32 %v1678_v16, %v1675_v31 }
 0x75b   : > { %v6411_v42 = vpop.f32.mrb[28].mxu1 }
 0x75c   : > { %v1681_v40 = vmul.f32 %v6411_v42, %v7707_v63  ;;  %v1644_v28 = vpop.f32.mrb[29].mxu1 }
 0x75d   : > { %v1679_v56 = vmul.f32 %v1644_v28, %v7728_v8  ;;  %v6412_v20 = vpop.f32.mrb[30].mxu1 }
 0x75e   : > { %v1690_v14 = vadd.f32 %v1687_v6, %v1681_v40  ;;  %v1682_v2 = vmul.f32 %v6412_v20, %v7707_v63  ;;  %v1647_v15 = vpop.f32.mrb[31].mxu1 }
 0x75f   : > { %v1688_v60 = vadd.f32 %v1679_v56, %v1676_v36  ;;  %v1680_v11 = vmul.f32 %v1647_v15, %v7728_v8 }
 0x761   : > { %v1691_v12 = vadd.f32 %v1688_v60, %v1682_v2  ;;  %v1689_v19 = vadd.f32 %v1680_v11, %v1677_v54 }
 0x763   : > { %v6415_v29 = vpop.f32.mrb[32].mxu1 }
 0x764   : > { %v1685_v61 = vmul.f32 %v6415_v29, %v7731_v23  ;;  %v1660_v18 = vpop.f32.mrb[33].mxu1 }
 0x765   : > { %v1683_v25 = vmul.f32 %v1660_v18, %v7707_v63  ;;  %v6416_v22 = vpop.f32.mrb[34].mxu1 }
 0x766   : > { %v1694_v13 = vadd.f32 %v1691_v12, %v1685_v61  ;;  %v1686_v59 = vmul.f32 %v6416_v22, %v7731_v23  ;;  %v1663_v7 = vpop.f32.mrb[35].mxu1  ;;  %v5686_v61 = vld [vmem:[%s9573_s10] ss:$0 sm:$0xff] }
 0x767   : > { %v1692_v27 = vadd.f32 %v1689_v19, %v1683_v25  ;;  %v1684_v21 = vmul.f32 %v1663_v7, %v7731_v23 }
 0x769   : > { %v1695_v32 = vadd.f32 %v1692_v27, %v1686_v59  ;;  %v1693_v1 = vadd.f32 %v1690_v14, %v1684_v21 }
 0x76b   : > { %v2072_v43 = vpack.c.bf16 %v1694_v13, %v1693_v1  ;;  %v6439_v34 = vpop.f32.mrb[36].mxu1 }
 0x76c   : > { %v2004_v5 = vpop.f32.mrb[37].mxu1  ;;  %v2053_v33 = vmul.f32 %v6439_v34, %v7701_v58 }
 0x76d   : > { %v2051_v37 = vmul.f32 %v2004_v5, %v7701_v58  ;;  %v6440_v35 = vpop.f32.mrb[38].mxu1  ;;  %6466 = vmatmul.mubr.bf16.vlgmr.msra.gmra.mrb[36].mxu0 %v2072_v43 }
 0x76e   : > { %v2054_v4 = vmul.f32 %v6440_v35, %v7728_v8  ;;  %v2007_v9 = vpop.f32.mrb[39].mxu1  ;;  %6469 = vmatprep.mubr.msk.bf16.mxu0 %vm7331_vm0, %v9586_v3 }
 0x76f   : > { %v2052_v38 = vmul.f32 %v2007_v9, %v7701_v58 }
 0x770   : > { %v2063_v17 = vadd.f32 %v2054_v4, %v2051_v37 }
 0x773   : > { %v6443_v50 = vpop.f32.mrb[40].mxu1 }
 0x774   : > { %v2057_v51 = vmul.f32 %v6443_v50, %v7707_v63  ;;  %v2020_v10 = vpop.f32.mrb[41].mxu1 }
 0x775   : > { %v2055_v24 = vmul.f32 %v2020_v10, %v7728_v8  ;;  %v6444_v46 = vpop.f32.mrb[42].mxu1 }
 0x776   : > { %v2066_v55 = vadd.f32 %v2063_v17, %v2057_v51  ;;  %v2058_v39 = vmul.f32 %v6444_v46, %v7707_v63  ;;  %v2023_v31 = vpop.f32.mrb[43].mxu1  ;;  %v6684_v46 = vld [vmem:[%s9576_s13 + $0x2c] ss:$16 sps:$4 sm:$0xff]  }
 0x777   : > { %v2064_v16 = vadd.f32 %v2055_v24, %v2052_v38  ;;  %v2056_v41 = vmul.f32 %v2023_v31, %v7728_v8  ;;  %v6675_v38 = vld [vmem:[%s9576_s13 + $0x4] ss:$16 sps:$4 sm:$0xff]  }
 0x778   : > { %v6681_v24 = vld [vmem:[%s9576_s13 + $0x24] ss:$16 sps:$4 sm:$0xff]   ;;  %2518 = vmatprep.subr.bf16.mxu1 %v6675_v38 }
 0x779   : > { %v2067_v6 = vadd.f32 %v2064_v16, %v2058_v39  ;;  %v2065_v42 = vadd.f32 %v2056_v41, %v2053_v33  ;;  %v6682_v39 = vld [vmem:[%s9576_s13 + $0x28] ss:$16 sps:$4 sm:$0xff]   ;;  %v6711_v38 = vld [vmem:[%s9576_s13 + $0xc4] ss:$16 sps:$4 sm:$0xff]  }
 0x77b   : > { %v6447_v40 = vpop.f32.mrb[44].mxu1 }
 0x77c   : > { %v2061_v28 = vmul.f32 %v6447_v40, %v7731_v23  ;;  %v2036_v36 = vpop.f32.mrb[45].mxu1 }
 0x77d   : > { %v2059_v56 = vmul.f32 %v2036_v36, %v7707_v63  ;;  %v6448_v20 = vpop.f32.mrb[46].mxu1  ;;  %v6687_v36 = vld [vmem:[%s9576_s13 + $0x44] ss:$16 sps:$4 sm:$0xff]  }
 0x77e   : > { %v2070_v14 = vadd.f32 %v2067_v6, %v2061_v28  ;;  %v2062_v2 = vmul.f32 %v6448_v20, %v7731_v23  ;;  %v2039_v15 = vpop.f32.mrb[47].mxu1 }
 0x77f   : > { %v2068_v54 = vadd.f32 %v2065_v42, %v2059_v56  ;;  %v2060_v60 = vmul.f32 %v2039_v15, %v7731_v23  ;;  %v6690_v56 = vld [vmem:[%s9576_s13 + $0x4c] ss:$16 sps:$4 sm:$0xff]  }
 0x781   : > { %v2071_v11 = vadd.f32 %v2068_v54, %v2062_v2  ;;  %v2069_v12 = vadd.f32 %v2066_v55, %v2060_v60  ;;  %v6679_v55 = vld [vmem:[%s9576_s13 + $0x20] ss:$16 sps:$4 sm:$0xff]   ;;  %v6688_v2 = vld [vmem:[%s9576_s13 + $0x48] ss:$16 sps:$4 sm:$0xff]  }
 0x783   : > { %v2073_v19 = vpack.c.bf16 %v2069_v12, %v1695_v32  ;;  %v2074_v29 = vpack.c.bf16 %v2071_v11, %v2070_v14  ;;  %v6685_v14 = vld [vmem:[%s9576_s13 + $0x40] ss:$16 sps:$4 sm:$0xff]   ;;  %v6693_v12 = vld [vmem:[%s9576_s13 + $0x64] ss:$16 sps:$4 sm:$0xff]  }
 0x785   : > { %6470 = vmatmul.mubr.bf16.gmra.mrb[40].mxu0 %v2073_v19  ;;  %v6696_v19 = vld [vmem:[%s9576_s13 + $0x6c] ss:$16 sps:$4 sm:$0xff]  }
 0x786   : > { %6473 = vmatprep.mubr.msk.bf16.mxu0 %vm7331_vm0, %v9586_v3 }
 0x78d   : > { %6474 = vmatmul.mubr.bf16.gmra.mrb[44].mxu0 %v2074_v29  ;;  %v6691_v29 = vld [vmem:[%s9576_s13 + $0x60] ss:$16 sps:$4 sm:$0xff]  }
 0x78e   : > { %2613 = vmatprep.mubr.bf16.mxu0 %v7330_v52 }
 0x840   : > { %v2180_v18 = vpop.f32.mrb[36].mxu0 }
 0x841   : > { %v2181_v25 = vadd.f32 %v5686_v61, %v2180_v18  ;;  %v6467_v22 = vpop.f32.mrb[37].mxu0 }
 0x842   : > { %v2183_v13 = vpop.f32.mrb[38].mxu0 }
 0x843   : > { %v8160_v59 = vadd.f32 %v2181_v25, %v7523_v44  ;;  %v2184_v7 = vadd.f32 %v5686_v61, %v2183_v13  ;;  %v6468_v27 = vpop.f32.mrb[39].mxu0  ;;  %v6699_v13 = vld [vmem:[%s9576_s13 + $0x84] ss:$16 sps:$4 sm:$0xff]  }
 0x845   : > { %v8163_v21 = vadd.f32 %v2184_v7, %v7526_v49  ;;  %2211 = vadd.xlane.f32.xlu0 %v8160_v59  ;;  %v6702_v7 = vld [vmem:[%s9576_s13 + $0x8c] ss:$16 sps:$4 sm:$0xff]  }
 0x847   : > { %2213 = vadd.xlane.f32.xlu1 %v8163_v21 }
 0x858   : > { %v2188_v32 = vpop.f32.mrb[40].mxu0 }
 0x859   : > { %v2189_v1 = vadd.f32 %v5686_v61, %v2188_v32  ;;  %v6471_v43 = vpop.f32.mrb[41].mxu0  ;;  %v6697_v32 = vld [vmem:[%s9576_s13 + $0x80] ss:$16 sps:$4 sm:$0xff]  }
 0x85a   : > { %v2191_v34 = vpop.f32.mrb[42].mxu0 }
 0x85b   : > { %v8168_v5 = vadd.f32 %v2189_v1, %v7529_v53  ;;  %v2192_v37 = vadd.f32 %v5686_v61, %v2191_v34  ;;  %v6472_v35 = vpop.f32.mrb[43].mxu0  ;;  %v6700_v1 = vld [vmem:[%s9576_s13 + $0x88] ss:$16 sps:$4 sm:$0xff]  }
 0x85d   : > { %v8171_v44 = vadd.f32 %v2192_v37, %v7532_v57  ;;  %2215 = vadd.xlane.f32.xlu0 %v8168_v5  ;;  %v6673_v57 = vld [vmem:[%s9576_s13] ss:$16 sps:$4 sm:$0xff]  }
 0x85e   : > { %2519 = vmatpush1.bf16.msra.mxu1 %v6673_v57 }
 0x85f   : > { %2217 = vadd.xlane.f32.xlu1 %v8171_v44  ;;  %2520 = vmatprep.subr.bf16.mxu1 %v6681_v24  ;;  %v6712_v24 = vld [vmem:[%s9576_s13 + $0xc8] ss:$16 sps:$4 sm:$0xff]  }
 0x860   : > { %v2196_v49 = vpop.f32.mrb[44].mxu0 }
 0x861   : > { %v2197_v4 = vadd.f32 %v5686_v61, %v2196_v49  ;;  %v6475_v9 = vpop.f32.mrb[45].mxu0  ;;  %v6705_v49 = vld [vmem:[%s9576_s13 + $0xa4] ss:$16 sps:$4 sm:$0xff]  }
 0x862   : > { %v2199_v17 = vpop.f32.mrb[46].mxu0  ;;  %2521 = vmatpush1.bf16.msra.mxu1 %v6679_v55  ;;  %v6703_v9 = vld [vmem:[%s9576_s13 + $0xa0] ss:$16 sps:$4 sm:$0xff]   ;;  %v6720_v55 = vld [vmem:[%s9576_s13 + $0xec] ss:$16 sps:$4 sm:$0xff]  }
 0x863   : > { %v8176_v50 = vadd.f32 %v2197_v4, %v7535_v62  ;;  %v2200_v51 = vadd.f32 %v5686_v61, %v2199_v17  ;;  %v6476_v10 = vpop.f32.mrb[47].mxu0  ;;  %v6676_v62 = vld [vmem:[%s9576_s13 + $0x8] ss:$16 sps:$4 sm:$0xff]   ;;  %2522 = vmatprep.subr.bf16.mxu1 %v6687_v36  ;;  %v6708_v4 = vld [vmem:[%s9576_s13 + $0xac] ss:$16 sps:$4 sm:$0xff]  }
 0x864   : > { %v6694_v61 = vld [vmem:[%s9576_s13 + $0x68] ss:$16 sps:$4 sm:$0xff]  }
 0x865   : > { %v8179_v53 = vadd.f32 %v2200_v51, %v7538_v0  ;;  %2219 = vadd.xlane.f32.xlu0 %v8176_v50  ;;  %v6678_v0 = vld [vmem:[%s9576_s13 + $0xc] ss:$16 sps:$4 sm:$0xff]   ;;  %v6706_v17 = vld [vmem:[%s9576_s13 + $0xa8] ss:$16 sps:$4 sm:$0xff]  }
 0x866   : > { %2581 = vmatprep.subr.bf16.mxu0 %v6678_v0  ;;  %2523 = vmatpush1.bf16.msra.mxu1 %v6685_v14  ;;  %v6709_v0 = vld [vmem:[%s9576_s13 + $0xc0] ss:$16 sps:$4 sm:$0xff]  }
 0x867   : > { %2221 = vadd.xlane.f32.xlu1 %v8179_v53  ;;  %2582 = vmatpush1.bf16.msra.mxu0 %v6676_v62  ;;  %v6714_v62 = vld [vmem:[%s9576_s13 + $0xcc] ss:$16 sps:$4 sm:$0xff]  }
 0x868   : > { %2583 = vmatprep.subr.bf16.mxu0 %v6684_v46  ;;  %2524 = vmatprep.subr.bf16.mxu1 %v6693_v12  ;;  %v6717_v46 = vld [vmem:[%s9576_s13 + $0xe4] ss:$16 sps:$4 sm:$0xff]  }
 0x86a   : > { %2525 = vmatpush1.bf16.msra.mxu1 %v6691_v29 }
 0x86b   : > { %2584 = vmatpush1.bf16.msra.mxu0 %v6682_v39  ;;  %2526 = vmatprep.subr.bf16.mxu1 %v6699_v13  ;;  %v6715_v39 = vld [vmem:[%s9576_s13 + $0xe0] ss:$16 sps:$4 sm:$0xff]  }
 0x86c   : > { %2585 = vmatprep.subr.bf16.mxu0 %v6690_v56 }
 0x86e   : > { %2527 = vmatpush1.bf16.msra.mxu1 %v6697_v32 }
 0x86f   : > { %2586 = vmatpush1.bf16.msra.mxu0 %v6688_v2  ;;  %2528 = vmatprep.subr.bf16.mxu1 %v6705_v49 }
 0x870   : > { %2587 = vmatprep.subr.bf16.mxu0 %v6696_v19 }
 0x872   : > { %2529 = vmatpush1.bf16.msra.mxu1 %v6703_v9 }
 0x873   : > { %2588 = vmatpush1.bf16.msra.mxu0 %v6694_v61  ;;  %2530 = vmatprep.subr.bf16.mxu1 %v6711_v38 }
 0x874   : > { %2589 = vmatprep.subr.bf16.mxu0 %v6702_v7 }
 0x876   : > { %2531 = vmatpush1.bf16.msra.mxu1 %v6709_v0 }
 0x877   : > { %2590 = vmatpush1.bf16.msra.mxu0 %v6700_v1  ;;  %2532 = vmatprep.subr.bf16.mxu1 %v6717_v46 }
 0x878   : > { %2591 = vmatprep.subr.bf16.mxu0 %v6708_v4 }
 0x87a   : > { %2533 = vmatpush1.bf16.msra.mxu1 %v6715_v39 }
 0x87b   : > { %2592 = vmatpush1.bf16.msra.mxu0 %v6706_v17 }
 0x87c   : > { %2593 = vmatprep.subr.bf16.mxu0 %v6714_v62 }
 0x87f   : > { %2594 = vmatpush1.bf16.msra.mxu0 %v6712_v24 }
 0x880   : > { %2595 = vmatprep.subr.bf16.mxu0 %v6720_v55 }
 0x8d2   : > { %v2212_v31 = vpop.xlane.xlu0 %2211 }
 0x8d3   : > { %v2223_v33 = vmul.f32 0.0078125, %v2212_v31  ;;  %v6718_v31 = vld [vmem:[%s9576_s13 + $0xe8] ss:$16 sps:$4 sm:$0xff]  }
 0x8d4   : > { %v2214_v16 = vpop.xlane.xlu1 %2213  ;;  %2596 = vmatpush1.bf16.msra.mxu0 %v6718_v31 }
 0x8d5   : > { %v8208_v41 = vsub.f32 %v8160_v59, %v2223_v33  ;;  %v2224_v6 = vmul.f32 0.0078125, %v2214_v16 }
 0x8d7   : > { %v8211_v42 = vsub.f32 %v8163_v21, %v2224_v6  ;;  %v2235_v40 = vmul.f32 %v8208_v41, %v8208_v41 }
 0x8d9   : > { %2241 = vadd.xlane.f32.xlu0 %v2235_v40  ;;  %v2236_v28 = vmul.f32 %v8211_v42, %v8211_v42 }
 0x8db   : > { %2243 = vadd.xlane.f32.xlu1 %v2236_v28 }
 0x8ea   : > { %v2216_v20 = vpop.xlane.xlu0 %2215 }
 0x8eb   : > { %v2225_v15 = vmul.f32 0.0078125, %v2216_v20  ;;  %v5695_v20 = vld [vmem:[%s9574_s11] ss:$0 sm:$0xff] }
 0x8ec   : > { %v2218_v54 = vpop.xlane.xlu1 %2217 }
 0x8ed   : > { %v8230_v60 = vsub.f32 %v8168_v5, %v2225_v15  ;;  %v2226_v11 = vmul.f32 0.0078125, %v2218_v54 }
 0x8ef   : > { %v8245_v18 = vsub.f32 %v8171_v44, %v2226_v11  ;;  %v2237_v25 = vmul.f32 %v8230_v60, %v8230_v60  ;;  %v5696_v11 = vld [vmem:[%s9575_s12] ss:$0 sm:$0xff] }
 0x8f1   : > { %2245 = vadd.xlane.f32.xlu0 %v2237_v25  ;;  %v2238_v22 = vmul.f32 %v8245_v18, %v8245_v18 }
 0x8f2   : > { %v2220_v27 = vpop.xlane.xlu0 %2219 }
 0x8f3   : > { %v2227_v43 = vmul.f32 0.0078125, %v2220_v27  ;;  %2247 = vadd.xlane.f32.xlu1 %v2238_v22 }
 0x8f4   : > { %v2222_v34 = vpop.xlane.xlu1 %2221 }
 0x8f5   : > { %v8264_v37 = vsub.f32 %v8176_v50, %v2227_v43  ;;  %v2228_v35 = vmul.f32 0.0078125, %v2222_v34 }
 0x8f7   : > { %v8279_v51 = vsub.f32 %v8179_v53, %v2228_v35  ;;  %v2239_v10 = vmul.f32 %v8264_v37, %v8264_v37 }
 0x8f9   : > { %2249 = vadd.xlane.f32.xlu0 %v2239_v10  ;;  %v2240_v57 = vmul.f32 %v8279_v51, %v8279_v51 }
 0x8fb   : > { %2251 = vadd.xlane.f32.xlu1 %v2240_v57 }
 0x966   : > { %v2242_v33 = vpop.xlane.xlu0 %2241 }
 0x967   : > { %v2253_v16 = vmul.f32 0.0078125, %v2242_v33 }
 0x968   : > { %v2244_v6 = vpop.xlane.xlu1 %2243 }
 0x969   : > { %v2259_v40 = vadd.f32 1e-05, %v2253_v16  ;;  %v2254_v28 = vmul.f32 0.0078125, %v2244_v6  ;;  %v6722_v6 = vld [vmem:[%s9578_s15 + $0xc0] sm:$0xff]  }
 0x96a   : > { %6201 = vmatprep.subr.bf16.mxu0 %v6722_v6 }
 0x96b   : > { %6993 = vrsqrt.f32 %v2259_v40  ;;  %v2260_v36 = vadd.f32 1e-05, %v2254_v28  ;;  %v6724_v40 = vld [vmem:[%s9578_s15 + $0x80] sm:$0xff]   ;;  %v6725_v28 = vld [vmem:[%s9578_s15 + $0x48] sm:$0xff]  }
 0x96d   : > { %6995 = vrsqrt.f32 %v2260_v36  ;;  %v6726_v36 = vld [vmem:[%s9578_s15 + $0xc8] sm:$0xff]  }
 0x975   : > { %v6994_v56 = vpop.eup %6993 }
 0x976   : > { %v2271_v14 = vmul.f32 %v6994_v56, %v8208_v41  ;;  %v6727_v56 = vld [vmem:[%s9578_s15 + $0x8] sm:$0xff]  }
 0x977   : > { %v6996_v2 = vpop.eup %6995 }
 0x978   : > { %v2283_v15 = vmul.f32 %v5695_v20, %v2271_v14  ;;  %v2272_v54 = vmul.f32 %v6996_v2, %v8211_v42  ;;  %v6729_v14 = vld [vmem:[%s9578_s15 + $0x50] sm:$0xff]  }
 0x979   : > { %v6730_v2 = vld [vmem:[%s9578_s15 + $0xd0] sm:$0xff]  }
 0x97a   : > { %v2284_v12 = vmul.f32 %v5695_v20, %v2272_v54  ;;  %v2295_v19 = vadd.f32 %v5696_v11, %v2283_v15  ;;  %v6731_v15 = vld [vmem:[%s9578_s15 + $0x10] sm:$0xff]  }
 0x97b   : > { %v6732_v54 = vld [vmem:[%s9578_s15 + $0x90] sm:$0xff]  }
 0x97c   : > { %v2296_v29 = vadd.f32 %v5696_v11, %v2284_v12  ;;  %v6734_v12 = vld [vmem:[%s9578_s15 + $0xd8] sm:$0xff]  }
 0x97e   : > { %v2246_v61 = vpop.xlane.xlu0 %2245  ;;  %v2301_v25 = vpack.c.bf16 %v2296_v29, %v2295_v19  ;;  %v6735_v19 = vld [vmem:[%s9578_s15 + $0x18] sm:$0xff]  }
 0x97f   : > { %v2255_v22 = vmul.f32 0.0078125, %v2246_v61  ;;  %v6736_v29 = vld [vmem:[%s9578_s15 + $0x98] sm:$0xff]   ;;  %v6737_v61 = vld [vmem:[%s9578_s15 + $0x60] sm:$0xff]  }
 0x980   : > { %2551 = vmatmul.mubr.bf16.vlgmr.msra.gmra.mrb[48].mxu1 %v2301_v25  ;;  %2614 = vmatmul.mubr.bf16.vlgmr.msra.gmra.mrb[48].mxu0 %v2301_v25  ;;  %v2248_v13 = vpop.xlane.xlu1 %2247  ;;  %v6738_v25 = vld [vmem:[%s9578_s15 + $0xe0] sm:$0xff]  }
 0x981   : > { %v2261_v7 = vadd.f32 1e-05, %v2255_v22  ;;  %v2256_v27 = vmul.f32 0.0078125, %v2248_v13  ;;  %2560 = vmatprep.mubr.bf16.mxu1 %v7330_v52  ;;  %2623 = vmatprep.mubr.bf16.mxu0 %v7330_v52  ;;  %v6739_v22 = vld [vmem:[%s9578_s15 + $0x20] sm:$0xff]  }
 0x982   : > { %6202 = vmatpush3.bf16.msra.mxu0 %v6724_v40  ;;  %v6740_v13 = vld [vmem:[%s9578_s15 + $0xa0] sm:$0xff]  }
 0x983   : > { %6997 = vrsqrt.f32 %v2261_v7  ;;  %v2262_v41 = vadd.f32 1e-05, %v2256_v27  ;;  %6203 = vmatprep.subr.bf16.mxu0 %v6726_v36  ;;  %v6741_v7 = vld [vmem:[%s9578_s15 + $0x68] sm:$0xff]  }
 0x984   : > { %v6742_v27 = vld [vmem:[%s9578_s15 + $0xe8] sm:$0xff]  }
 0x985   : > { %6999 = vrsqrt.f32 %v2262_v41  ;;  %v6743_v41 = vld [vmem:[%s9578_s15 + $0x28] sm:$0xff]  }
 0x986   : > { %v2250_v42 = vpop.xlane.xlu0 %2249 }
 0x987   : > { %v2257_v32 = vmul.f32 0.0078125, %v2250_v42  ;;  %v6744_v42 = vld [vmem:[%s9578_s15 + $0xa8] sm:$0xff]  }
 0x988   : > { %v2252_v1 = vpop.xlane.xlu1 %2251 }
 0x989   : > { %v2263_v43 = vadd.f32 1e-05, %v2257_v32  ;;  %v2258_v34 = vmul.f32 0.0078125, %v2252_v1  ;;  %v6745_v32 = vld [vmem:[%s9578_s15 + $0x70] sm:$0xff]  }
 0x98a   : > { %v6746_v1 = vld [vmem:[%s9578_s15 + $0xf0] sm:$0xff]  }
 0x98b   : > { %7001 = vrsqrt.f32 %v2263_v43  ;;  %v2264_v35 = vadd.f32 1e-05, %v2258_v34  ;;  %v6747_v43 = vld [vmem:[%s9578_s15 + $0x30] sm:$0xff]  }
 0x98c   : > { %v6748_v34 = vld [vmem:[%s9578_s15 + $0xb0] sm:$0xff]  }
 0x98d   : > { %v6998_v49 = vpop.eup %6997  ;;  %7003 = vrsqrt.f32 %v2264_v35  ;;  %v6749_v35 = vld [vmem:[%s9578_s15 + $0x78] sm:$0xff]  }
 0x98e   : > { %v2273_v4 = vmul.f32 %v6998_v49, %v8230_v60  ;;  %v6750_v49 = vld [vmem:[%s9578_s15 + $0xf8] sm:$0xff]  }
 0x98f   : > { %v7000_v9 = vpop.eup %6999 }
 0x990   : > { %v2274_v17 = vmul.f32 %v7000_v9, %v8245_v18  ;;  %v2285_v10 = vmul.f32 %v5695_v20, %v2273_v4  ;;  %v6751_v4 = vld [vmem:[%s9578_s15 + $0x38] sm:$0xff]  }
 0x991   : > { %v6752_v9 = vld [vmem:[%s9578_s15 + $0xb8] sm:$0xff]  }
 0x992   : > { %v2286_v57 = vmul.f32 %v5695_v20, %v2274_v17  ;;  %v2297_v38 = vadd.f32 %v5696_v11, %v2285_v10  ;;  %v2336_v17 = vld [vmem:[%s9577_s14] sm:$0xf]  ;;  %v9585_v10 = vsub.s32 3, %v7672_v26 }
 0x994   : > { %v2298_v62 = vadd.f32 %v5696_v11, %v2286_v57  ;;  %v8427_v57 = vrot.slane %v2336_v17, %v7677_v30 }
 0x995   : > { %v7002_v0 = vpop.eup %7001 }
 0x996   : > { %v2302_v24 = vpack.c.bf16 %v2298_v62, %v2297_v38  ;;  %v2275_v46 = vmul.f32 %v7002_v0, %v8264_v37  ;;  %v6721_v37 = vld [vmem:[%s9578_s15 + $0x40] sm:$0xff]   ;;  %v8430_v38 = vrot.slane %v2336_v17, %v7683_v47  ;;  %v8433_v62 = vrot.slane %v2336_v17, %v7688_v48 }
 0x997   : > { %v7004_v55 = vpop.eup %7003  ;;  %6167 = vmatprep.subr.bf16.mxu1 %v6721_v37  ;;  %v8437_v0 = vrot.slane %v2336_v17, %v9585_v10 }
 0x998   : > { %2561 = vmatmul.mubr.bf16.gmra.mrb[52].mxu1 %v2302_v24  ;;  %2624 = vmatmul.mubr.bf16.gmra.mrb[52].mxu0 %v2302_v24  ;;  %v2276_v39 = vmul.f32 %v7004_v55, %v8279_v51  ;;  %v2287_v31 = vmul.f32 %v5695_v20, %v2275_v46  ;;  %v6723_v51 = vld [vmem:[%s9578_s15] sm:$0xff]  }
 0x999   : > { %2570 = vmatprep.mubr.bf16.mxu1 %v7330_v52  ;;  %2633 = vmatprep.mubr.bf16.mxu0 %v7330_v52 }
 0x99a   : > { %v2288_v60 = vmul.f32 %v5695_v20, %v2276_v39  ;;  %v2299_v18 = vadd.f32 %v5696_v11, %v2287_v31  ;;  %6168 = vmatpush3.bf16.msra.mxu1 %v6723_v51  ;;  %v6728_v20 = vld [vmem:[%s9578_s15 + $0x88] sm:$0xff]  }
 0x99b   : > { %6169 = vmatprep.subr.bf16.mxu1 %v6725_v28  ;;  %6204 = vmatpush3.bf16.msra.mxu0 %v6728_v20 }
 0x99c   : > { %v2300_v33 = vadd.f32 %v5696_v11, %v2288_v60  ;;  %6205 = vmatprep.subr.bf16.mxu0 %v6730_v2  ;;  %v6733_v11 = vld [vmem:[%s9578_s15 + $0x58] sm:$0xff]  }
 0x99e   : > { %v2303_v16 = vpack.c.bf16 %v2300_v33, %v2299_v18  ;;  %6170 = vmatpush3.bf16.msra.mxu1 %v6727_v56 }
 0x99f   : > { %6171 = vmatprep.subr.bf16.mxu1 %v6729_v14  ;;  %6206 = vmatpush3.bf16.msra.mxu0 %v6732_v54 }
 0x9a0   : > { %2571 = vmatmul.mubr.bf16.gmra.mrb[56].mxu1 %v2303_v16  ;;  %2634 = vmatmul.mubr.bf16.gmra.mrb[56].mxu0 %v2303_v16 }
 0x9a1   : > { %6207 = vmatprep.subr.bf16.mxu0 %v6734_v12 }
 0x9a2   : > { %6172 = vmatpush3.bf16.msra.mxu1 %v6731_v15 }
 0x9a3   : > { %6173 = vmatprep.subr.bf16.mxu1 %v6733_v11  ;;  %6208 = vmatpush3.bf16.msra.mxu0 %v6736_v29 }
 0x9a4   : > { %6209 = vmatprep.subr.bf16.mxu0 %v6738_v25 }
 0x9a6   : > { %6174 = vmatpush3.bf16.msra.mxu1 %v6735_v19 }
 0x9a7   : > { %6175 = vmatprep.subr.bf16.mxu1 %v6737_v61  ;;  %6210 = vmatpush3.bf16.msra.mxu0 %v6740_v13 }
 0x9a8   : > { %6211 = vmatprep.subr.bf16.mxu0 %v6742_v27 }
 0x9aa   : > { %6176 = vmatpush3.bf16.msra.mxu1 %v6739_v22 }
 0x9ab   : > { %6177 = vmatprep.subr.bf16.mxu1 %v6741_v7  ;;  %6212 = vmatpush3.bf16.msra.mxu0 %v6744_v42 }
 0x9ac   : > { %6213 = vmatprep.subr.bf16.mxu0 %v6746_v1 }
 0x9ae   : > { %6178 = vmatpush3.bf16.msra.mxu1 %v6743_v41 }
 0x9af   : > { %6179 = vmatprep.subr.bf16.mxu1 %v6745_v32  ;;  %6214 = vmatpush3.bf16.msra.mxu0 %v6748_v34 }
 0x9b0   : > { %6215 = vmatprep.subr.bf16.mxu0 %v6750_v49 }
 0x9b2   : > { %6180 = vmatpush3.bf16.msra.mxu1 %v6747_v43 }
 0x9b3   : > { %6181 = vmatprep.subr.bf16.mxu1 %v6749_v35  ;;  %6216 = vmatpush3.bf16.msra.mxu0 %v6752_v9 }
 0x9b4   : > { %6477 = vmatprep.subr.bf16.mxu0 %v9586_v3 }
 0x9b6   : > { %6182 = vmatpush3.bf16.msra.mxu1 %v6751_v4 }
 0xa53   : > { %v2552_v24 = vpop.f32.mrb[48].mxu1  ;;  %v2615_v46 = vpop.f32.mrb[48].mxu0 }
 0xa54   : > { %v8440_v55 = vadd.f32 %v2552_v24, %v8427_v57  ;;  %v8443_v39 = vadd.f32 %v2615_v46, %v8430_v38  ;;  %v2554_v31 = vpop.f32.mrb[49].mxu1  ;;  %v2617_v60 = vpop.f32.mrb[49].mxu0 }
 0xa55   : > { %v8446_v18 = vadd.f32 %v2554_v31, %v8433_v62  ;;  %v8449_v33 = vadd.f32 %v2617_v60, %v8437_v0  ;;  %v2556_v16 = vpop.f32.mrb[50].mxu1  ;;  %v2619_v37 = vpop.f32.mrb[50].mxu0 }
 0xa56   : > { %v5729_v6 = vmul.f32 -1.702, %v8440_v55  ;;  %v5731_v51 = vmul.f32 -1.702, %v8443_v39  ;;  %v8454_v40 = vadd.f32 %v2556_v16, %v8427_v57  ;;  %v8457_v28 = vadd.f32 %v2619_v37, %v8430_v38  ;;  %v2558_v36 = vpop.f32.mrb[51].mxu1  ;;  %v2621_v56 = vpop.f32.mrb[51].mxu0 }
 0xa57   : > { %v5730_v20 = vmul.f32 -1.702, %v8446_v18  ;;  %v5732_v14 = vmul.f32 -1.702, %v8449_v33  ;;  %v8462_v2 = vadd.f32 %v2558_v36, %v8433_v62  ;;  %v8465_v15 = vadd.f32 %v2621_v56, %v8437_v0 }
 0xa58   : > { %v2692_v54 = vmul.f32 1.442695, %v5729_v6  ;;  %v2696_v11 = vmul.f32 1.442695, %v5731_v51  ;;  %v5733_v12 = vmul.f32 -1.702, %v8454_v40 }
 0xa59   : > { %v2694_v19 = vmul.f32 1.442695, %v5730_v20  ;;  %v2698_v29 = vmul.f32 1.442695, %v5732_v14  ;;  %v5735_v61 = vmul.f32 -1.702, %v8457_v28 }
 0xa5a   : > { %7005 = vpow2.f32 %v2692_v54  ;;  %v2700_v25 = vmul.f32 1.442695, %v5733_v12  ;;  %v5734_v22 = vmul.f32 -1.702, %v8462_v2  ;;  %v5736_v13 = vmul.f32 -1.702, %v8465_v15 }
 0xa5b   : > { %7007 = vpow2.f32 %v2696_v11  ;;  %v2704_v7 = vmul.f32 1.442695, %v5735_v61 }
 0xa5c   : > { %7009 = vpow2.f32 %v2694_v19  ;;  %v2702_v27 = vmul.f32 1.442695, %v5734_v22  ;;  %v2706_v41 = vmul.f32 1.442695, %v5736_v13 }
 0xa5d   : > { %7011 = vpow2.f32 %v2698_v29 }
 0xa5e   : > { %7013 = vpow2.f32 %v2700_v25 }
 0xa5f   : > { %7015 = vpow2.f32 %v2704_v7 }
 0xa60   : > { %7017 = vpow2.f32 %v2702_v27 }
 0xa61   : > { %7019 = vpow2.f32 %v2706_v41 }
 0xa64   : > { %v7006_v42 = vpop.eup %7005 }
 0xa65   : > { %v7008_v32 = vpop.eup %7007  ;;  %v2740_v1 = vadd.f32 1.0, %v7006_v42 }
 0xa66   : > { %v7010_v43 = vpop.eup %7009  ;;  %v2742_v34 = vadd.f32 1.0, %v7008_v32 }
 0xa67   : > { %v7012_v35 = vpop.eup %7011  ;;  %7021 = vrcp.f32 %v2740_v1  ;;  %v2741_v49 = vadd.f32 1.0, %v7010_v43 }
 0xa68   : > { %v7014_v4 = vpop.eup %7013  ;;  %7023 = vrcp.f32 %v2742_v34  ;;  %v2743_v9 = vadd.f32 1.0, %v7012_v35 }
 0xa69   : > { %v7016_v17 = vpop.eup %7015  ;;  %7025 = vrcp.f32 %v2741_v49  ;;  %v2744_v24 = vadd.f32 1.0, %v7014_v4 }
 0xa6a   : > { %v7018_v46 = vpop.eup %7017  ;;  %7027 = vrcp.f32 %v2743_v9  ;;  %v2746_v31 = vadd.f32 1.0, %v7016_v17 }
 0xa6b   : > { %v7020_v60 = vpop.eup %7019  ;;  %7029 = vrcp.f32 %v2744_v24  ;;  %v2745_v16 = vadd.f32 1.0, %v7018_v46  ;;  %v2562_v37 = vpop.f32.mrb[52].mxu1 }
 0xa6c   : > { %v2625_v6 = vpop.f32.mrb[52].mxu0  ;;  %7031 = vrcp.f32 %v2746_v31  ;;  %v2747_v51 = vadd.f32 1.0, %v7020_v60  ;;  %v8472_v36 = vadd.f32 %v2562_v37, %v8427_v57  ;;  %v2564_v20 = vpop.f32.mrb[53].mxu1 }
 0xa6d   : > { %v8475_v56 = vadd.f32 %v2625_v6, %v8430_v38  ;;  %v2627_v14 = vpop.f32.mrb[53].mxu0  ;;  %7033 = vrcp.f32 %v2745_v16  ;;  %v8478_v54 = vadd.f32 %v2564_v20, %v8433_v62  ;;  %v2566_v12 = vpop.f32.mrb[54].mxu1 }
 0xa6e   : > { %v8481_v11 = vadd.f32 %v2627_v14, %v8437_v0  ;;  %v2629_v19 = vpop.f32.mrb[54].mxu0  ;;  %7035 = vrcp.f32 %v2747_v51  ;;  %v5737_v29 = vmul.f32 -1.702, %v8472_v36  ;;  %v8486_v25 = vadd.f32 %v2566_v12, %v8427_v57  ;;  %v2568_v22 = vpop.f32.mrb[55].mxu1 }
 0xa6f   : > { %v5739_v61 = vmul.f32 -1.702, %v8475_v56  ;;  %v2631_v13 = vpop.f32.mrb[55].mxu0  ;;  %v5738_v7 = vmul.f32 -1.702, %v8478_v54  ;;  %v8491_v41 = vadd.f32 %v2629_v19, %v8430_v38  ;;  %v8494_v42 = vadd.f32 %v2568_v22, %v8433_v62 }
 0xa70   : > { %v5740_v27 = vmul.f32 -1.702, %v8481_v11  ;;  %v2708_v32 = vmul.f32 1.442695, %v5737_v29  ;;  %v5741_v43 = vmul.f32 -1.702, %v8486_v25  ;;  %v8498_v34 = vadd.f32 %v2631_v13, %v8437_v0 }
 0xa71   : > { %v2712_v1 = vmul.f32 1.442695, %v5739_v61  ;;  %v7022_v35 = vpop.eup %7021  ;;  %v2710_v49 = vmul.f32 1.442695, %v5738_v7  ;;  %v5743_v9 = vmul.f32 -1.702, %v8491_v41 }
 0xa72   : > { %v2714_v4 = vmul.f32 1.442695, %v5740_v27  ;;  %v7024_v17 = vpop.eup %7023  ;;  %7037 = vpow2.f32 %v2708_v32  ;;  %v2716_v24 = vmul.f32 1.442695, %v5741_v43  ;;  %v5742_v46 = vmul.f32 -1.702, %v8494_v42 }
 0xa73   : > { %v7026_v31 = vpop.eup %7025  ;;  %7039 = vpow2.f32 %v2712_v1  ;;  %v2720_v60 = vmul.f32 1.442695, %v5743_v9  ;;  %v5744_v16 = vmul.f32 -1.702, %v8498_v34  ;;  %v2572_v37 = vpop.f32.mrb[56].mxu1  ;;  %v2812_v61 = vmul.f32 %v7022_v35, %v8440_v55 }
 0xa74   : > { %v2635_v6 = vpop.f32.mrb[56].mxu0  ;;  %v7028_v51 = vpop.eup %7027  ;;  %7041 = vpow2.f32 %v2710_v49  ;;  %v2718_v20 = vmul.f32 1.442695, %v5742_v46  ;;  %v8504_v14 = vadd.f32 %v2572_v37, %v8427_v57  ;;  %v2814_v55 = vmul.f32 %v7024_v17, %v8443_v39 }
 0xa75   : > { %v2574_v12 = vpop.f32.mrb[57].mxu1  ;;  %v2637_v19 = vpop.f32.mrb[57].mxu0  ;;  %7043 = vpow2.f32 %v2714_v4  ;;  %v2722_v22 = vmul.f32 1.442695, %v5744_v16  ;;  %v8508_v13 = vadd.f32 %v2635_v6, %v8430_v38  ;;  %v2813_v3 = vmul.f32 %v7026_v31, %v8446_v18 }
 0xa76   : > { %v7030_v29 = vpop.eup %7029  ;;  %v2576_v7 = vpop.f32.mrb[58].mxu1  ;;  %7045 = vpow2.f32 %v2716_v24  ;;  %v5745_v43 = vmul.f32 -1.702, %v8504_v14  ;;  %v8513_v49 = vadd.f32 %v2574_v12, %v8433_v62 }
 0xa77   : > { %v2639_v27 = vpop.f32.mrb[58].mxu0  ;;  %v7032_v32 = vpop.eup %7031  ;;  %v2816_v1 = vmul.f32 %v7030_v29, %v8454_v40  ;;  %7047 = vpow2.f32 %v2720_v60  ;;  %v5747_v4 = vmul.f32 -1.702, %v8508_v13  ;;  %v8527_v18 = vadd.f32 %v2576_v7, %v8427_v57 }
 0xa78   : > { %v2578_v9 = vpop.f32.mrb[59].mxu1  ;;  %v2641_v46 = vpop.f32.mrb[59].mxu0  ;;  %v2818_v35 = vmul.f32 %v7032_v32, %v8457_v28  ;;  %7049 = vpow2.f32 %v2718_v20  ;;  %v2724_v24 = vmul.f32 1.442695, %v5745_v43  ;;  %v5746_v39 = vmul.f32 -1.702, %v8513_v49 }
 0xa79   : > { %v7034_v37 = vpop.eup %7033  ;;  %v2836_v6 = vpack.c.bf16 %v2816_v1, %v2812_v61  ;;  %7051 = vpow2.f32 %v2722_v22  ;;  %v2728_v10 = vmul.f32 1.442695, %v5747_v4  ;;  %v2815_v28 = vmul.f32 %v7028_v51, %v8449_v33 }
 0xa7a   : > { %v7036_v16 = vpop.eup %7035  ;;  %v2817_v40 = vmul.f32 %v7034_v37, %v8462_v2  ;;  %v2838_v29 = vpack.c.bf16 %v2818_v35, %v2814_v55  ;;  %7053 = vpow2.f32 %v2724_v24  ;;  %v2726_v60 = vmul.f32 1.442695, %v5746_v39 }
 0xa7b   : > { %v2819_v12 = vmul.f32 %v7036_v16, %v8465_v15  ;;  %7055 = vpow2.f32 %v2728_v10  ;;  %v8524_v2 = vadd.f32 %v2637_v19, %v8437_v0  ;;  %v8530_v10 = vadd.f32 %v2639_v27, %v8430_v38 }
 0xa7c   : > { %v7038_v17 = vpop.eup %7037  ;;  %v2837_v32 = vpack.c.bf16 %v2817_v40, %v2813_v3  ;;  %7057 = vpow2.f32 %v2726_v60  ;;  %v8534_v57 = vadd.f32 %v2578_v9, %v8433_v62  ;;  %v5749_v35 = vmul.f32 -1.702, %v8527_v18 }
 0xa7d   : > { %v7040_v61 = vpop.eup %7039  ;;  %v2748_v1 = vadd.f32 1.0, %v7038_v17  ;;  %v2839_v20 = vpack.c.bf16 %v2819_v12, %v2815_v28  ;;  %v5748_v37 = vmul.f32 -1.702, %v8524_v2  ;;  %v8538_v4 = vadd.f32 %v2641_v46, %v8437_v0 }
 0xa7e   : > { %v7042_v15 = vpop.eup %7041  ;;  %v2750_v22 = vadd.f32 1.0, %v7040_v61  ;;  %3143 = vmatprep.mubr.bf16.mxu1 %v2837_v32  ;;  %v5750_v62 = vmul.f32 -1.702, %v8534_v57  ;;  %v2732_v24 = vmul.f32 1.442695, %v5749_v35 }
 0xa7f   : > { %v7044_v31 = vpop.eup %7043  ;;  %7059 = vrcp.f32 %v2748_v1  ;;  %v2749_v33 = vadd.f32 1.0, %v7042_v15  ;;  %3200 = vmatprep.mubr.bf16.mxu0 %v2839_v20  ;;  %3144 = vmatmul.mubr.bf16.vlgmr.msra.gmra.mrb[60].mxu1 %v2836_v6  ;;  %v5751_v6 = vmul.f32 -1.702, %v8530_v10  ;;  %v2730_v40 = vmul.f32 1.442695, %v5748_v37 }
 0xa80   : > { %v7046_v3 = vpop.eup %7045  ;;  %7061 = vrcp.f32 %v2750_v22  ;;  %v2751_v51 = vadd.f32 1.0, %v7044_v31  ;;  %3201 = vmatmul.mubr.bf16.vlgmr.msra.gmra.mrb[60].mxu0 %v2838_v29  ;;  %v5752_v29 = vmul.f32 -1.702, %v8538_v4  ;;  %v2734_v28 = vmul.f32 1.442695, %v5750_v62 }
 0xa81   : > { %v7048_v19 = vpop.eup %7047  ;;  %7063 = vrcp.f32 %v2749_v33  ;;  %v2752_v43 = vadd.f32 1.0, %v7046_v3  ;;  %v2736_v0 = vmul.f32 1.442695, %v5751_v6 }
 0xa82   : > { %v7050_v7 = vpop.eup %7049  ;;  %7065 = vrcp.f32 %v2751_v51  ;;  %v2754_v55 = vadd.f32 1.0, %v7048_v19  ;;  %v2738_v60 = vmul.f32 1.442695, %v5752_v29 }
 0xa83   : > { %v7052_v16 = vpop.eup %7051  ;;  %7067 = vrcp.f32 %v2752_v43  ;;  %v2753_v38 = vadd.f32 1.0, %v7050_v7 }
 0xa84   : > { %7069 = vrcp.f32 %v2754_v55  ;;  %v2755_v27 = vadd.f32 1.0, %v7052_v16  ;;  %v7054_v9 = vpop.eup %7053 }
 0xa85   : > { %7071 = vrcp.f32 %v2753_v38  ;;  %v7056_v12 = vpop.eup %7055  ;;  %v2756_v37 = vadd.f32 1.0, %v7054_v9 }
 0xa86   : > { %7073 = vrcp.f32 %v2755_v27  ;;  %v7058_v39 = vpop.eup %7057 }
 0xa87   : > { %7075 = vpow2.f32 %v2730_v40 }
 0xa88   : > { %7077 = vpow2.f32 %v2732_v24 }
 0xa89   : > { %v7060_v46 = vpop.eup %7059  ;;  %7079 = vpow2.f32 %v2736_v0 }
 0xa8a   : > { %v7062_v17 = vpop.eup %7061  ;;  %7081 = vpow2.f32 %v2734_v28  ;;  %v2820_v15 = vmul.f32 %v7060_v46, %v8472_v36  ;;  %v2758_v36 = vadd.f32 1.0, %v7056_v12 }
 0xa8b   : > { %v7064_v32 = vpop.eup %7063  ;;  %7083 = vpow2.f32 %v2738_v60  ;;  %v2822_v33 = vmul.f32 %v7062_v17, %v8475_v56 }
 0xa8c   : > { %v7066_v61 = vpop.eup %7065  ;;  %v2821_v19 = vmul.f32 %v7064_v32, %v8478_v54  ;;  %7085 = vrcp.f32 %v2756_v37 }
 0xa8d   : > { %v7068_v1 = vpop.eup %7067  ;;  %v2823_v55 = vmul.f32 %v7066_v61, %v8481_v11  ;;  %7087 = vrcp.f32 %v2758_v36 }
 0xa8e   : > { %v7070_v20 = vpop.eup %7069  ;;  %v2824_v22 = vmul.f32 %v7068_v1, %v8486_v25  ;;  %v2757_v25 = vadd.f32 1.0, %v7058_v39 }
 0xa8f   : > { %v7072_v31 = vpop.eup %7071  ;;  %v2826_v3 = vmul.f32 %v7070_v20, %v8491_v41 }
 0xa90   : > { %v7074_v51 = vpop.eup %7073  ;;  %v2825_v43 = vmul.f32 %v7072_v31, %v8494_v42  ;;  %v2840_v7 = vpack.c.bf16 %v2824_v22, %v2820_v15  ;;  %7089 = vrcp.f32 %v2757_v25 }
 0xa91   : > { %v2827_v35 = vmul.f32 %v7074_v51, %v8498_v34  ;;  %v2842_v16 = vpack.c.bf16 %v2826_v3, %v2822_v33  ;;  %v7076_v27 = vpop.eup %7075 }
 0xa92   : > { %v2841_v38 = vpack.c.bf16 %v2825_v43, %v2821_v19  ;;  %v7078_v56 = vpop.eup %7077  ;;  %v2759_v41 = vadd.f32 1.0, %v7076_v27 }
 0xa93   : > { %v2843_v6 = vpack.c.bf16 %v2827_v35, %v2823_v55  ;;  %v2760_v54 = vadd.f32 1.0, %v7078_v56  ;;  %v7080_v42 = vpop.eup %7079 }
 0xa94   : > { %3151 = vmatprep.mubr.bf16.mxu1 %v2841_v38  ;;  %v7082_v11 = vpop.eup %7081  ;;  %v2762_v34 = vadd.f32 1.0, %v7080_v42 }
 0xa95   : > { %3208 = vmatprep.mubr.bf16.mxu0 %v2843_v6  ;;  %3152 = vmatmul.mubr.bf16.gmra.mrb[64].mxu1 %v2840_v7  ;;  %7091 = vrcp.f32 %v2760_v54  ;;  %v7084_v40 = vpop.eup %7083  ;;  %v2761_v62 = vadd.f32 1.0, %v7082_v11 }
 0xa96   : > { %3209 = vmatmul.mubr.bf16.gmra.mrb[64].mxu0 %v2842_v16  ;;  %7093 = vrcp.f32 %v2759_v41  ;;  %v2763_v9 = vadd.f32 1.0, %v7084_v40  ;;  %v7086_v24 = vpop.eup %7085 }
 0xa97   : > { %7095 = vrcp.f32 %v2762_v34  ;;  %v7088_v29 = vpop.eup %7087  ;;  %v2828_v46 = vmul.f32 %v7086_v24, %v8504_v14 }
 0xa98   : > { %7097 = vrcp.f32 %v2761_v62  ;;  %v2830_v32 = vmul.f32 %v7088_v29, %v8508_v13  ;;  %v9596_v13 = vmov 0.0  }
 0xa99   : > { %7099 = vrcp.f32 %v2763_v9 }
 0xa9a   : > { %v7090_v12 = vpop.eup %7089 }
 0xa9b   : > { %v2829_v15 = vmul.f32 %v7090_v12, %v8513_v49 }
 0xa9f   : > { %v7092_v39 = vpop.eup %7091 }
 0xaa0   : > { %v7094_v0 = vpop.eup %7093  ;;  %v2832_v28 = vmul.f32 %v7092_v39, %v8527_v18 }
 0xaa1   : > { %v7096_v17 = vpop.eup %7095  ;;  %v2831_v31 = vmul.f32 %v7094_v0, %v8524_v2  ;;  %v5753_v2 = vld [vmem:[%s9579_s16] ss:$0 sm:$0xff] }
 0xaa2   : > { %v7098_v60 = vpop.eup %7097  ;;  %v2834_v61 = vmul.f32 %v7096_v17, %v8530_v10  ;;  %v2844_v1 = vpack.c.bf16 %v2832_v28, %v2828_v46 }
 0xaa3   : > { %v7100_v20 = vpop.eup %7099  ;;  %v2833_v22 = vmul.f32 %v7098_v60, %v8534_v57 }
 0xaa4   : > { %v2835_v33 = vmul.f32 %v7100_v20, %v8538_v4  ;;  %v2846_v3 = vpack.c.bf16 %v2834_v61, %v2830_v32 }
 0xaa5   : > { %v2845_v14 = vpack.c.bf16 %v2833_v22, %v2829_v15 }
 0xaa6   : > { %v2847_v51 = vpack.c.bf16 %v2835_v33, %v2831_v31 }
 0xaa7   : > { %3159 = vmatprep.mubr.bf16.mxu1 %v2845_v14 }
 0xaa8   : > { %3216 = vmatprep.mubr.bf16.mxu0 %v2847_v51  ;;  %3160 = vmatmul.mubr.bf16.gmra.mrb[68].mxu1 %v2844_v1 }
 0xaa9   : > { %3217 = vmatmul.mubr.bf16.gmra.mrb[68].mxu0 %v2846_v3  ;;  %3539 = vmatprep.mubr.bf16.mxu1 %v7330_v52 }
 0xaaa   : > { %6493 = vmatprep.mubr.msk.bf16.mxu0 %vm7331_vm0, %v9596_v13 }
 0xb52   : > { %v6183_v18 = vpop.f32.mrb[60].mxu1 }
 0xb53   : > { %v6217_v49 = vpop.f32.mrb[60].mxu0  ;;  %v6184_v10 = vpop.f32.mrb[61].mxu1 }
 0xb54   : > { %v6185_v57 = vadd.f32 %v6184_v10, %v6183_v18  ;;  %v6218_v4 = vpop.f32.mrb[61].mxu0  ;;  %v6186_v19 = vpop.f32.mrb[62].mxu1 }
 0xb55   : > { %v6219_v43 = vadd.f32 %v6218_v4, %v6217_v49  ;;  %v6220_v37 = vpop.f32.mrb[62].mxu0  ;;  %v6187_v7 = vpop.f32.mrb[63].mxu1  ;;  %v6753_v4 = vld [vmem:[%s9570_s7 + $0xc0] ss:$12 sps:$4 sm:$0xff]  }
 0xb56   : > { %v3146_v55 = vadd.f32 %v6185_v57, %v5753_v2  ;;  %v6188_v35 = vadd.f32 %v6187_v7, %v6186_v19  ;;  %v6221_v36 = vpop.f32.mrb[63].mxu0  ;;  %v6755_v19 = vld [vmem:[%s9570_s7 + $0xc4] ss:$12 sps:$4 sm:$0xff]  }
 0xb57   : > { %v6222_v16 = vadd.f32 %v6221_v36, %v6220_v37  ;;  %3507 = vmatprep.subr.bf16.mxu1 %v6755_v19 }
 0xb58   : > { %v3203_v25 = vadd.f32 %v6219_v43, %v3146_v55  ;;  %v3149_v38 = vadd.f32 %v6188_v35, %v5753_v2  ;;  %3508 = vmatpush1.bf16.msra.mxu1 %v6753_v4  ;;  %v6757_v43 = vld [vmem:[%s9570_s7 + $0xd8] ss:$12 sps:$4 sm:$0xff]   ;;  %v6784_v4 = vld [vmem:[%s9570_s7 + $0x170] ss:$12 sps:$4 sm:$0xff]  }
 0xb5a   : > { %v3206_v27 = vadd.f32 %v6222_v16, %v3149_v38  ;;  %v8566_v6 = vadd.f32 %v3203_v25, %v8160_v59 }
 0xb5c   : > { %3235 = vadd.xlane.f32.xlu0 %v8566_v6  ;;  %v8570_v56 = vadd.f32 %v3206_v27, %v8163_v21 }
 0xb5e   : > { %3237 = vadd.xlane.f32.xlu1 %v8570_v56 }
 0xb68   : > { %v6189_v41 = vpop.f32.mrb[64].mxu1 }
 0xb69   : > { %v6223_v54 = vpop.f32.mrb[64].mxu0  ;;  %v6190_v42 = vpop.f32.mrb[65].mxu1 }
 0xb6a   : > { %v6191_v11 = vadd.f32 %v6190_v42, %v6189_v41  ;;  %v6224_v34 = vpop.f32.mrb[65].mxu0  ;;  %v6192_v40 = vpop.f32.mrb[66].mxu1 }
 0xb6b   : > { %v6225_v62 = vadd.f32 %v6224_v34, %v6223_v54  ;;  %v6226_v9 = vpop.f32.mrb[66].mxu0  ;;  %v6193_v24 = vpop.f32.mrb[67].mxu1 }
 0xb6c   : > { %v3154_v29 = vadd.f32 %v6191_v11, %v5753_v2  ;;  %v6194_v12 = vadd.f32 %v6193_v24, %v6192_v40  ;;  %v6227_v59 = vpop.f32.mrb[67].mxu0  ;;  %v6761_v24 = vld [vmem:[%s9570_s7 + $0xf0] ss:$12 sps:$4 sm:$0xff]  }
 0xb6d   : > { %v6228_v39 = vadd.f32 %v6227_v59, %v6226_v9  ;;  %v6763_v9 = vld [vmem:[%s9570_s7 + $0xf4] ss:$12 sps:$4 sm:$0xff]  }
 0xb6e   : > { %v3211_v0 = vadd.f32 %v6225_v62, %v3154_v29  ;;  %v3157_v46 = vadd.f32 %v6194_v12, %v5753_v2  ;;  %v6764_v29 = vld [vmem:[%s9570_s7 + $0xf8] ss:$12 sps:$4 sm:$0xff]   ;;  %v6765_v59 = vld [vmem:[%s9570_s7 + $0x108] ss:$12 sps:$4 sm:$0xff]  }
 0xb6f   : > { %v6767_v12 = vld [vmem:[%s9570_s7 + $0x10c] ss:$12 sps:$4 sm:$0xff]  }
 0xb70   : > { %v3214_v28 = vadd.f32 %v6228_v39, %v3157_v46  ;;  %v8574_v21 = vadd.f32 %v3211_v0, %v8168_v5  ;;  %v6768_v39 = vld [vmem:[%s9570_s7 + $0x110] ss:$12 sps:$4 sm:$0xff]   ;;  %v6769_v0 = vld [vmem:[%s9570_s7 + $0x120] ss:$12 sps:$4 sm:$0xff]  }
 0xb71   : > { %v6771_v46 = vld [vmem:[%s9570_s7 + $0x124] ss:$12 sps:$4 sm:$0xff]  }
 0xb72   : > { %3239 = vadd.xlane.f32.xlu0 %v8574_v21  ;;  %v8578_v17 = vadd.f32 %v3214_v28, %v8171_v44  ;;  %v6772_v28 = vld [vmem:[%s9570_s7 + $0x128] ss:$12 sps:$4 sm:$0xff]  }
 0xb74   : > { %3241 = vadd.xlane.f32.xlu1 %v8578_v17 }
 0xb7b   : > { %v6195_v60 = vpop.f32.mrb[68].mxu1 }
 0xb7c   : > { %v6229_v32 = vpop.f32.mrb[68].mxu0  ;;  %v6196_v61 = vpop.f32.mrb[69].mxu1 }
 0xb7d   : > { %v6197_v1 = vadd.f32 %v6196_v61, %v6195_v60  ;;  %v6230_v20 = vpop.f32.mrb[69].mxu0  ;;  %v6198_v15 = vpop.f32.mrb[70].mxu1  ;;  %v6775_v60 = vld [vmem:[%s9570_s7 + $0x13c] ss:$12 sps:$4 sm:$0xff]   ;;  %v6773_v61 = vld [vmem:[%s9570_s7 + $0x138] ss:$12 sps:$4 sm:$0xff]  }
 0xb7e   : > { %v6231_v22 = vadd.f32 %v6230_v20, %v6229_v32  ;;  %v6232_v31 = vpop.f32.mrb[70].mxu0  ;;  %v6199_v33 = vpop.f32.mrb[71].mxu1 }
 0xb7f   : > { %v3162_v3 = vadd.f32 %v6197_v1, %v5753_v2  ;;  %v6200_v14 = vadd.f32 %v6199_v33, %v6198_v15  ;;  %v6233_v5 = vpop.f32.mrb[71].mxu0  ;;  %v6776_v1 = vld [vmem:[%s9570_s7 + $0x140] ss:$12 sps:$4 sm:$0xff]  }
 0xb80   : > { %v6234_v51 = vadd.f32 %v6233_v5, %v6232_v31  ;;  %v6779_v15 = vld [vmem:[%s9570_s7 + $0x154] ss:$12 sps:$4 sm:$0xff]  }
 0xb81   : > { %v3219_v18 = vadd.f32 %v6231_v22, %v3162_v3  ;;  %v3165_v49 = vadd.f32 %v6200_v14, %v5753_v2  ;;  %v6759_v2 = vld [vmem:[%s9570_s7 + $0xdc] ss:$12 sps:$4 sm:$0xff]   ;;  %v6780_v14 = vld [vmem:[%s9570_s7 + $0x158] ss:$12 sps:$4 sm:$0xff]  }
 0xb82   : > { %3509 = vmatprep.subr.bf16.mxu1 %v6759_v2  ;;  %v6777_v3 = vld [vmem:[%s9570_s7 + $0x150] ss:$12 sps:$4 sm:$0xff]  }
 0xb83   : > { %v3222_v10 = vadd.f32 %v6234_v51, %v3165_v49  ;;  %v8582_v44 = vadd.f32 %v3219_v18, %v8176_v50  ;;  %v6756_v50 = vld [vmem:[%s9570_s7 + $0xc8] ss:$12 sps:$4 sm:$0xff]   ;;  %3510 = vmatpush1.bf16.msra.mxu1 %v6757_v43  ;;  %v6783_v18 = vld [vmem:[%s9570_s7 + $0x16c] ss:$12 sps:$4 sm:$0xff]  }
 0xb84   : > { %6478 = vmatpush3.bf16.msra.mxu0 %v6756_v50  ;;  %3511 = vmatprep.subr.bf16.mxu1 %v6763_v9 }
 0xb85   : > { %3243 = vadd.xlane.f32.xlu0 %v8582_v44  ;;  %v8586_v57 = vadd.f32 %v3222_v10, %v8179_v53  ;;  %v6760_v53 = vld [vmem:[%s9570_s7 + $0xe0] ss:$12 sps:$4 sm:$0xff]   ;;  %6479 = vmatprep.subr.bf16.mxu0 %v9596_v13  ;;  %v6781_v10 = vld [vmem:[%s9570_s7 + $0x168] ss:$12 sps:$4 sm:$0xff]  }
 0xb87   : > { %3245 = vadd.xlane.f32.xlu1 %v8586_v57  ;;  %3512 = vmatpush1.bf16.msra.mxu1 %v6761_v24 }
 0xb88   : > { %6480 = vmatpush3.bf16.msra.mxu0 %v6760_v53  ;;  %3513 = vmatprep.subr.bf16.mxu1 %v6767_v12 }
 0xb89   : > { %6481 = vmatprep.subr.bf16.mxu0 %v9596_v13 }
 0xb8b   : > { %3514 = vmatpush1.bf16.msra.mxu1 %v6765_v59 }
 0xb8c   : > { %6482 = vmatpush3.bf16.msra.mxu0 %v6764_v29  ;;  %3515 = vmatprep.subr.bf16.mxu1 %v6771_v46 }
 0xb8d   : > { %6483 = vmatprep.subr.bf16.mxu0 %v9596_v13 }
 0xb8f   : > { %3516 = vmatpush1.bf16.msra.mxu1 %v6769_v0 }
 0xb90   : > { %6484 = vmatpush3.bf16.msra.mxu0 %v6768_v39  ;;  %3517 = vmatprep.subr.bf16.mxu1 %v6775_v60 }
 0xb91   : > { %6485 = vmatprep.subr.bf16.mxu0 %v9596_v13 }
 0xb93   : > { %3518 = vmatpush1.bf16.msra.mxu1 %v6773_v61 }
 0xb94   : > { %6486 = vmatpush3.bf16.msra.mxu0 %v6772_v28  ;;  %3519 = vmatprep.subr.bf16.mxu1 %v6779_v15 }
 0xb95   : > { %6487 = vmatprep.subr.bf16.mxu0 %v9596_v13 }
 0xb97   : > { %3520 = vmatpush1.bf16.msra.mxu1 %v6777_v3 }
 0xb98   : > { %6488 = vmatpush3.bf16.msra.mxu0 %v6776_v1  ;;  %3521 = vmatprep.subr.bf16.mxu1 %v6783_v18 }
 0xb99   : > { %6489 = vmatprep.subr.bf16.mxu0 %v9596_v13 }
 0xb9b   : > { %3522 = vmatpush1.bf16.msra.mxu1 %v6781_v10 }
 0xb9c   : > { %6490 = vmatpush3.bf16.msra.mxu0 %v6780_v14 }
 0xb9d   : > { %6491 = vmatprep.subr.bf16.mxu0 %v9596_v13 }
 0xba0   : > { %6492 = vmatpush3.bf16.msra.mxu0 %v6784_v4 }
 0xbe9   : > { %v3236_v37 = vpop.xlane.xlu0 %3235 }
 0xbea   : > { %v3247_v7 = vmul.f32 0.0078125, %v3236_v37 }
 0xbeb   : > { %v3238_v55 = vpop.xlane.xlu1 %3237 }
 0xbec   : > { %v8610_v35 = vsub.f32 %v8566_v6, %v3247_v7  ;;  %v3248_v36 = vmul.f32 0.0078125, %v3238_v55  ;;  %v5788_v55 = vld [vmem:[%s9568_s5 + $0x1] ss:$0 sm:$0xff] }
 0xbee   : > { %v8613_v16 = vsub.f32 %v8570_v56, %v3248_v36  ;;  %v3259_v25 = vmul.f32 %v8610_v35, %v8610_v35 }
 0xbf0   : > { %3265 = vadd.xlane.f32.xlu0 %v3259_v25  ;;  %v3260_v38 = vmul.f32 %v8613_v16, %v8613_v16 }
 0xbf2   : > { %3267 = vadd.xlane.f32.xlu1 %v3260_v38 }
 0xbff   : > { %v3240_v27 = vpop.xlane.xlu0 %3239 }
 0xc00   : > { %v3249_v41 = vmul.f32 0.0078125, %v3240_v27 }
 0xc01   : > { %v3242_v54 = vpop.xlane.xlu1 %3241 }
 0xc02   : > { %v8620_v42 = vsub.f32 %v8574_v21, %v3249_v41  ;;  %v3250_v11 = vmul.f32 0.0078125, %v3242_v54  ;;  %v5789_v41 = vld [vmem:[%s9569_s6 + $0x1] ss:$0 sm:$0xff] }
 0xc04   : > { %v8623_v34 = vsub.f32 %v8578_v17, %v3250_v11  ;;  %v3261_v40 = vmul.f32 %v8620_v42, %v8620_v42 }
 0xc06   : > { %3269 = vadd.xlane.f32.xlu0 %v3261_v40  ;;  %v3262_v62 = vmul.f32 %v8623_v34, %v8623_v34 }
 0xc08   : > { %3271 = vadd.xlane.f32.xlu1 %v3262_v62 }
 0xc12   : > { %v3244_v32 = vpop.xlane.xlu0 %3243 }
 0xc13   : > { %v3251_v20 = vmul.f32 0.0078125, %v3244_v32 }
 0xc14   : > { %v3246_v22 = vpop.xlane.xlu1 %3245 }
 0xc15   : > { %v8672_v31 = vsub.f32 %v8582_v44, %v3251_v20  ;;  %v3252_v33 = vmul.f32 0.0078125, %v3246_v22 }
 0xc17   : > { %v8681_v5 = vsub.f32 %v8586_v57, %v3252_v33  ;;  %v3263_v51 = vmul.f32 %v8672_v31, %v8672_v31 }
 0xc19   : > { %3273 = vadd.xlane.f32.xlu0 %v3263_v51  ;;  %v3264_v49 = vmul.f32 %v8681_v5, %v8681_v5 }
 0xc1b   : > { %3275 = vadd.xlane.f32.xlu1 %v3264_v49 }
 0xc7d   : > { %v3266_v19 = vpop.xlane.xlu0 %3265 }
 0xc7e   : > { %v3277_v50 = vmul.f32 0.0078125, %v3266_v19 }
 0xc7f   : > { %v3268_v2 = vpop.xlane.xlu1 %3267 }
 0xc80   : > { %v3283_v53 = vadd.f32 1e-05, %v3277_v50  ;;  %v3278_v43 = vmul.f32 0.0078125, %v3268_v2  ;;  %v5822_v2 = vld [vmem:[%s9571_s8 + $0x3] sm:$0x7] }
 0xc82   : > { %7101 = vrsqrt.f32 %v3283_v53  ;;  %v3284_v37 = vadd.f32 1e-05, %v3278_v43  ;;  %v8720_v53 = vrot.slane %v5822_v2, %v7677_v30  ;;  %v8723_v43 = vrot.slane %v5822_v2, %v7683_v47 }
 0xc84   : > { %7103 = vrsqrt.f32 %v3284_v37 }
 0xc8c   : > { %v7102_v7 = vpop.eup %7101 }
 0xc8d   : > { %v3295_v36 = vmul.f32 %v7102_v7, %v8610_v35 }
 0xc8e   : > { %v7104_v25 = vpop.eup %7103 }
 0xc8f   : > { %v3307_v38 = vmul.f32 %v5788_v55, %v3295_v36  ;;  %v3296_v27 = vmul.f32 %v7104_v25, %v8613_v16 }
 0xc91   : > { %v3308_v54 = vmul.f32 %v5788_v55, %v3296_v27  ;;  %v3319_v40 = vadd.f32 %v5789_v41, %v3307_v38 }
 0xc93   : > { %v3270_v11 = vpop.xlane.xlu0 %3269  ;;  %v3320_v62 = vadd.f32 %v5789_v41, %v3308_v54 }
 0xc94   : > { %v3279_v9 = vmul.f32 0.0078125, %v3270_v11 }
 0xc95   : > { %v3272_v24 = vpop.xlane.xlu1 %3271  ;;  %v3325_v29 = vpack.c.bf16 %v3320_v62, %v3319_v40 }
 0xc96   : > { %v3285_v12 = vadd.f32 1e-05, %v3279_v9  ;;  %v3280_v59 = vmul.f32 0.0078125, %v3272_v24 }
 0xc97   : > { %3540 = vmatmul.mubr.bf16.vlgmr.msra.gmra.mrb[72].mxu1 %v3325_v29  ;;  %6494 = vmatmul.mubr.bf16.vlgmr.msra.gmra.mrb[72].mxu0 %v3325_v29 }
 0xc98   : > { %7105 = vrsqrt.f32 %v3285_v12  ;;  %v3286_v35 = vadd.f32 1e-05, %v3280_v59  ;;  %3549 = vmatprep.mubr.bf16.mxu1 %v7330_v52  ;;  %6497 = vmatprep.mubr.msk.bf16.mxu0 %vm7331_vm0, %v9596_v13 }
 0xc9a   : > { %7107 = vrsqrt.f32 %v3286_v35 }
 0xca2   : > { %v7106_v16 = vpop.eup %7105 }
 0xca3   : > { %v3297_v39 = vmul.f32 %v7106_v16, %v8620_v42 }
 0xca4   : > { %v7108_v0 = vpop.eup %7107 }
 0xca5   : > { %v3298_v46 = vmul.f32 %v7108_v0, %v8623_v34  ;;  %v3309_v28 = vmul.f32 %v5788_v55, %v3297_v39 }
 0xca6   : > { %v3274_v32 = vpop.xlane.xlu0 %3273 }
 0xca7   : > { %v3310_v60 = vmul.f32 %v5788_v55, %v3298_v46  ;;  %v3281_v61 = vmul.f32 0.0078125, %v3274_v32  ;;  %v3321_v1 = vadd.f32 %v5789_v41, %v3309_v28 }
 0xca8   : > { %v3276_v15 = vpop.xlane.xlu1 %3275 }
 0xca9   : > { %v3322_v20 = vadd.f32 %v5789_v41, %v3310_v60  ;;  %v3287_v22 = vadd.f32 1e-05, %v3281_v61  ;;  %v3282_v33 = vmul.f32 0.0078125, %v3276_v15 }
 0xcab   : > { %v3326_v3 = vpack.c.bf16 %v3322_v20, %v3321_v1  ;;  %7109 = vrsqrt.f32 %v3287_v22  ;;  %v3288_v14 = vadd.f32 1e-05, %v3282_v33 }
 0xcad   : > { %3550 = vmatmul.mubr.bf16.gmra.mrb[76].mxu1 %v3326_v3  ;;  %6498 = vmatmul.mubr.bf16.gmra.mrb[76].mxu0 %v3326_v3  ;;  %7111 = vrsqrt.f32 %v3288_v14 }
 0xcae   : > { %3559 = vmatprep.mubr.bf16.mxu1 %v7330_v52  ;;  %6501 = vmatprep.mubr.msk.bf16.mxu0 %vm7331_vm0, %v9596_v13 }
 0xcb5   : > { %v7110_v42 = vpop.eup %7109 }
 0xcb6   : > { %v3299_v34 = vmul.f32 %v7110_v42, %v8672_v31 }
 0xcb7   : > { %v7112_v51 = vpop.eup %7111 }
 0xcb8   : > { %v3300_v18 = vmul.f32 %v7112_v51, %v8681_v5  ;;  %v3311_v49 = vmul.f32 %v5788_v55, %v3299_v34  ;;  %v8726_v5 = vrot.slane %v5822_v2, %v7688_v48 }
 0xcba   : > { %v3312_v10 = vmul.f32 %v5788_v55, %v3300_v18  ;;  %v3323_v4 = vadd.f32 %v5789_v41, %v3311_v49 }
 0xcbc   : > { %v3324_v19 = vadd.f32 %v5789_v41, %v3312_v10 }
 0xcbe   : > { %v3327_v50 = vpack.c.bf16 %v3324_v19, %v3323_v4 }
 0xcc0   : > { %3560 = vmatmul.mubr.bf16.gmra.mrb[80].mxu1 %v3327_v50  ;;  %6502 = vmatmul.mubr.bf16.gmra.mrb[80].mxu0 %v3327_v50 }
 0xd6a   : > { %v3541_v31 = vpop.f32.mrb[72].mxu1  ;;  %v3604_v37 = vpop.f32.mrb[72].mxu0 }
 0xd6b   : > { %v3542_v7 = vadd.f32 %v3541_v31, %v8720_v53  ;;  %v3543_v55 = vpop.f32.mrb[73].mxu1  ;;  %v6495_v36 = vpop.f32.mrb[73].mxu0  ;;  %v3605_v27 = vadd.f32 %v3604_v37, %v8723_v43 }
 0xd6c   : > { %v3545_v25 = vpop.f32.mrb[74].mxu1  ;;  %v3607_v38 = vpop.f32.mrb[74].mxu0  ;;  %v3544_v9 = vadd.f32 %v3543_v55, %v8726_v5 }
 0xd6d   : > { %v3546_v41 = vadd.f32 %v3545_v25, %v8720_v53  ;;  %v3608_v54 = vadd.f32 %v3607_v38, %v8723_v43  ;;  %v3547_v11 = vpop.f32.mrb[75].mxu1  ;;  %v6496_v40 = vpop.f32.mrb[75].mxu0  ;;  %v3633_v62 = vmul.f32 %v3542_v7, %v7707_v63  ;;  %v3627_v59 = vmul.f32 %v3542_v7, %v7701_v58 }
 0xd6e   : > { %v3548_v24 = vadd.f32 %v3547_v11, %v8726_v5  ;;  %v3630_v22 = vmul.f32 %v3542_v7, %v7728_v8  ;;  %v3636_v42 = vmul.f32 %v3542_v7, %v7731_v23 }
 0xd6f   : > { %v3634_v29 = vmul.f32 %v3546_v41, %v7707_v63  ;;  %v3878_v12 = vpack.c.bf16 %v3608_v54, %v3605_v27  ;;  %v3628_v35 = vmul.f32 %v3546_v41, %v7701_v58  ;;  %v3631_v51 = vmul.f32 %v3546_v41, %v7728_v8 }
 0xd70   : > { %v3645_v16 = vpack.c.bf16 %v3548_v24, %v3544_v9  ;;  %v3637_v4 = vmul.f32 %v3546_v41, %v7731_v23 }
 0xd71   : > { %v3642_v39 = vpack.c.bf16 %v3634_v29, %v3633_v62  ;;  %v3639_v0 = vpack.c.bf16 %v3628_v35, %v3627_v59 }
 0xd72   : > { %6505 = vmatprep.subr.bf16.mxu0 %v3645_v16  ;;  %6597 = vmatprep.subr.bf16.mxu1 %v3645_v16 }
 0xd73   : > { %6506 = vmatpush3.bf16.xpose.msra.mxu0 %v3645_v16  ;;  %6599 = vmatpush3.bf16.xpose.msra.mxu1 %v3645_v16 }
 0xd74   : > { %6509 = vmatprep.mubr.bf16.mxu0 %v3639_v0 }
 0xd80   : > { %v3551_v46 = vpop.f32.mrb[76].mxu1  ;;  %v3612_v28 = vpop.f32.mrb[76].mxu0 }
 0xd81   : > { %v3552_v60 = vadd.f32 %v3551_v46, %v8720_v53  ;;  %v3553_v32 = vpop.f32.mrb[77].mxu1  ;;  %v6499_v61 = vpop.f32.mrb[77].mxu0  ;;  %v3613_v37 = vadd.f32 %v3612_v28, %v8723_v43 }
 0xd82   : > { %v3554_v1 = vadd.f32 %v3553_v32, %v8726_v5  ;;  %v3555_v20 = vpop.f32.mrb[78].mxu1  ;;  %v3615_v15 = vpop.f32.mrb[78].mxu0 }
 0xd83   : > { %v3629_v33 = vmul.f32 %v3552_v60, %v7701_v58  ;;  %v3557_v3 = vpop.f32.mrb[79].mxu1  ;;  %v6500_v14 = vpop.f32.mrb[79].mxu0  ;;  %v3632_v18 = vmul.f32 %v3552_v60, %v7728_v8  ;;  %v3635_v49 = vmul.f32 %v3552_v60, %v7707_v63  ;;  %v3638_v19 = vmul.f32 %v3552_v60, %v7731_v23 }
 0xd84   : > { %v3646_v34 = vpack.c.bf16 %v3554_v1, %v3554_v1  ;;  %v3879_v7 = vpack.c.bf16 %v3613_v37, %v3613_v37  ;;  %v3556_v36 = vadd.f32 %v3555_v20, %v8720_v53  ;;  %v3616_v27 = vadd.f32 %v3615_v15, %v8723_v43 }
 0xd85   : > { %v3640_v10 = vpack.c.bf16 %v3630_v22, %v3629_v33  ;;  %v3641_v50 = vpack.c.bf16 %v3632_v18, %v3631_v51  ;;  %v3643_v2 = vpack.c.bf16 %v3636_v42, %v3635_v49  ;;  %v3644_v31 = vpack.c.bf16 %v3638_v19, %v3637_v4 }
 0xd86   : > { %6507 = vmatprep.subr.bf16.mxu0 %v3646_v34  ;;  %6598 = vmatprep.subr.bf16.mxu1 %v3646_v34  ;;  %v3899_v55 = vsel %vm1590_vm9, %v3879_v7, 0  ;;  %v3558_v41 = vadd.f32 %v3557_v3, %v8726_v5  ;;  %v4006_v9 = vmul.f32 %v3556_v36, %v7728_v8  ;;  %v4003_v59 = vmul.f32 %v3556_v36, %v7701_v58 }
 0xd87   : > { %6508 = vmatpush3.bf16.xpose.msra.mxu0 %v3646_v34  ;;  %6600 = vmatpush3.bf16.xpose.msra.mxu1 %v3646_v34  ;;  %v4009_v35 = vmul.f32 %v3556_v36, %v7707_v63  ;;  %v4012_v20 = vmul.f32 %v3556_v36, %v7731_v23 }
 0xd88   : > { %6513 = vmatprep.mubr.bf16.mxu1 %v3641_v50  ;;  %6521 = vmatprep.subr.bf16.mxu0 %v3878_v12 }
 0xd8e   : > { %6510 = vmatmul.mubr.bf16.vlgmr.msra.gmra.mrb[84].mxu0 %v3640_v10  ;;  %6514 = vmatmul.mubr.bf16.vlgmr.msra.gmra.mrb[84].mxu1 %v3642_v39 }
 0xd8f   : > { %6517 = vmatprep.mubr.bf16.mxu1 %v3643_v2  ;;  %6522 = vmatpush3.bf16.msra.mxu0 %v3878_v12 }
 0xd90   : > { %6603 = vmatprep.subr.msk.bf16.mxu0 %vm1590_vm9, %v3879_v7 }
 0xd93   : > { %6524 = vmatpush3.bf16.msra.mxu0 %v3899_v55  ;;  %v3561_v25 = vpop.f32.mrb[80].mxu1  ;;  %v3620_v38 = vpop.f32.mrb[80].mxu0 }
 0xd94   : > { %v3562_v54 = vadd.f32 %v3561_v25, %v8720_v53  ;;  %v3621_v11 = vadd.f32 %v3620_v38, %v8723_v43  ;;  %v3563_v40 = vpop.f32.mrb[81].mxu1  ;;  %v6503_v62 = vpop.f32.mrb[81].mxu0 }
 0xd95   : > { %v3564_v24 = vadd.f32 %v3563_v40, %v8726_v5  ;;  %v3565_v29 = vpop.f32.mrb[82].mxu1  ;;  %v3623_v12 = vpop.f32.mrb[82].mxu0 }
 0xd96   : > { %6518 = vmatmul.mubr.bf16.gmra.mrb[88].mxu1 %v3644_v31  ;;  %v8760_v16 = vpack.c.bf16 %v3621_v11, %v3616_v27  ;;  %v3566_v39 = vadd.f32 %v3565_v29, %v8720_v53  ;;  %v8764_v0 = vadd.f32 %v3623_v12, %v8723_v43  ;;  %v3567_v46 = vpop.f32.mrb[83].mxu1  ;;  %v6504_v28 = vpop.f32.mrb[83].mxu0  ;;  %v4004_v60 = vmul.f32 %v3562_v54, %v7701_v58 }
 0xd97   : > { %v4021_v32 = vpack.c.bf16 %v3564_v24, %v3558_v41  ;;  %v3568_v61 = vadd.f32 %v3567_v46, %v8726_v5  ;;  %v4010_v1 = vmul.f32 %v3562_v54, %v7707_v63  ;;  %v4007_v53 = vmul.f32 %v3562_v54, %v7728_v8 }
 0xd98   : > { %v4005_v15 = vmul.f32 %v3566_v39, %v7701_v58  ;;  %6553 = vmatprep.subr.bf16.mxu0 %v8760_v16  ;;  %v4015_v22 = vpack.c.bf16 %v4004_v60, %v4003_v59  ;;  %v4008_v43 = vmul.f32 %v3566_v39, %v7728_v8  ;;  %v4011_v14 = vmul.f32 %v3566_v39, %v7707_v63 }
 0xd99   : > { %v4022_v33 = vpack.c.bf16 %v3568_v61, %v3568_v61  ;;  %6537 = vmatprep.subr.bf16.mxu1 %v4021_v32  ;;  %v4018_v3 = vpack.c.bf16 %v4010_v1, %v4009_v35  ;;  %v4013_v5 = vmul.f32 %v3562_v54, %v7731_v23  ;;  %v4014_v51 = vmul.f32 %v3566_v39, %v7731_v23 }
 0xd9a   : > { %v4016_v42 = vpack.c.bf16 %v4006_v9, %v4005_v15  ;;  %6538 = vmatpush3.bf16.xpose.msra.mxu1 %v4021_v32  ;;  %6541 = vmatprep.mubr.bf16.mxu1 %v4015_v22  ;;  %v4017_v34 = vpack.c.bf16 %v4008_v43, %v4007_v53  ;;  %v4019_v18 = vpack.c.bf16 %v4012_v20, %v4011_v14 }
 0xd9b   : > { %6539 = vmatprep.subr.bf16.mxu1 %v4022_v33  ;;  %v4020_v49 = vpack.c.bf16 %v4014_v51, %v4013_v5 }
 0xda2   : > { %6540 = vmatpush3.bf16.xpose.msra.mxu1 %v4022_v33 }
 0xda3   : > { %6569 = vmatprep.subr.bf16.mxu1 %v9596_v13 }
 0xda9   : > { %6542 = vmatmul.mubr.bf16.vlgmr.msra.gmra.mrb[92].mxu1 %v4016_v42 }
 0xdaa   : > { %6545 = vmatprep.mubr.bf16.mxu1 %v4017_v34 }
 0xdb1   : > { %6546 = vmatmul.mubr.bf16.gmra.mrb[96].mxu1 %v4018_v3 }
 0xdb2   : > { %6549 = vmatprep.mubr.bf16.mxu1 %v4019_v18 }
 0xdb9   : > { %6550 = vmatmul.mubr.bf16.gmra.mrb[100].mxu1 %v4020_v49 }
 0xdba   : > { %6585 = vmatprep.mubr.msk.bf16.mxu1 %vm7331_vm0, %v9596_v13 }
 0xe61   : > { %v6511_v10 = vpop.f32.mrb[84].mxu0  ;;  %v6515_v4 = vpop.f32.mrb[84].mxu1 }
 0xe62   : > { %v3681_v19 = vpop.f32.mrb[85].mxu0  ;;  %v3697_v50 = vpop.f32.mrb[85].mxu1  ;;  %v8788_v55 = vsel %vm909_vm10, %v6511_v10, -1e+30  ;;  %v8816_v35 = vsel %vm909_vm10, %v6515_v4, -1e+30 }
 0xe63   : > { %v8782_v2 = vsel %vm909_vm10, %v3681_v19, -1e+30  ;;  %v6512_v31 = vpop.f32.mrb[86].mxu0  ;;  %v6516_v37 = vpop.f32.mrb[86].mxu1  ;;  %v3746_v41 = vsel %vm1431_vm11, %v8788_v55, -inf  ;;  %v3758_v46 = vsel %vm1431_vm11, %v8816_v35, -inf }
 0xe64   : > { %v3740_v7 = vsel %vm1431_vm11, %v8782_v2, -inf  ;;  %v3684_v36 = vpop.f32.mrb[87].mxu0  ;;  %v3700_v25 = vpop.f32.mrb[87].mxu1  ;;  %v8800_v54 = vsel %vm909_vm10, %v6512_v31, -1e+30 }
 0xe65   : > { %3741 = vmax.xlane.f32.xlu0 %v3740_v7  ;;  %v8792_v38 = vsel %vm909_vm10, %v3684_v36, -1e+30  ;;  %v8804_v11 = vsel %vm909_vm10, %v3697_v50, -1e+30  ;;  %v3749_v9 = vsel %vm1431_vm11, %v8800_v54, -inf }
 0xe66   : > { %v3743_v27 = vsel %vm1431_vm11, %v8792_v38, -inf  ;;  %v3752_v29 = vsel %vm1431_vm11, %v8804_v11, -inf  ;;  %v8812_v12 = vsel %vm909_vm10, %v3700_v25, -1e+30  ;;  %v8824_v28 = vsel %vm909_vm10, %v6516_v37, -1e+30 }
 0xe67   : > { %3744 = vmax.xlane.f32.xlu1 %v3743_v27  ;;  %v3755_v39 = vsel %vm1431_vm11, %v8812_v12, -inf  ;;  %v3761_v32 = vsel %vm1431_vm11, %v8824_v28, -inf }
 0xe69   : > { %3747 = vmax.xlane.f32.xlu0 %v3746_v41  ;;  %v6519_v40 = vpop.f32.mrb[88].mxu1 }
 0xe6a   : > { %v3713_v62 = vpop.f32.mrb[89].mxu1  ;;  %v8840_v20 = vsel %vm909_vm10, %v6519_v40, -1e+30 }
 0xe6b   : > { %v6520_v24 = vpop.f32.mrb[90].mxu1  ;;  %3750 = vmax.xlane.f32.xlu1 %v3749_v9  ;;  %v8828_v60 = vsel %vm909_vm10, %v3713_v62, -1e+30  ;;  %v3770_v22 = vsel %vm1431_vm11, %v8840_v20, -inf }
 0xe6c   : > { %v3716_v59 = vpop.f32.mrb[91].mxu1  ;;  %v3764_v61 = vsel %vm1431_vm11, %v8828_v60, -inf  ;;  %v8848_v53 = vsel %vm909_vm10, %v6520_v24, -1e+30 }
 0xe6d   : > { %3753 = vmax.xlane.f32.xlu0 %v3752_v29  ;;  %v8836_v1 = vsel %vm909_vm10, %v3716_v59, -1e+30  ;;  %v3773_v43 = vsel %vm1431_vm11, %v8848_v53, -inf }
 0xe6e   : > { %v3767_v15 = vsel %vm1431_vm11, %v8836_v1, -inf }
 0xe6f   : > { %3756 = vmax.xlane.f32.xlu1 %v3755_v39 }
 0xe71   : > { %3759 = vmax.xlane.f32.xlu0 %v3758_v46 }
 0xe73   : > { %3762 = vmax.xlane.f32.xlu1 %v3761_v32 }
 0xe75   : > { %3765 = vmax.xlane.f32.xlu0 %v3764_v61 }
 0xe77   : > { %3768 = vmax.xlane.f32.xlu1 %v3767_v15 }
 0xe79   : > { %3771 = vmax.xlane.f32.xlu0 %v3770_v22 }
 0xe7b   : > { %3774 = vmax.xlane.f32.xlu1 %v3773_v43 }
 0xe7c   : > { %v6543_v33 = vpop.f32.mrb[92].mxu1 }
 0xe7d   : > { %v4057_v3 = vpop.f32.mrb[93].mxu1  ;;  %v8860_v51 = vsel %vm909_vm10, %v6543_v33, -1e+30 }
 0xe7e   : > { %v8854_v14 = vsel %vm909_vm10, %v4057_v3, -1e+30  ;;  %v6544_v5 = vpop.f32.mrb[94].mxu1  ;;  %v4122_v4 = vsel %vm1431_vm11, %v8860_v51, -inf }
 0xe7f   : > { %v4116_v42 = vsel %vm1431_vm11, %v8854_v14, -inf  ;;  %v4060_v34 = vpop.f32.mrb[95].mxu1  ;;  %v8870_v10 = vsel %vm909_vm10, %v6544_v5, -1e+30 }
 0xe80   : > { %v8864_v18 = vsel %vm909_vm10, %v4060_v34, -1e+30  ;;  %4117 = vmax.xlane.f32.xlu0 %v4116_v42  ;;  %v4125_v50 = vsel %vm1431_vm11, %v8870_v10, -inf }
 0xe81   : > { %v4119_v49 = vsel %vm1431_vm11, %v8864_v18, -inf }
 0xe82   : > { %4120 = vmax.xlane.f32.xlu1 %v4119_v49 }
 0xe84   : > { %v6547_v19 = vpop.f32.mrb[96].mxu1  ;;  %4123 = vmax.xlane.f32.xlu0 %v4122_v4 }
 0xe85   : > { %v4073_v31 = vpop.f32.mrb[97].mxu1  ;;  %v8884_v27 = vsel %vm909_vm10, %v6547_v19, -1e+30 }
 0xe86   : > { %v8878_v37 = vsel %vm909_vm10, %v4073_v31, -1e+30  ;;  %v6548_v7 = vpop.f32.mrb[98].mxu1  ;;  %4126 = vmax.xlane.f32.xlu1 %v4125_v50  ;;  %v4134_v9 = vsel %vm1431_vm11, %v8884_v27, -inf }
 0xe87   : > { %v4128_v36 = vsel %vm1431_vm11, %v8878_v37, -inf  ;;  %v4076_v25 = vpop.f32.mrb[99].mxu1  ;;  %v8894_v62 = vsel %vm909_vm10, %v6548_v7, -1e+30 }
 0xe88   : > { %v8888_v41 = vsel %vm909_vm10, %v4076_v25, -1e+30  ;;  %4129 = vmax.xlane.f32.xlu0 %v4128_v36  ;;  %v4137_v29 = vsel %vm1431_vm11, %v8894_v62, -inf }
 0xe89   : > { %v4131_v40 = vsel %vm1431_vm11, %v8888_v41, -inf }
 0xe8a   : > { %4132 = vmax.xlane.f32.xlu1 %v4131_v40 }
 0xe8c   : > { %v6551_v24 = vpop.f32.mrb[100].mxu1  ;;  %4135 = vmax.xlane.f32.xlu0 %v4134_v9 }
 0xe8d   : > { %v4089_v59 = vpop.f32.mrb[101].mxu1  ;;  %v8908_v15 = vsel %vm909_vm10, %v6551_v24, -1e+30 }
 0xe8e   : > { %v8902_v39 = vsel %vm909_vm10, %v4089_v59, -1e+30  ;;  %v6552_v46 = vpop.f32.mrb[102].mxu1  ;;  %4138 = vmax.xlane.f32.xlu1 %v4137_v29  ;;  %v4146_v3 = vsel %vm1431_vm11, %v8908_v15, -inf }
 0xe8f   : > { %v4140_v32 = vsel %vm1431_vm11, %v8902_v39, -inf  ;;  %v4092_v61 = vpop.f32.mrb[103].mxu1  ;;  %v8918_v33 = vsel %vm909_vm10, %v6552_v46, -1e+30 }
 0xe90   : > { %v8912_v22 = vsel %vm909_vm10, %v4092_v61, -1e+30  ;;  %4141 = vmax.xlane.f32.xlu0 %v4140_v32  ;;  %v4149_v5 = vsel %vm1431_vm11, %v8918_v33, -inf }
 0xe91   : > { %v4143_v43 = vsel %vm1431_vm11, %v8912_v22, -inf }
 0xe92   : > { %4144 = vmax.xlane.f32.xlu1 %v4143_v43 }
 0xe94   : > { %4147 = vmax.xlane.f32.xlu0 %v4146_v3 }
 0xe96   : > { %4150 = vmax.xlane.f32.xlu1 %v4149_v5 }
 0xef2   : > { %v3742_v42 = vpop.xlane.xlu0 %3741 }
 0xef3   : > { %v3776_v34 = vsub.f32 %v8782_v2, %v3742_v42 }
 0xef4   : > { %v3745_v4 = vpop.xlane.xlu1 %3744 }
 0xef5   : > { %v3788_v49 = vmul.f32 1.442695, %v3776_v34  ;;  %v3777_v19 = vsub.f32 %v8792_v38, %v3745_v4 }
 0xef6   : > { %v3748_v50 = vpop.xlane.xlu0 %3747 }
 0xef7   : > { %7113 = vpow2.f32 %v3788_v49  ;;  %v3778_v45 = vsub.f32 %v8788_v55, %v3748_v50  ;;  %v3790_v31 = vmul.f32 1.442695, %v3777_v19 }
 0xef8   : > { %v3751_v36 = vpop.xlane.xlu1 %3750 }
 0xef9   : > { %v3792_v7 = vmul.f32 1.442695, %v3778_v45  ;;  %7115 = vpow2.f32 %v3790_v31  ;;  %v3779_v25 = vsub.f32 %v8800_v54, %v3751_v36 }
 0xefa   : > { %v3754_v40 = vpop.xlane.xlu0 %3753 }
 0xefb   : > { %7117 = vpow2.f32 %v3792_v7  ;;  %v3780_v9 = vsub.f32 %v8804_v11, %v3754_v40  ;;  %v3794_v24 = vmul.f32 1.442695, %v3779_v25 }
 0xefc   : > { %v3757_v29 = vpop.xlane.xlu1 %3756 }
 0xefd   : > { %v3796_v2 = vmul.f32 1.442695, %v3780_v9  ;;  %7119 = vpow2.f32 %v3794_v24  ;;  %v3781_v38 = vsub.f32 %v8812_v12, %v3757_v29 }
 0xefe   : > { %v3760_v59 = vpop.xlane.xlu0 %3759 }
 0xeff   : > { %7121 = vpow2.f32 %v3796_v2  ;;  %v3782_v55 = vsub.f32 %v8816_v35, %v3760_v59  ;;  %v3798_v46 = vmul.f32 1.442695, %v3781_v38 }
 0xf00   : > { %v3763_v43 = vpop.xlane.xlu1 %3762 }
 0xf01   : > { %v8931_v32 = vpop.eup %7113  ;;  %v3800_v61 = vmul.f32 1.442695, %v3782_v55  ;;  %7123 = vpow2.f32 %v3798_v46  ;;  %v3783_v54 = vsub.f32 %v8824_v28, %v3763_v43 }
 0xf02   : > { %v3766_v3 = vpop.xlane.xlu0 %3765  ;;  %v3812_v11 = vsel %vm1431_vm11, %v8931_v32, 0.0 }
 0xf03   : > { %7125 = vpow2.f32 %v3800_v61  ;;  %v3784_v5 = vsub.f32 %v8828_v60, %v3766_v3  ;;  %3813 = vadd.xlane.f32.xlu0 %v3812_v11  ;;  %v8937_v12 = vpop.eup %7115  ;;  %v3802_v42 = vmul.f32 1.442695, %v3783_v54 }
 0xf04   : > { %v3769_v49 = vpop.xlane.xlu1 %3768  ;;  %v3815_v4 = vsel %vm1431_vm11, %v8937_v12, 0.0 }
 0xf05   : > { %v8939_v35 = vpop.eup %7117  ;;  %v3804_v34 = vmul.f32 1.442695, %v3784_v5  ;;  %7127 = vpow2.f32 %v3802_v42  ;;  %v3785_v28 = vsub.f32 %v8836_v1, %v3769_v49  ;;  %3816 = vadd.xlane.f32.xlu1 %v3815_v4 }
 0xf06   : > { %v3772_v19 = vpop.xlane.xlu0 %3771  ;;  %v3818_v50 = vsel %vm1431_vm11, %v8939_v35, 0.0 }
 0xf07   : > { %7129 = vpow2.f32 %v3804_v34  ;;  %v3786_v60 = vsub.f32 %v8840_v20, %v3772_v19  ;;  %3819 = vadd.xlane.f32.xlu0 %v3818_v50  ;;  %v8947_v45 = vpop.eup %7119  ;;  %v3806_v31 = vmul.f32 1.442695, %v3785_v28 }
 0xf08   : > { %v3775_v25 = vpop.xlane.xlu1 %3774  ;;  %v3821_v40 = vsel %vm1431_vm11, %v8947_v45, 0.0 }
 0xf09   : > { %v8949_v7 = vpop.eup %7121  ;;  %v3808_v36 = vmul.f32 1.442695, %v3786_v60  ;;  %7131 = vpow2.f32 %v3806_v31  ;;  %v3787_v1 = vsub.f32 %v8848_v53, %v3775_v25  ;;  %3822 = vadd.xlane.f32.xlu1 %v3821_v40 }
 0xf0a   : > { %v3824_v9 = vsel %vm1431_vm11, %v8949_v7, 0.0 }
 0xf0b   : > { %7133 = vpow2.f32 %v3808_v36  ;;  %3825 = vadd.xlane.f32.xlu0 %v3824_v9  ;;  %v8956_v20 = vpop.eup %7123  ;;  %v3810_v24 = vmul.f32 1.442695, %v3787_v1 }
 0xf0c   : > { %v3827_v29 = vsel %vm1431_vm11, %v8956_v20, 0.0 }
 0xf0d   : > { %v8958_v2 = vpop.eup %7125  ;;  %7135 = vpow2.f32 %v3810_v24  ;;  %3828 = vadd.xlane.f32.xlu1 %v3827_v29  ;;  %v4118_v53 = vpop.xlane.xlu0 %4117 }
 0xf0e   : > { %v3830_v38 = vsel %vm1431_vm11, %v8958_v2, 0.0  ;;  %v4152_v55 = vsub.f32 %v8854_v14, %v4118_v53 }
 0xf0f   : > { %3831 = vadd.xlane.f32.xlu0 %v3830_v38  ;;  %v8964_v59 = vpop.eup %7127  ;;  %v4121_v61 = vpop.xlane.xlu1 %4120 }
 0xf10   : > { %v3833_v43 = vsel %vm1431_vm11, %v8964_v59, 0.0  ;;  %v4164_v54 = vmul.f32 1.442695, %v4152_v55  ;;  %v4153_v3 = vsub.f32 %v8864_v18, %v4121_v61 }
 0xf11   : > { %v8967_v46 = vpop.eup %7129  ;;  %3834 = vadd.xlane.f32.xlu1 %v3833_v43  ;;  %v4124_v5 = vpop.xlane.xlu0 %4123 }
 0xf12   : > { %v3836_v11 = vsel %vm1431_vm11, %v8967_v46, 0.0  ;;  %7137 = vpow2.f32 %v4164_v54  ;;  %v4166_v34 = vmul.f32 1.442695, %v4153_v3  ;;  %v4154_v14 = vsub.f32 %v8860_v51, %v4124_v5 }
 0xf13   : > { %3837 = vadd.xlane.f32.xlu0 %v3836_v11  ;;  %v8974_v42 = vpop.eup %7131  ;;  %v4127_v4 = vpop.xlane.xlu1 %4126 }
 0xf14   : > { %v3839_v28 = vsel %vm1431_vm11, %v8974_v42, 0.0  ;;  %7139 = vpow2.f32 %v4166_v34  ;;  %v4168_v18 = vmul.f32 1.442695, %v4154_v14  ;;  %v4155_v19 = vsub.f32 %v8870_v10, %v4127_v4 }
 0xf15   : > { %v8977_v49 = vpop.eup %7133  ;;  %3840 = vadd.xlane.f32.xlu1 %v3839_v28  ;;  %v4130_v60 = vpop.xlane.xlu0 %4129 }
 0xf16   : > { %v3842_v50 = vsel %vm1431_vm11, %v8977_v49, 0.0  ;;  %7141 = vpow2.f32 %v4168_v18  ;;  %v4170_v51 = vmul.f32 1.442695, %v4155_v19  ;;  %v4156_v36 = vsub.f32 %v8878_v37, %v4130_v60 }
 0xf17   : > { %3843 = vadd.xlane.f32.xlu0 %v3842_v50  ;;  %v8984_v31 = vpop.eup %7135  ;;  %v4133_v25 = vpop.xlane.xlu1 %4132 }
 0xf18   : > { %v3845_v40 = vsel %vm1431_vm11, %v8984_v31, 0.0  ;;  %7143 = vpow2.f32 %v4170_v51  ;;  %v4172_v1 = vmul.f32 1.442695, %v4156_v36  ;;  %v4157_v10 = vsub.f32 %v8888_v41, %v4133_v25 }
 0xf19   : > { %3846 = vadd.xlane.f32.xlu1 %v3845_v40  ;;  %v4136_v9 = vpop.xlane.xlu0 %4135 }
 0xf1a   : > { %7145 = vpow2.f32 %v4172_v1  ;;  %v4174_v24 = vmul.f32 1.442695, %v4157_v10  ;;  %v4158_v29 = vsub.f32 %v8884_v27, %v4136_v9 }
 0xf1b   : > { %v4139_v38 = vpop.xlane.xlu1 %4138 }
 0xf1c   : > { %v8991_v53 = vpop.eup %7137  ;;  %7147 = vpow2.f32 %v4174_v24  ;;  %v4176_v55 = vmul.f32 1.442695, %v4158_v29  ;;  %v4159_v37 = vsub.f32 %v8894_v62, %v4139_v38 }
 0xf1d   : > { %v4142_v61 = vpop.xlane.xlu0 %4141  ;;  %v4188_v43 = vsel %vm1431_vm11, %v8991_v53, 0.0 }
 0xf1e   : > { %v8996_v54 = vpop.eup %7139  ;;  %7149 = vpow2.f32 %v4176_v55  ;;  %v4178_v41 = vmul.f32 1.442695, %v4159_v37  ;;  %v4160_v3 = vsub.f32 %v8902_v39, %v4142_v61  ;;  %4189 = vadd.xlane.f32.xlu0 %v4188_v43 }
 0xf1f   : > { %v4145_v11 = vpop.xlane.xlu1 %4144  ;;  %v4191_v27 = vsel %vm1431_vm11, %v8996_v54, 0.0 }
 0xf20   : > { %v9001_v5 = vpop.eup %7141  ;;  %7151 = vpow2.f32 %v4178_v41  ;;  %v4180_v34 = vmul.f32 1.442695, %v4160_v3  ;;  %v4161_v62 = vsub.f32 %v8912_v22, %v4145_v11  ;;  %4192 = vadd.xlane.f32.xlu1 %v4191_v27  ;;  %v6785_v3 = vld [vmem:[%s9572_s9 + $0x40] sm:$0xff]   ;;  %v6786_v11 = vld [vmem:[%s9572_s9 + $0x48] sm:$0xff]  }
 0xf21   : > { %v4148_v14 = vpop.xlane.xlu0 %4147  ;;  %v4194_v4 = vsel %vm1431_vm11, %v9001_v5, 0.0  ;;  %6570 = vmatpush3.bf16.msra.mxu1 %v6785_v3 }
 0xf22   : > { %v9006_v28 = vpop.eup %7143  ;;  %7153 = vpow2.f32 %v4180_v34  ;;  %v4182_v39 = vmul.f32 1.442695, %v4161_v62  ;;  %v4162_v18 = vsub.f32 %v8908_v15, %v4148_v14  ;;  %4195 = vadd.xlane.f32.xlu0 %v4194_v4  ;;  %6571 = vmatprep.subr.bf16.mxu1 %v9596_v13 }
 0xf23   : > { %v4151_v19 = vpop.xlane.xlu1 %4150  ;;  %v4197_v50 = vsel %vm1431_vm11, %v9006_v28, 0.0 }
 0xf24   : > { %v9011_v60 = vpop.eup %7145  ;;  %7155 = vpow2.f32 %v4182_v39  ;;  %v4184_v22 = vmul.f32 1.442695, %v4162_v18  ;;  %v4163_v51 = vsub.f32 %v8918_v33, %v4151_v19  ;;  %4198 = vadd.xlane.f32.xlu1 %v4197_v50 }
 0xf25   : > { %v4200_v36 = vsel %vm1431_vm11, %v9011_v60, 0.0  ;;  %6572 = vmatpush3.bf16.msra.mxu1 %v6786_v11 }
 0xf26   : > { %v9016_v25 = vpop.eup %7147  ;;  %7157 = vpow2.f32 %v4184_v22  ;;  %v4186_v40 = vmul.f32 1.442695, %v4163_v51  ;;  %4201 = vadd.xlane.f32.xlu0 %v4200_v36  ;;  %6573 = vmatprep.subr.bf16.mxu1 %v9596_v13 }
 0xf27   : > { %v4203_v15 = vsel %vm1431_vm11, %v9016_v25, 0.0 }
 0xf28   : > { %v9020_v1 = vpop.eup %7149  ;;  %7159 = vpow2.f32 %v4186_v40  ;;  %4204 = vadd.xlane.f32.xlu1 %v4203_v15 }
 0xf29   : > { %v4206_v10 = vsel %vm1431_vm11, %v9020_v1, 0.0 }
 0xf2a   : > { %v9024_v33 = vpop.eup %7151  ;;  %4207 = vadd.xlane.f32.xlu0 %v4206_v10 }
 0xf2b   : > { %v4209_v9 = vsel %vm1431_vm11, %v9024_v33, 0.0 }
 0xf2c   : > { %v9028_v24 = vpop.eup %7153  ;;  %4210 = vadd.xlane.f32.xlu1 %v4209_v9 }
 0xf2d   : > { %v4212_v29 = vsel %vm1431_vm11, %v9028_v24, 0.0 }
 0xf2e   : > { %v9032_v38 = vpop.eup %7155  ;;  %4213 = vadd.xlane.f32.xlu0 %v4212_v29 }
 0xf2f   : > { %v4215_v55 = vsel %vm1431_vm11, %v9032_v38, 0.0 }
 0xf30   : > { %v9036_v37 = vpop.eup %7157  ;;  %4216 = vadd.xlane.f32.xlu1 %v4215_v55 }
 0xf31   : > { %v4218_v61 = vsel %vm1431_vm11, %v9036_v37, 0.0 }
 0xf32   : > { %v9040_v43 = vpop.eup %7159  ;;  %4219 = vadd.xlane.f32.xlu0 %v4218_v61 }
 0xf33   : > { %v4221_v41 = vsel %vm1431_vm11, %v9040_v43, 0.0 }
 0xf34   : > { %4222 = vadd.xlane.f32.xlu1 %v4221_v41 }
 0xf90   : > { %v3814_v27 = vpop.xlane.xlu0 %3813 }
 0xf91   : > { %7161 = vrcp.f32 %v3814_v27 }
 0xf92   : > { %v3817_v34 = vpop.xlane.xlu1 %3816 }
 0xf93   : > { %7163 = vrcp.f32 %v3817_v34 }
 0xf94   : > { %v3820_v62 = vpop.xlane.xlu0 %3819 }
 0xf95   : > { %7165 = vrcp.f32 %v3820_v62 }
 0xf96   : > { %v3823_v14 = vpop.xlane.xlu1 %3822 }
 0xf97   : > { %7167 = vrcp.f32 %v3823_v14 }
 0xf98   : > { %v3826_v4 = vpop.xlane.xlu0 %3825 }
 0xf99   : > { %7169 = vrcp.f32 %v3826_v4 }
 0xf9a   : > { %v3829_v39 = vpop.xlane.xlu1 %3828 }
 0xf9b   : > { %v7162_v18 = vpop.eup %7161  ;;  %7171 = vrcp.f32 %v3829_v39 }
 0xf9c   : > { %v3832_v19 = vpop.xlane.xlu0 %3831  ;;  %v3860_v51 = vmul.f32 %v7162_v18, %v8931_v32 }
 0xf9d   : > { %v7164_v50 = vpop.eup %7163  ;;  %7173 = vrcp.f32 %v3832_v19 }
 0xf9e   : > { %v3835_v22 = vpop.xlane.xlu1 %3834  ;;  %v3861_v36 = vmul.f32 %v7164_v50, %v8937_v12  ;;  %v4255_v12 = vpack.c.bf16 %v8764_v0, %v8764_v0 }
 0xf9f   : > { %v7166_v40 = vpop.eup %7165  ;;  %7175 = vrcp.f32 %v3835_v22 }
 0xfa0   : > { %v3838_v15 = vpop.xlane.xlu0 %3837  ;;  %v3872_v10 = vpack.c.bf16 %v3861_v36, %v3860_v51  ;;  %v3862_v29 = vmul.f32 %v7166_v40, %v8939_v35  ;;  %v4275_v4 = vsel %vm1590_vm9, %v4255_v12, 0 }
 0xfa1   : > { %v7168_v9 = vpop.eup %7167  ;;  %7177 = vrcp.f32 %v3838_v15 }
 0xfa2   : > { %v3863_v55 = vmul.f32 %v7168_v9, %v8947_v45  ;;  %6525 = vmatprep.mubr.msk.bf16.mxu0 %vm1431_vm11, %v3872_v10  ;;  %v3841_v61 = vpop.xlane.xlu1 %3840 }
 0xfa3   : > { %v7170_v41 = vpop.eup %7169  ;;  %7179 = vrcp.f32 %v3841_v61 }
 0xfa4   : > { %v3844_v3 = vpop.xlane.xlu0 %3843  ;;  %v3873_v11 = vpack.c.bf16 %v3863_v55, %v3862_v29  ;;  %v3864_v34 = vmul.f32 %v7170_v41, %v8949_v7 }
 0xfa5   : > { %v7172_v32 = vpop.eup %7171  ;;  %7181 = vrcp.f32 %v3844_v3 }
 0xfa6   : > { %6526 = vmatmul.mubr.msk.bf16.vlgmr.msra.gmra.mrb[88].mxu0 %vm1431_vm11, %v3873_v11  ;;  %v3847_v27 = vpop.xlane.xlu1 %3846  ;;  %v3865_v35 = vmul.f32 %v7172_v32, %v8956_v20 }
 0xfa7   : > { %v7174_v45 = vpop.eup %7173  ;;  %6554 = vmatpush3.bf16.msra.mxu0 %v8760_v16  ;;  %7183 = vrcp.f32 %v3847_v27 }
 0xfa8   : > { %6604 = vmatprep.subr.msk.bf16.mxu0 %vm1590_vm9, %v4255_v12  ;;  %v3874_v62 = vpack.c.bf16 %v3865_v35, %v3864_v34  ;;  %v3866_v0 = vmul.f32 %v7174_v45, %v8958_v2 }
 0xfa9   : > { %v7176_v14 = vpop.eup %7175 }
 0xfaa   : > { %6529 = vmatprep.mubr.msk.bf16.mxu0 %vm1431_vm11, %v3874_v62  ;;  %v3867_v39 = vmul.f32 %v7176_v14, %v8964_v59 }
 0xfab   : > { %v7178_v18 = vpop.eup %7177  ;;  %6556 = vmatpush3.bf16.msra.mxu0 %v4275_v4  ;;  %v4190_v7 = vpop.xlane.xlu0 %4189 }
 0xfac   : > { %v3875_v20 = vpack.c.bf16 %v3867_v39, %v3866_v0  ;;  %7185 = vrcp.f32 %v4190_v7  ;;  %v3868_v50 = vmul.f32 %v7178_v18, %v8967_v46 }
 0xfad   : > { %v7180_v19 = vpop.eup %7179  ;;  %v4193_v16 = vpop.xlane.xlu1 %4192 }
 0xfae   : > { %6530 = vmatmul.mubr.msk.bf16.gmra.mrb[92].mxu0 %vm1431_vm11, %v3875_v20  ;;  %v3869_v22 = vmul.f32 %v7180_v19, %v8974_v42  ;;  %7187 = vrcp.f32 %v4193_v16 }
 0xfaf   : > { %v7182_v51 = vpop.eup %7181  ;;  %v4196_v36 = vpop.xlane.xlu0 %4195 }
 0xfb0   : > { %v3876_v40 = vpack.c.bf16 %v3869_v22, %v3868_v50  ;;  %7189 = vrcp.f32 %v4196_v36  ;;  %v3870_v15 = vmul.f32 %v7182_v51, %v8977_v49 }
 0xfb1   : > { %v7184_v2 = vpop.eup %7183  ;;  %v4199_v59 = vpop.xlane.xlu1 %4198 }
 0xfb2   : > { %6533 = vmatprep.mubr.msk.bf16.mxu0 %vm1431_vm11, %v3876_v40  ;;  %v3871_v10 = vmul.f32 %v7184_v2, %v8984_v31  ;;  %7191 = vrcp.f32 %v4199_v59  ;;  %v6792_v2 = vld [vmem:[%s9572_s9 + $0x78] sm:$0xff]  }
 0xfb3   : > { %v4202_v9 = vpop.xlane.xlu0 %4201 }
 0xfb4   : > { %v3877_v29 = vpack.c.bf16 %v3871_v10, %v3870_v15  ;;  %7193 = vrcp.f32 %v4202_v9 }
 0xfb5   : > { %v4205_v46 = vpop.xlane.xlu1 %4204 }
 0xfb6   : > { %6534 = vmatmul.mubr.msk.bf16.gmra.mrb[96].mxu0 %vm1431_vm11, %v3877_v29  ;;  %v7186_v42 = vpop.eup %7185  ;;  %7195 = vrcp.f32 %v4205_v46 }
 0xfb7   : > { %v4208_v55 = vpop.xlane.xlu0 %4207  ;;  %v4236_v3 = vmul.f32 %v7186_v42, %v8991_v53 }
 0xfb8   : > { %v7188_v61 = vpop.eup %7187  ;;  %7197 = vrcp.f32 %v4208_v55 }
 0xfb9   : > { %v4211_v41 = vpop.xlane.xlu1 %4210  ;;  %v4237_v11 = vmul.f32 %v7188_v61, %v8996_v54 }
 0xfba   : > { %v7190_v49 = vpop.eup %7189  ;;  %7199 = vrcp.f32 %v4211_v41 }
 0xfbb   : > { %v4214_v31 = vpop.xlane.xlu0 %4213  ;;  %v4248_v32 = vpack.c.bf16 %v4237_v11, %v4236_v3  ;;  %v4238_v27 = vmul.f32 %v7190_v49, %v9001_v5 }
 0xfbc   : > { %v7192_v12 = vpop.eup %7191  ;;  %7201 = vrcp.f32 %v4214_v31 }
 0xfbd   : > { %v4239_v34 = vmul.f32 %v7192_v12, %v9006_v28  ;;  %6557 = vmatprep.mubr.msk.bf16.mxu0 %vm1431_vm11, %v4248_v32  ;;  %v4217_v35 = vpop.xlane.xlu1 %4216 }
 0xfbe   : > { %v7194_v45 = vpop.eup %7193  ;;  %7203 = vrcp.f32 %v4217_v35 }
 0xfbf   : > { %v4249_v62 = vpack.c.bf16 %v4239_v34, %v4238_v27  ;;  %v4220_v14 = vpop.xlane.xlu0 %4219  ;;  %v4240_v4 = vmul.f32 %v7194_v45, %v9011_v60 }
 0xfc0   : > { %v7196_v53 = vpop.eup %7195  ;;  %7205 = vrcp.f32 %v4220_v14 }
 0xfc1   : > { %6558 = vmatmul.mubr.msk.bf16.vlgmr.msra.gmra.mrb[100].mxu0 %vm1431_vm11, %v4249_v62  ;;  %v4223_v54 = vpop.xlane.xlu1 %4222  ;;  %v4241_v0 = vmul.f32 %v7196_v53, %v9016_v25 }
 0xfc2   : > { %v7198_v39 = vpop.eup %7197  ;;  %7207 = vrcp.f32 %v4223_v54 }
 0xfc3   : > { %v4250_v5 = vpack.c.bf16 %v4241_v0, %v4240_v4  ;;  %v4242_v18 = vmul.f32 %v7198_v39, %v9020_v1 }
 0xfc4   : > { %v7200_v28 = vpop.eup %7199 }
 0xfc5   : > { %6561 = vmatprep.mubr.msk.bf16.mxu0 %vm1431_vm11, %v4250_v5  ;;  %v4243_v7 = vmul.f32 %v7200_v28, %v9024_v33  ;;  %v6787_v33 = vld [vmem:[%s9572_s9 + $0x50] sm:$0xff]  }
 0xfc6   : > { %v7202_v20 = vpop.eup %7201  ;;  %6574 = vmatpush3.bf16.msra.mxu1 %v6787_v33 }
 0xfc7   : > { %v4251_v19 = vpack.c.bf16 %v4243_v7, %v4242_v18  ;;  %v4244_v50 = vmul.f32 %v7202_v20, %v9028_v24  ;;  %v6788_v24 = vld [vmem:[%s9572_s9 + $0x58] sm:$0xff]   ;;  %6575 = vmatprep.subr.bf16.mxu1 %v9596_v13 }
 0xfc8   : > { %v7204_v16 = vpop.eup %7203 }
 0xfc9   : > { %6562 = vmatmul.mubr.msk.bf16.gmra.mrb[104].mxu0 %vm1431_vm11, %v4251_v19  ;;  %v4245_v60 = vmul.f32 %v7204_v16, %v9032_v38  ;;  %v6789_v38 = vld [vmem:[%s9572_s9 + $0x60] sm:$0xff]  }
 0xfca   : > { %v7206_v25 = vpop.eup %7205  ;;  %6576 = vmatpush3.bf16.msra.mxu1 %v6788_v24 }
 0xfcb   : > { %v4252_v22 = vpack.c.bf16 %v4245_v60, %v4244_v50  ;;  %v4246_v36 = vmul.f32 %v7206_v25, %v9036_v37  ;;  %6577 = vmatprep.subr.bf16.mxu1 %v9596_v13  ;;  %v6790_v37 = vld [vmem:[%s9572_s9 + $0x68] sm:$0xff]  }
 0xfcc   : > { %v7208_v51 = vpop.eup %7207 }
 0xfcd   : > { %6565 = vmatprep.mubr.msk.bf16.mxu0 %vm1431_vm11, %v4252_v22  ;;  %v4247_v1 = vmul.f32 %v7208_v51, %v9040_v43  ;;  %v6791_v43 = vld [vmem:[%s9572_s9 + $0x70] sm:$0xff]  }
 0xfce   : > { %6578 = vmatpush3.bf16.msra.mxu1 %v6789_v38 }
 0xfcf   : > { %v4253_v40 = vpack.c.bf16 %v4247_v1, %v4246_v36  ;;  %6579 = vmatprep.subr.bf16.mxu1 %v9596_v13 }
 0xfd1   : > { %6566 = vmatmul.mubr.msk.bf16.gmra.mrb[108].mxu0 %vm1431_vm11, %v4253_v40 }
 0xfd2   : > { %4863 = vmatprep.mubr.bf16.mxu0 %v7330_v52  ;;  %6580 = vmatpush3.bf16.msra.mxu1 %v6790_v37 }
 0xfd3   : > { %6581 = vmatprep.subr.bf16.mxu1 %v9596_v13 }
 0xfd6   : > { %6582 = vmatpush3.bf16.msra.mxu1 %v6791_v43 }
 0xfd7   : > { %6583 = vmatprep.subr.bf16.mxu1 %v9596_v13 }
 0xfda   : > { %6584 = vmatpush3.bf16.msra.mxu1 %v6792_v2 }
0x1079   : > { %v6527_v59 = vpop.f32.mrb[88].mxu0 }
0x107a   : > { %v3935_v15 = vpop.f32.mrb[89].mxu0  ;;  %v3984_v27 = vmul.f32 %v6527_v59, %v7701_v58 }
0x107b   : > { %v3982_v10 = vmul.f32 %v3935_v15, %v7701_v58  ;;  %v6528_v9 = vpop.f32.mrb[90].mxu0 }
0x107c   : > { %v3985_v29 = vmul.f32 %v6528_v9, %v7728_v8  ;;  %v3938_v46 = vpop.f32.mrb[91].mxu0 }
0x107d   : > { %v3983_v3 = vmul.f32 %v3938_v46, %v7701_v58 }
0x107e   : > { %v3994_v42 = vadd.f32 %v3985_v29, %v3982_v10 }
0x1081   : > { %v6531_v55 = vpop.f32.mrb[92].mxu0 }
0x1082   : > { %v3988_v61 = vmul.f32 %v6531_v55, %v7707_v63  ;;  %v3951_v41 = vpop.f32.mrb[93].mxu0 }
0x1083   : > { %v3986_v11 = vmul.f32 %v3951_v41, %v7728_v8  ;;  %v6532_v49 = vpop.f32.mrb[94].mxu0 }
0x1084   : > { %v3997_v31 = vadd.f32 %v3994_v42, %v3988_v61  ;;  %v3989_v32 = vmul.f32 %v6532_v49, %v7707_v63  ;;  %v3954_v12 = vpop.f32.mrb[95].mxu0 }
0x1085   : > { %v3995_v34 = vadd.f32 %v3986_v11, %v3983_v3  ;;  %v3987_v35 = vmul.f32 %v3954_v12, %v7728_v8 }
0x1087   : > { %v3998_v45 = vadd.f32 %v3995_v34, %v3989_v32  ;;  %v3996_v62 = vadd.f32 %v3987_v35, %v3984_v27 }
0x1089   : > { %v6535_v14 = vpop.f32.mrb[96].mxu0 }
0x108a   : > { %v3992_v53 = vmul.f32 %v6535_v14, %v7731_v23  ;;  %v3967_v54 = vpop.f32.mrb[97].mxu0 }
0x108b   : > { %v3990_v4 = vmul.f32 %v3967_v54, %v7707_v63  ;;  %v6536_v0 = vpop.f32.mrb[98].mxu0 }
0x108c   : > { %v4001_v39 = vadd.f32 %v3998_v45, %v3992_v53  ;;  %v3993_v5 = vmul.f32 %v6536_v0, %v7731_v23  ;;  %v3970_v28 = vpop.f32.mrb[99].mxu0 }
0x108d   : > { %v3999_v18 = vadd.f32 %v3996_v62, %v3990_v4  ;;  %v3991_v7 = vmul.f32 %v3970_v28, %v7731_v23 }
0x108f   : > { %v4002_v20 = vadd.f32 %v3999_v18, %v3993_v5  ;;  %v4000_v19 = vadd.f32 %v3997_v31, %v3991_v7 }
0x1091   : > { %v4379_v16 = vpack.c.bf16 %v4001_v39, %v4000_v19 }
0x1093   : > { %6586 = vmatmul.mubr.bf16.vlgmr.msra.gmra.mrb[104].mxu1 %v4379_v16 }
0x1094   : > { %6589 = vmatprep.mubr.msk.bf16.mxu1 %vm7331_vm0, %v9596_v13  ;;  %v6559_v50 = vpop.f32.mrb[100].mxu0 }
0x1095   : > { %v4311_v60 = vpop.f32.mrb[101].mxu0  ;;  %v4360_v10 = vmul.f32 %v6559_v50, %v7701_v58 }
0x1096   : > { %v4358_v25 = vmul.f32 %v4311_v60, %v7701_v58  ;;  %v6560_v22 = vpop.f32.mrb[102].mxu0 }
0x1097   : > { %v4361_v51 = vmul.f32 %v6560_v22, %v7728_v8  ;;  %v4314_v36 = vpop.f32.mrb[103].mxu0  ;;  %v6793_v22 = vld [vmem:[%s9576_s13 + $0x100] ss:$16 sps:$4 sm:$0xff]  }
0x1098   : > { %v4359_v38 = vmul.f32 %v4314_v36, %v7701_v58  ;;  %v6801_v36 = vld [vmem:[%s9576_s13 + $0x124] ss:$16 sps:$4 sm:$0xff]  }
0x1099   : > { %v4370_v1 = vadd.f32 %v4361_v51, %v4358_v25  ;;  %v6798_v51 = vld [vmem:[%s9576_s13 + $0x10c] ss:$16 sps:$4 sm:$0xff]  }
0x109a   : > { %4894 = vmatprep.subr.bf16.mxu1 %v6798_v51 }
0x109c   : > { %v6563_v40 = vpop.f32.mrb[104].mxu0 }
0x109d   : > { %v4364_v33 = vmul.f32 %v6563_v40, %v7707_v63  ;;  %v4327_v24 = vpop.f32.mrb[105].mxu0  ;;  %v6799_v40 = vld [vmem:[%s9576_s13 + $0x120] ss:$16 sps:$4 sm:$0xff]  }
0x109e   : > { %v4362_v37 = vmul.f32 %v4327_v24, %v7728_v8  ;;  %v6564_v43 = vpop.f32.mrb[106].mxu0 }
0x109f   : > { %v4373_v2 = vadd.f32 %v4370_v1, %v4364_v33  ;;  %v4365_v59 = vmul.f32 %v6564_v43, %v7707_v63  ;;  %v4330_v15 = vpop.f32.mrb[107].mxu0  ;;  %v6804_v1 = vld [vmem:[%s9576_s13 + $0x12c] ss:$16 sps:$4 sm:$0xff]   ;;  %v6802_v33 = vld [vmem:[%s9576_s13 + $0x128] ss:$16 sps:$4 sm:$0xff]  }
0x10a0   : > { %v4371_v9 = vadd.f32 %v4362_v37, %v4359_v38  ;;  %v4363_v29 = vmul.f32 %v4330_v15, %v7728_v8 }
0x10a2   : > { %v4374_v46 = vadd.f32 %v4371_v9, %v4365_v59  ;;  %v4372_v42 = vadd.f32 %v4363_v29, %v4360_v10 }
0x10a4   : > { %v6567_v55 = vpop.f32.mrb[108].mxu0 }
0x10a5   : > { %v4368_v61 = vmul.f32 %v6567_v55, %v7731_v23  ;;  %v4343_v41 = vpop.f32.mrb[109].mxu0 }
0x10a6   : > { %v4366_v3 = vmul.f32 %v4343_v41, %v7707_v63  ;;  %v6568_v11 = vpop.f32.mrb[110].mxu0  ;;  %v5876_v63 = vld [vmem:[%s9573_s10 + $0x1] ss:$0 sm:$0xff] }
0x10a7   : > { %v4377_v49 = vadd.f32 %v4374_v46, %v4368_v61  ;;  %v4369_v31 = vmul.f32 %v6568_v11, %v7731_v23  ;;  %v4346_v32 = vpop.f32.mrb[111].mxu0  ;;  %v6807_v11 = vld [vmem:[%s9576_s13 + $0x144] ss:$16 sps:$4 sm:$0xff]  }
0x10a8   : > { %v4375_v12 = vadd.f32 %v4372_v42, %v4366_v3  ;;  %v4367_v27 = vmul.f32 %v4346_v32, %v7731_v23  ;;  %v6808_v32 = vld [vmem:[%s9576_s13 + $0x148] ss:$16 sps:$4 sm:$0xff]  }
0x10aa   : > { %v4378_v58 = vadd.f32 %v4375_v12, %v4369_v31  ;;  %v4376_v34 = vadd.f32 %v4373_v2, %v4367_v27  ;;  %v6805_v31 = vld [vmem:[%s9576_s13 + $0x140] ss:$16 sps:$4 sm:$0xff]  }
0x10ac   : > { %v4380_v35 = vpack.c.bf16 %v4376_v34, %v4002_v20  ;;  %v4381_v8 = vpack.c.bf16 %v4378_v58, %v4377_v49  ;;  %v6810_v49 = vld [vmem:[%s9576_s13 + $0x14c] ss:$16 sps:$4 sm:$0xff]   ;;  %v6813_v58 = vld [vmem:[%s9576_s13 + $0x164] ss:$16 sps:$4 sm:$0xff]  }
0x10ad   : > { %v6816_v34 = vld [vmem:[%s9576_s13 + $0x16c] ss:$16 sps:$4 sm:$0xff]  }
0x10ae   : > { %6590 = vmatmul.mubr.bf16.gmra.mrb[108].mxu1 %v4380_v35  ;;  %v6819_v35 = vld [vmem:[%s9576_s13 + $0x184] ss:$16 sps:$4 sm:$0xff]  }
0x10af   : > { %6593 = vmatprep.mubr.msk.bf16.mxu1 %vm7331_vm0, %v9596_v13 }
0x10b6   : > { %6594 = vmatmul.mubr.bf16.gmra.mrb[112].mxu1 %v4381_v8  ;;  %v6822_v8 = vld [vmem:[%s9576_s13 + $0x18c] ss:$16 sps:$4 sm:$0xff]  }
0x10b7   : > { %4926 = vmatprep.mubr.bf16.mxu1 %v7330_v52 }
0x1166   : > { %v4489_v45 = vpop.f32.mrb[104].mxu1 }
0x1167   : > { %v4490_v62 = vadd.f32 %v5876_v63, %v4489_v45  ;;  %v6587_v14 = vpop.f32.mrb[105].mxu1  ;;  %v6820_v45 = vld [vmem:[%s9576_s13 + $0x188] ss:$16 sps:$4 sm:$0xff]  }
0x1168   : > { %v4492_v53 = vpop.f32.mrb[106].mxu1  ;;  %v6828_v14 = vld [vmem:[%s9576_s13 + $0x1ac] ss:$16 sps:$4 sm:$0xff]  }
0x1169   : > { %v9150_v23 = vadd.f32 %v4490_v62, %v8566_v6  ;;  %v4493_v54 = vadd.f32 %v5876_v63, %v4492_v53  ;;  %v6588_v4 = vpop.f32.mrb[107].mxu1  ;;  %v6825_v62 = vld [vmem:[%s9576_s13 + $0x1a4] ss:$16 sps:$4 sm:$0xff]   ;;  %v6823_v53 = vld [vmem:[%s9576_s13 + $0x1a0] ss:$16 sps:$4 sm:$0xff]  }
0x116a   : > { %v6831_v4 = vld [vmem:[%s9576_s13 + $0x1c4] ss:$16 sps:$4 sm:$0xff]  }
0x116b   : > { %v4513_v0 = vadd.f32 %v4493_v54, %v8570_v56  ;;  %4522 = vadd.xlane.f32.xlu0 %v9150_v23  ;;  %v6826_v54 = vld [vmem:[%s9576_s13 + $0x1a8] ss:$16 sps:$4 sm:$0xff]  }
0x116d   : > { %4524 = vadd.xlane.f32.xlu1 %v4513_v0 }
0x1181   : > { %v4497_v13 = vpop.f32.mrb[108].mxu1 }
0x1182   : > { %v4498_v39 = vadd.f32 %v5876_v63, %v4497_v13  ;;  %v6591_v5 = vpop.f32.mrb[109].mxu1  ;;  %v6829_v13 = vld [vmem:[%s9576_s13 + $0x1c0] ss:$16 sps:$4 sm:$0xff]  }
0x1183   : > { %v4500_v28 = vpop.f32.mrb[110].mxu1  ;;  %v6837_v5 = vld [vmem:[%s9576_s13 + $0x1e4] ss:$16 sps:$4 sm:$0xff]  }
0x1184   : > { %v4514_v18 = vadd.f32 %v4498_v39, %v8574_v21  ;;  %v4501_v7 = vadd.f32 %v5876_v63, %v4500_v28  ;;  %v6592_v20 = vpop.f32.mrb[111].mxu1  ;;  %v6795_v21 = vld [vmem:[%s9576_s13 + $0x104] ss:$16 sps:$4 sm:$0xff]   ;;  %v6832_v39 = vld [vmem:[%s9576_s13 + $0x1c8] ss:$16 sps:$4 sm:$0xff]  }
0x1185   : > { %4831 = vmatprep.subr.bf16.mxu0 %v6795_v21  ;;  %v6840_v28 = vld [vmem:[%s9576_s13 + $0x1ec] ss:$16 sps:$4 sm:$0xff]  }
0x1186   : > { %v9156_v19 = vadd.f32 %v4501_v7, %v8578_v17  ;;  %4526 = vadd.xlane.f32.xlu0 %v4514_v18  ;;  %v6796_v17 = vld [vmem:[%s9576_s13 + $0x108] ss:$16 sps:$4 sm:$0xff]   ;;  %4832 = vmatpush1.bf16.msra.mxu0 %v6793_v22  ;;  %v9284_v22 = vld [vmem:[%s9574_s11 + $0x1] ss:$0 sm:$0xff] }
0x1187   : > { %4895 = vmatpush1.bf16.msra.mxu1 %v6796_v17  ;;  %4833 = vmatprep.subr.bf16.mxu0 %v6801_v36  ;;  %v6838_v7 = vld [vmem:[%s9576_s13 + $0x1e8] ss:$16 sps:$4 sm:$0xff]  }
0x1188   : > { %4528 = vadd.xlane.f32.xlu1 %v9156_v19  ;;  %4896 = vmatprep.subr.bf16.mxu1 %v6804_v1  ;;  %v9292_v1 = vld [vmem:[%s9575_s12 + $0x1] ss:$0 sm:$0xff] }
0x1189   : > { %v4505_v6 = vpop.f32.mrb[112].mxu1 }
0x118a   : > { %v4506_v16 = vadd.f32 %v5876_v63, %v4505_v6  ;;  %v6595_v56 = vpop.f32.mrb[113].mxu1  ;;  %4834 = vmatpush1.bf16.msra.mxu0 %v6799_v40 }
0x118b   : > { %v4508_v50 = vpop.f32.mrb[114].mxu1  ;;  %4897 = vmatpush1.bf16.msra.mxu1 %v6802_v33  ;;  %4835 = vmatprep.subr.bf16.mxu0 %v6807_v11 }
0x118c   : > { %v4509_v60 = vadd.f32 %v5876_v63, %v4508_v50  ;;  %v6596_v25 = vpop.f32.mrb[115].mxu1  ;;  %v9214_v12 = vadd.f32 %v4506_v16, %v8582_v44  ;;  %4898 = vmatprep.subr.bf16.mxu1 %v6810_v49  ;;  %v6811_v44 = vld [vmem:[%s9576_s13 + $0x160] ss:$16 sps:$4 sm:$0xff]  }
0x118d   : > { %v6817_v63 = vld [vmem:[%s9576_s13 + $0x180] ss:$16 sps:$4 sm:$0xff]  }
0x118e   : > { %4836 = vmatpush1.bf16.msra.mxu0 %v6805_v31  ;;  %v9217_v27 = vadd.f32 %v4509_v60, %v8586_v57  ;;  %v6814_v57 = vld [vmem:[%s9576_s13 + $0x168] ss:$16 sps:$4 sm:$0xff]  }
0x118f   : > { %4899 = vmatpush1.bf16.msra.mxu1 %v6808_v32  ;;  %4837 = vmatprep.subr.bf16.mxu0 %v6813_v58 }
0x1190   : > { %4900 = vmatprep.subr.bf16.mxu1 %v6816_v34 }
0x1192   : > { %4838 = vmatpush1.bf16.msra.mxu0 %v6811_v44 }
0x1193   : > { %4901 = vmatpush1.bf16.msra.mxu1 %v6814_v57  ;;  %4839 = vmatprep.subr.bf16.mxu0 %v6819_v35 }
0x1194   : > { %4902 = vmatprep.subr.bf16.mxu1 %v6822_v8  ;;  %v6843_v8 = vld [vmem:[%s9578_s15 + $0x100] sm:$0xff]  }
0x1196   : > { %4840 = vmatpush1.bf16.msra.mxu0 %v6817_v63  ;;  %v6844_v63 = vld [vmem:[%s9578_s15 + $0x180] sm:$0xff]  }
0x1197   : > { %4903 = vmatpush1.bf16.msra.mxu1 %v6820_v45  ;;  %4841 = vmatprep.subr.bf16.mxu0 %v6825_v62  ;;  %v6846_v45 = vld [vmem:[%s9578_s15 + $0x1c8] sm:$0xff]  }
0x1198   : > { %4904 = vmatprep.subr.bf16.mxu1 %v6828_v14  ;;  %v6847_v62 = vld [vmem:[%s9578_s15 + $0x108] sm:$0xff]  }
0x1199   : > { %v6848_v14 = vld [vmem:[%s9578_s15 + $0x188] sm:$0xff]  }
0x119a   : > { %4842 = vmatpush1.bf16.msra.mxu0 %v6823_v53  ;;  %v6849_v53 = vld [vmem:[%s9578_s15 + $0x150] sm:$0xff]  }
0x119b   : > { %4905 = vmatpush1.bf16.msra.mxu1 %v6826_v54  ;;  %4843 = vmatprep.subr.bf16.mxu0 %v6831_v4  ;;  %v6850_v54 = vld [vmem:[%s9578_s15 + $0x1d0] sm:$0xff]  }
0x119c   : > { %v6851_v4 = vld [vmem:[%s9578_s15 + $0x110] sm:$0xff]  }
0x119e   : > { %4844 = vmatpush1.bf16.msra.mxu0 %v6829_v13  ;;  %v6853_v13 = vld [vmem:[%s9578_s15 + $0x158] sm:$0xff]  }
0x119f   : > { %4845 = vmatprep.subr.bf16.mxu0 %v6837_v5  ;;  %v6855_v5 = vld [vmem:[%s9578_s15 + $0x118] sm:$0xff]  }
0x11f8   : > { %v4523_v24 = vpop.xlane.xlu0 %4522 }
0x11f9   : > { %v4534_v38 = vmul.f32 0.0078125, %v4523_v24 }
0x11fa   : > { %v4525_v37 = vpop.xlane.xlu1 %4524 }
0x11fb   : > { %v9184_v43 = vsub.f32 %v9150_v23, %v4534_v38  ;;  %v4535_v2 = vmul.f32 0.0078125, %v4525_v37 }
0x11fd   : > { %v9186_v59 = vsub.f32 %v4513_v0, %v4535_v2  ;;  %v4546_v15 = vmul.f32 %v9184_v43, %v9184_v43  ;;  %v6834_v0 = vld [vmem:[%s9576_s13 + $0x1cc] ss:$16 sps:$4 sm:$0xff]  }
0x11fe   : > { %4906 = vmatprep.subr.bf16.mxu1 %v6834_v0  ;;  %v6852_v0 = vld [vmem:[%s9578_s15 + $0x190] sm:$0xff]  }
0x11ff   : > { %4552 = vadd.xlane.f32.xlu0 %v4546_v15  ;;  %v4547_v10 = vmul.f32 %v9186_v59, %v9186_v59  ;;  %4907 = vmatpush1.bf16.msra.mxu1 %v6832_v39  ;;  %v6854_v39 = vld [vmem:[%s9578_s15 + $0x1d8] sm:$0xff]  }
0x1200   : > { %4908 = vmatprep.subr.bf16.mxu1 %v6840_v28  ;;  %v6856_v28 = vld [vmem:[%s9578_s15 + $0x198] sm:$0xff]  }
0x1201   : > { %4554 = vadd.xlane.f32.xlu1 %v4547_v10 }
0x1203   : > { %4909 = vmatpush1.bf16.msra.mxu1 %v6838_v7  ;;  %v6858_v7 = vld [vmem:[%s9578_s15 + $0x1e0] sm:$0xff]  }
0x1213   : > { %v4527_v9 = vpop.xlane.xlu0 %4526 }
0x1214   : > { %v4536_v29 = vmul.f32 0.0078125, %v4527_v9 }
0x1215   : > { %v4529_v46 = vpop.xlane.xlu1 %4528 }
0x1216   : > { %v9192_v42 = vsub.f32 %v4514_v18, %v4536_v29  ;;  %v4537_v55 = vmul.f32 0.0078125, %v4529_v46  ;;  %v6835_v18 = vld [vmem:[%s9576_s13 + $0x1e0] ss:$16 sps:$4 sm:$0xff]  }
0x1217   : > { %4846 = vmatpush1.bf16.msra.mxu0 %v6835_v18  ;;  %v6857_v18 = vld [vmem:[%s9578_s15 + $0x160] sm:$0xff]  }
0x1218   : > { %v9195_v61 = vsub.f32 %v9156_v19, %v4537_v55  ;;  %v4548_v41 = vmul.f32 %v9192_v42, %v9192_v42 }
0x121a   : > { %4556 = vadd.xlane.f32.xlu0 %v4548_v41  ;;  %v4549_v3 = vmul.f32 %v9195_v61, %v9195_v61 }
0x121c   : > { %4558 = vadd.xlane.f32.xlu1 %v4549_v3 }
0x121e   : > { %4530 = vadd.xlane.f32.xlu0 %v9214_v12 }
0x1220   : > { %4532 = vadd.xlane.f32.xlu1 %v9217_v27 }
0x128c   : > { %v4553_v20 = vpop.xlane.xlu0 %4552 }
0x128d   : > { %v4564_v6 = vmul.f32 0.0078125, %v4553_v20  ;;  %v6859_v20 = vld [vmem:[%s9578_s15 + $0x120] sm:$0xff]  }
0x128e   : > { %v4555_v16 = vpop.xlane.xlu1 %4554 }
0x128f   : > { %v4570_v56 = vadd.f32 1e-05, %v4564_v6  ;;  %v4565_v50 = vmul.f32 0.0078125, %v4555_v16  ;;  %v6860_v6 = vld [vmem:[%s9578_s15 + $0x1a0] sm:$0xff]   ;;  %v6861_v16 = vld [vmem:[%s9578_s15 + $0x168] sm:$0xff]  }
0x1291   : > { %7209 = vrsqrt.f32 %v4570_v56  ;;  %v4571_v60 = vadd.f32 1e-05, %v4565_v50  ;;  %v6862_v56 = vld [vmem:[%s9578_s15 + $0x1e8] sm:$0xff]  }
0x1292   : > { %v6863_v50 = vld [vmem:[%s9578_s15 + $0x128] sm:$0xff]  }
0x1293   : > { %7211 = vrsqrt.f32 %v4571_v60  ;;  %v6864_v60 = vld [vmem:[%s9578_s15 + $0x1a8] sm:$0xff]  }
0x129b   : > { %v7210_v25 = vpop.eup %7209 }
0x129c   : > { %v4582_v21 = vmul.f32 %v7210_v25, %v9184_v43  ;;  %v6865_v25 = vld [vmem:[%s9578_s15 + $0x170] sm:$0xff]  }
0x129d   : > { %v7212_v17 = vpop.eup %7211 }
0x129e   : > { %v4594_v51 = vmul.f32 %v9284_v22, %v4582_v21  ;;  %v4583_v36 = vmul.f32 %v7212_v17, %v9186_v59  ;;  %v6866_v21 = vld [vmem:[%s9578_s15 + $0x1f0] sm:$0xff]  }
0x129f   : > { %v6867_v17 = vld [vmem:[%s9578_s15 + $0x130] sm:$0xff]  }
0x12a0   : > { %v4595_v40 = vmul.f32 %v9284_v22, %v4583_v36  ;;  %v4606_v33 = vadd.f32 %v9292_v1, %v4594_v51  ;;  %v6868_v51 = vld [vmem:[%s9578_s15 + $0x1b0] sm:$0xff]   ;;  %v6869_v36 = vld [vmem:[%s9578_s15 + $0x178] sm:$0xff]  }
0x12a2   : > { %v4607_v24 = vadd.f32 %v9292_v1, %v4595_v40  ;;  %v6870_v40 = vld [vmem:[%s9578_s15 + $0x1f8] sm:$0xff]  }
0x12a4   : > { %v4612_v38 = vpack.c.bf16 %v4607_v24, %v4606_v33  ;;  %v6871_v33 = vld [vmem:[%s9578_s15 + $0x138] sm:$0xff]  }
0x12a5   : > { %v6872_v24 = vld [vmem:[%s9578_s15 + $0x1b8] sm:$0xff]  }
0x12a6   : > { %4864 = vmatmul.mubr.bf16.vlgmr.msra.gmra.mrb[112].mxu0 %v4612_v38  ;;  %4927 = vmatmul.mubr.bf16.vlgmr.msra.gmra.mrb[116].mxu1 %v4612_v38 }
0x12a7   : > { %4873 = vmatprep.mubr.bf16.mxu0 %v7330_v52  ;;  %4936 = vmatprep.mubr.bf16.mxu1 %v7330_v52  ;;  %v4557_v37 = vpop.xlane.xlu0 %4556 }
0x12a8   : > { %v4566_v43 = vmul.f32 0.0078125, %v4557_v37 }
0x12a9   : > { %v4559_v2 = vpop.xlane.xlu1 %4558 }
0x12aa   : > { %v4572_v59 = vadd.f32 1e-05, %v4566_v43  ;;  %v4567_v15 = vmul.f32 0.0078125, %v4559_v2 }
0x12ab   : > { %v4531_v10 = vpop.xlane.xlu0 %4530 }
0x12ac   : > { %7213 = vrsqrt.f32 %v4572_v59  ;;  %v4573_v9 = vadd.f32 1e-05, %v4567_v15  ;;  %v4538_v29 = vmul.f32 0.0078125, %v4531_v10 }
0x12ad   : > { %v4533_v46 = vpop.xlane.xlu1 %4532 }
0x12ae   : > { %7215 = vrsqrt.f32 %v4573_v9  ;;  %v9300_v55 = vsub.f32 %v9214_v12, %v4538_v29  ;;  %v4539_v41 = vmul.f32 0.0078125, %v4533_v46 }
0x12b0   : > { %v9303_v3 = vsub.f32 %v9217_v27, %v4539_v41  ;;  %v4550_v11 = vmul.f32 %v9300_v55, %v9300_v55 }
0x12b2   : > { %4560 = vadd.xlane.f32.xlu0 %v4550_v11  ;;  %v4551_v49 = vmul.f32 %v9303_v3, %v9303_v3 }
0x12b4   : > { %4562 = vadd.xlane.f32.xlu1 %v4551_v49 }
0x12b6   : > { %v7214_v31 = vpop.eup %7213 }
0x12b7   : > { %v4584_v32 = vmul.f32 %v7214_v31, %v9192_v42  ;;  %v6841_v42 = vld [vmem:[%s9578_s15 + $0x140] sm:$0xff]  }
0x12b8   : > { %v7216_v58 = vpop.eup %7215  ;;  %6289 = vmatprep.subr.bf16.mxu0 %v6841_v42 }
0x12b9   : > { %v4585_v34 = vmul.f32 %v7216_v58, %v9195_v61  ;;  %v4596_v12 = vmul.f32 %v9284_v22, %v4584_v32  ;;  %v6842_v61 = vld [vmem:[%s9578_s15 + $0x1c0] sm:$0xff]   ;;  %6290 = vmatpush3.bf16.msra.mxu0 %v6843_v8 }
0x12ba   : > { %6323 = vmatprep.subr.bf16.mxu1 %v6842_v61  ;;  %v5921_v58 = vld [vmem:[%s9577_s14 + $0x4] sm:$0xf] }
0x12bb   : > { %v4597_v44 = vmul.f32 %v9284_v22, %v4585_v34  ;;  %v4608_v27 = vadd.f32 %v9292_v1, %v4596_v12  ;;  %6324 = vmatpush3.bf16.msra.mxu1 %v6844_v63  ;;  %v9429_v34 = vrot.slane %v5921_v58, %v7688_v48 }
0x12bc   : > { %6325 = vmatprep.subr.bf16.mxu1 %v6846_v45 }
0x12bd   : > { %v4609_v57 = vadd.f32 %v9292_v1, %v4597_v44 }
0x12bf   : > { %v4613_v35 = vpack.c.bf16 %v4609_v57, %v4608_v27  ;;  %6326 = vmatpush3.bf16.msra.mxu1 %v6848_v14 }
0x12c0   : > { %6327 = vmatprep.subr.bf16.mxu1 %v6850_v54 }
0x12c1   : > { %4874 = vmatmul.mubr.bf16.gmra.mrb[116].mxu0 %v4613_v35  ;;  %4937 = vmatmul.mubr.bf16.gmra.mrb[120].mxu1 %v4613_v35 }
0x12c2   : > { %4883 = vmatprep.mubr.bf16.mxu0 %v7330_v52  ;;  %4946 = vmatprep.mubr.bf16.mxu1 %v7330_v52  ;;  %v6845_v52 = vld [vmem:[%s9578_s15 + $0x148] sm:$0xff]  }
0x12c3   : > { %6291 = vmatprep.subr.bf16.mxu0 %v6845_v52  ;;  %6328 = vmatpush3.bf16.msra.mxu1 %v6852_v0 }
0x12c4   : > { %6292 = vmatpush3.bf16.msra.mxu0 %v6847_v62  ;;  %6329 = vmatprep.subr.bf16.mxu1 %v6854_v39 }
0x12c5   : > { %6293 = vmatprep.subr.bf16.mxu0 %v6849_v53 }
0x12c7   : > { %6330 = vmatpush3.bf16.msra.mxu1 %v6856_v28 }
0x12c8   : > { %6294 = vmatpush3.bf16.msra.mxu0 %v6851_v4  ;;  %6331 = vmatprep.subr.bf16.mxu1 %v6858_v7 }
0x12c9   : > { %6295 = vmatprep.subr.bf16.mxu0 %v6853_v13 }
0x12cb   : > { %6332 = vmatpush3.bf16.msra.mxu1 %v6860_v6 }
0x12cc   : > { %6296 = vmatpush3.bf16.msra.mxu0 %v6855_v5  ;;  %6333 = vmatprep.subr.bf16.mxu1 %v6862_v56 }
0x12cd   : > { %6297 = vmatprep.subr.bf16.mxu0 %v6857_v18 }
0x12cf   : > { %6334 = vmatpush3.bf16.msra.mxu1 %v6864_v60 }
0x12d0   : > { %6298 = vmatpush3.bf16.msra.mxu0 %v6859_v20  ;;  %6335 = vmatprep.subr.bf16.mxu1 %v6866_v21 }
0x12d1   : > { %6299 = vmatprep.subr.bf16.mxu0 %v6861_v16 }
0x12d3   : > { %6336 = vmatpush3.bf16.msra.mxu1 %v6868_v51 }
0x12d4   : > { %6300 = vmatpush3.bf16.msra.mxu0 %v6863_v50  ;;  %6337 = vmatprep.subr.bf16.mxu1 %v6870_v40 }
0x12d5   : > { %6301 = vmatprep.subr.bf16.mxu0 %v6865_v25 }
0x12d7   : > { %6338 = vmatpush3.bf16.msra.mxu1 %v6872_v24 }
0x12d8   : > { %6302 = vmatpush3.bf16.msra.mxu0 %v6867_v17 }
0x12d9   : > { %6303 = vmatprep.subr.bf16.mxu0 %v6869_v36 }
0x12dc   : > { %6304 = vmatpush3.bf16.msra.mxu0 %v6871_v33 }
0x133f   : > { %v4561_v38 = vpop.xlane.xlu0 %4560 }
0x1340   : > { %v4568_v37 = vmul.f32 0.0078125, %v4561_v38 }
0x1341   : > { %v4563_v43 = vpop.xlane.xlu1 %4562 }
0x1342   : > { %v4574_v2 = vadd.f32 1e-05, %v4568_v37  ;;  %v4569_v59 = vmul.f32 0.0078125, %v4563_v43 }
0x1344   : > { %7217 = vrsqrt.f32 %v4574_v2  ;;  %v4575_v15 = vadd.f32 1e-05, %v4569_v59 }
0x1346   : > { %7219 = vrsqrt.f32 %v4575_v15 }
0x134e   : > { %v7218_v10 = vpop.eup %7217 }
0x134f   : > { %v4586_v9 = vmul.f32 %v7218_v10, %v9300_v55  ;;  %v9423_v55 = vrot.slane %v5921_v58, %v7677_v30 }
0x1350   : > { %v7220_v29 = vpop.eup %7219 }
0x1351   : > { %v4587_v46 = vmul.f32 %v7220_v29, %v9303_v3  ;;  %v4598_v41 = vmul.f32 %v9284_v22, %v4586_v9  ;;  %v9426_v3 = vrot.slane %v5921_v58, %v7683_v47 }
0x1353   : > { %v4599_v11 = vmul.f32 %v9284_v22, %v4587_v46  ;;  %v4610_v49 = vadd.f32 %v9292_v1, %v4598_v41  ;;  %v9597_v22 = vsub.s32 3, %v7672_v26 }
0x1355   : > { %v4611_v31 = vadd.f32 %v9292_v1, %v4599_v11  ;;  %v9433_v12 = vrot.slane %v5921_v58, %v9597_v22 }
0x1357   : > { %v4614_v32 = vpack.c.bf16 %v4611_v31, %v4610_v49 }
0x1359   : > { %4884 = vmatmul.mubr.bf16.gmra.mrb[120].mxu0 %v4614_v32  ;;  %4947 = vmatmul.mubr.bf16.gmra.mrb[124].mxu1 %v4614_v32 }
0x1379   : > { %v4865_v1 = vpop.f32.mrb[112].mxu0  ;;  %v4928_v44 = vpop.f32.mrb[116].mxu1 }
0x137a   : > { %v9436_v27 = vadd.f32 %v4865_v1, %v9423_v55  ;;  %v9439_v57 = vadd.f32 %v4928_v44, %v9426_v3  ;;  %v4867_v30 = vpop.f32.mrb[113].mxu0  ;;  %v4930_v35 = vpop.f32.mrb[117].mxu1 }
0x137b   : > { %v9442_v47 = vadd.f32 %v4867_v30, %v9429_v34  ;;  %v9445_v48 = vadd.f32 %v4930_v35, %v9433_v12  ;;  %v4869_v42 = vpop.f32.mrb[114].mxu0  ;;  %v4932_v26 = vpop.f32.mrb[118].mxu1 }
0x137c   : > { %v5954_v61 = vmul.f32 -1.702, %v9436_v27  ;;  %v5956_v8 = vmul.f32 -1.702, %v9439_v57  ;;  %v9450_v63 = vadd.f32 %v4869_v42, %v9423_v55  ;;  %v9453_v52 = vadd.f32 %v4932_v26, %v9426_v3  ;;  %v4871_v45 = vpop.f32.mrb[115].mxu0  ;;  %v4934_v62 = vpop.f32.mrb[119].mxu1 }
0x137d   : > { %v5955_v14 = vmul.f32 -1.702, %v9442_v47  ;;  %v5957_v53 = vmul.f32 -1.702, %v9445_v48  ;;  %v9458_v54 = vadd.f32 %v4871_v45, %v9429_v34  ;;  %v9461_v4 = vadd.f32 %v4934_v62, %v9433_v12 }
0x137e   : > { %v5005_v0 = vmul.f32 1.442695, %v5954_v61  ;;  %v5009_v13 = vmul.f32 1.442695, %v5956_v8  ;;  %v5958_v39 = vmul.f32 -1.702, %v9450_v63 }
0x137f   : > { %v5007_v5 = vmul.f32 1.442695, %v5955_v14  ;;  %v5011_v28 = vmul.f32 1.442695, %v5957_v53  ;;  %v5960_v18 = vmul.f32 -1.702, %v9453_v52 }
0x1380   : > { %7221 = vpow2.f32 %v5005_v0  ;;  %v5013_v7 = vmul.f32 1.442695, %v5958_v39  ;;  %v5959_v20 = vmul.f32 -1.702, %v9458_v54  ;;  %v5961_v6 = vmul.f32 -1.702, %v9461_v4 }
0x1381   : > { %7223 = vpow2.f32 %v5009_v13  ;;  %v5017_v16 = vmul.f32 1.442695, %v5960_v18 }
0x1382   : > { %7225 = vpow2.f32 %v5007_v5  ;;  %v5015_v56 = vmul.f32 1.442695, %v5959_v20  ;;  %v5019_v50 = vmul.f32 1.442695, %v5961_v6 }
0x1383   : > { %7227 = vpow2.f32 %v5011_v28 }
0x1384   : > { %7229 = vpow2.f32 %v5013_v7 }
0x1385   : > { %7231 = vpow2.f32 %v5017_v16 }
0x1386   : > { %7233 = vpow2.f32 %v5015_v56 }
0x1387   : > { %7235 = vpow2.f32 %v5019_v50 }
0x138a   : > { %v7222_v60 = vpop.eup %7221 }
0x138b   : > { %v7224_v25 = vpop.eup %7223  ;;  %v5053_v21 = vadd.f32 1.0, %v7222_v60 }
0x138c   : > { %v7226_v17 = vpop.eup %7225  ;;  %v5055_v51 = vadd.f32 1.0, %v7224_v25 }
0x138d   : > { %v7228_v36 = vpop.eup %7227  ;;  %7237 = vrcp.f32 %v5053_v21  ;;  %v5054_v40 = vadd.f32 1.0, %v7226_v17 }
0x138e   : > { %v7230_v33 = vpop.eup %7229  ;;  %7239 = vrcp.f32 %v5055_v51  ;;  %v5056_v24 = vadd.f32 1.0, %v7228_v36 }
0x138f   : > { %v7232_v38 = vpop.eup %7231  ;;  %7241 = vrcp.f32 %v5054_v40  ;;  %v5057_v37 = vadd.f32 1.0, %v7230_v33 }
0x1390   : > { %v7234_v43 = vpop.eup %7233  ;;  %7243 = vrcp.f32 %v5056_v24  ;;  %v5059_v2 = vadd.f32 1.0, %v7232_v38 }
0x1391   : > { %v7236_v59 = vpop.eup %7235  ;;  %7245 = vrcp.f32 %v5057_v37  ;;  %v5058_v15 = vadd.f32 1.0, %v7234_v43 }
0x1392   : > { %7247 = vrcp.f32 %v5059_v2  ;;  %v5060_v10 = vadd.f32 1.0, %v7236_v59 }
0x1393   : > { %7249 = vrcp.f32 %v5058_v15 }
0x1394   : > { %7251 = vrcp.f32 %v5060_v10  ;;  %v4875_v9 = vpop.f32.mrb[116].mxu0  ;;  %v4938_v29 = vpop.f32.mrb[120].mxu1 }
0x1395   : > { %v9468_v46 = vadd.f32 %v4875_v9, %v9423_v55  ;;  %v9471_v41 = vadd.f32 %v4938_v29, %v9426_v3  ;;  %v4877_v11 = vpop.f32.mrb[117].mxu0  ;;  %v4940_v49 = vpop.f32.mrb[121].mxu1 }
0x1396   : > { %v9474_v32 = vadd.f32 %v4877_v11, %v9429_v34  ;;  %v9477_v58 = vadd.f32 %v4940_v49, %v9433_v12  ;;  %v4879_v22 = vpop.f32.mrb[118].mxu0  ;;  %v4942_v1 = vpop.f32.mrb[122].mxu1 }
0x1397   : > { %v7238_v31 = vpop.eup %7237  ;;  %v5962_v35 = vmul.f32 -1.702, %v9468_v46  ;;  %v5964_v42 = vmul.f32 -1.702, %v9471_v41  ;;  %v9483_v26 = vadd.f32 %v4879_v22, %v9423_v55  ;;  %v4881_v61 = vpop.f32.mrb[119].mxu0  ;;  %v9489_v0 = vadd.f32 %v4942_v1, %v9426_v3 }
0x1398   : > { %v7240_v44 = vpop.eup %7239  ;;  %v5125_v30 = vmul.f32 %v7238_v31, %v9436_v27  ;;  %v4944_v8 = vpop.f32.mrb[123].mxu1  ;;  %v5963_v14 = vmul.f32 -1.702, %v9474_v32  ;;  %v5965_v53 = vmul.f32 -1.702, %v9477_v58  ;;  %v9497_v60 = vadd.f32 %v4881_v61, %v9429_v34 }
0x1399   : > { %v7242_v45 = vpop.eup %7241  ;;  %v5127_v62 = vmul.f32 %v7240_v44, %v9439_v57  ;;  %v5021_v39 = vmul.f32 1.442695, %v5962_v35  ;;  %v5025_v5 = vmul.f32 1.442695, %v5964_v42  ;;  %v5966_v28 = vmul.f32 -1.702, %v9483_v26 }
0x139a   : > { %v7244_v27 = vpop.eup %7243  ;;  %v5126_v13 = vmul.f32 %v7242_v45, %v9442_v47  ;;  %v5023_v20 = vmul.f32 1.442695, %v5963_v14  ;;  %v5027_v6 = vmul.f32 1.442695, %v5965_v53  ;;  %v5968_v57 = vmul.f32 -1.702, %v9489_v0 }
0x139b   : > { %v7246_v18 = vpop.eup %7245  ;;  %v5128_v7 = vmul.f32 %v7244_v27, %v9445_v48  ;;  %7253 = vpow2.f32 %v5021_v39  ;;  %v5029_v50 = vmul.f32 1.442695, %v5966_v28  ;;  %v4945_v17 = vadd.f32 %v4944_v8, %v9433_v12 }
0x139c   : > { %v7248_v16 = vpop.eup %7247  ;;  %v5129_v56 = vmul.f32 %v7246_v18, %v9450_v63  ;;  %7255 = vpow2.f32 %v5025_v5  ;;  %v5033_v21 = vmul.f32 1.442695, %v5968_v57  ;;  %v5967_v40 = vmul.f32 -1.702, %v9497_v60 }
0x139d   : > { %v7250_v47 = vpop.eup %7249  ;;  %v5131_v25 = vmul.f32 %v7248_v16, %v9453_v52  ;;  %7257 = vpow2.f32 %v5023_v20  ;;  %v5969_v24 = vmul.f32 -1.702, %v4945_v17 }
0x139e   : > { %v7252_v48 = vpop.eup %7251  ;;  %v5149_v51 = vpack.c.bf16 %v5129_v56, %v5125_v30  ;;  %v5130_v36 = vmul.f32 %v7250_v47, %v9458_v54  ;;  %7259 = vpow2.f32 %v5027_v6  ;;  %v5031_v38 = vmul.f32 1.442695, %v5967_v40 }
0x139f   : > { %v5151_v63 = vpack.c.bf16 %v5131_v25, %v5127_v62  ;;  %v5132_v33 = vmul.f32 %v7252_v48, %v9461_v4  ;;  %7261 = vpow2.f32 %v5029_v50  ;;  %v5035_v52 = vmul.f32 1.442695, %v5969_v24 }
0x13a0   : > { %v5150_v37 = vpack.c.bf16 %v5130_v36, %v5126_v13  ;;  %7263 = vpow2.f32 %v5033_v21 }
0x13a1   : > { %v5152_v43 = vpack.c.bf16 %v5132_v33, %v5128_v7  ;;  %7265 = vpow2.f32 %v5031_v38 }
0x13a2   : > { %5458 = vmatprep.mubr.bf16.mxu0 %v5150_v37  ;;  %7267 = vpow2.f32 %v5035_v52 }
0x13a3   : > { %5511 = vmatprep.mubr.bf16.mxu1 %v5152_v43  ;;  %5459 = vmatmul.mubr.bf16.vlgmr.msra.gmra.mrb[124].mxu0 %v5149_v51 }
0x13a4   : > { %5512 = vmatmul.mubr.bf16.vlgmr.msra.gmra.mrb[128].mxu1 %v5151_v63 }
0x13a5   : > { %v7254_v54 = vpop.eup %7253 }
0x13a6   : > { %v7256_v2 = vpop.eup %7255  ;;  %v5061_v59 = vadd.f32 1.0, %v7254_v54 }
0x13a7   : > { %v7258_v15 = vpop.eup %7257  ;;  %v5063_v10 = vadd.f32 1.0, %v7256_v2 }
0x13a8   : > { %v7260_v4 = vpop.eup %7259  ;;  %7269 = vrcp.f32 %v5061_v59  ;;  %v5062_v9 = vadd.f32 1.0, %v7258_v15 }
0x13a9   : > { %v7262_v29 = vpop.eup %7261  ;;  %7271 = vrcp.f32 %v5063_v10  ;;  %v5064_v11 = vadd.f32 1.0, %v7260_v4 }
0x13aa   : > { %v7264_v49 = vpop.eup %7263  ;;  %7273 = vrcp.f32 %v5062_v9  ;;  %v5065_v31 = vadd.f32 1.0, %v7262_v29 }
0x13ab   : > { %v7266_v22 = vpop.eup %7265  ;;  %7275 = vrcp.f32 %v5064_v11  ;;  %v5067_v1 = vadd.f32 1.0, %v7264_v49 }
0x13ac   : > { %v7268_v44 = vpop.eup %7267  ;;  %7277 = vrcp.f32 %v5065_v31  ;;  %v5066_v30 = vadd.f32 1.0, %v7266_v22 }
0x13ad   : > { %7279 = vrcp.f32 %v5067_v1  ;;  %v5068_v35 = vadd.f32 1.0, %v7268_v44 }
0x13ae   : > { %7281 = vrcp.f32 %v5066_v30 }
0x13af   : > { %7283 = vrcp.f32 %v5068_v35 }
0x13b2   : > { %v7270_v42 = vpop.eup %7269 }
0x13b3   : > { %v7272_v61 = vpop.eup %7271  ;;  %v5133_v53 = vmul.f32 %v7270_v42, %v9468_v46 }
0x13b4   : > { %v7274_v8 = vpop.eup %7273  ;;  %v5135_v39 = vmul.f32 %v7272_v61, %v9471_v41 }
0x13b5   : > { %v7276_v45 = vpop.eup %7275  ;;  %v5134_v18 = vmul.f32 %v7274_v8, %v9474_v32 }
0x13b6   : > { %v7278_v62 = vpop.eup %7277  ;;  %v5136_v6 = vmul.f32 %v7276_v45, %v9477_v58 }
0x13b7   : > { %v7280_v14 = vpop.eup %7279  ;;  %v5137_v27 = vmul.f32 %v7278_v62, %v9483_v26 }
0x13b8   : > { %v7282_v13 = vpop.eup %7281  ;;  %v5139_v5 = vmul.f32 %v7280_v14, %v9489_v0 }
0x13b9   : > { %v7284_v28 = vpop.eup %7283  ;;  %v5138_v7 = vmul.f32 %v7282_v13, %v9497_v60  ;;  %v5153_v20 = vpack.c.bf16 %v5137_v27, %v5133_v53 }
0x13ba   : > { %v5140_v57 = vmul.f32 %v7284_v28, %v4945_v17  ;;  %v5155_v16 = vpack.c.bf16 %v5139_v5, %v5135_v39 }
0x13bb   : > { %v5154_v56 = vpack.c.bf16 %v5138_v7, %v5134_v18 }
0x13bc   : > { %v5156_v50 = vpack.c.bf16 %v5140_v57, %v5136_v6 }
0x13bd   : > { %5465 = vmatprep.mubr.bf16.mxu0 %v5154_v56 }
0x13be   : > { %5518 = vmatprep.mubr.bf16.mxu1 %v5156_v50  ;;  %5466 = vmatmul.mubr.bf16.gmra.mrb[128].mxu0 %v5153_v20 }
0x13bf   : > { %5519 = vmatmul.mubr.bf16.gmra.mrb[132].mxu1 %v5155_v16 }
0x142c   : > { %v4885_v46 = vpop.f32.mrb[120].mxu0  ;;  %v4948_v41 = vpop.f32.mrb[124].mxu1 }
0x142d   : > { %v9512_v26 = vadd.f32 %v4885_v46, %v9423_v55  ;;  %v9515_v32 = vadd.f32 %v4948_v41, %v9426_v3  ;;  %v4887_v0 = vpop.f32.mrb[121].mxu0  ;;  %v4950_v60 = vpop.f32.mrb[125].mxu1 }
0x142e   : > { %v9518_v58 = vadd.f32 %v4887_v0, %v9429_v34  ;;  %v9521_v47 = vadd.f32 %v4950_v60, %v9433_v12  ;;  %v4889_v25 = vpop.f32.mrb[122].mxu0  ;;  %v4952_v21 = vpop.f32.mrb[126].mxu1 }
0x142f   : > { %v5970_v17 = vmul.f32 -1.702, %v9512_v26  ;;  %v5972_v48 = vmul.f32 -1.702, %v9515_v32  ;;  %v4890_v51 = vadd.f32 %v4889_v25, %v9423_v55  ;;  %v4953_v36 = vadd.f32 %v4952_v21, %v9426_v3  ;;  %v4891_v40 = vpop.f32.mrb[123].mxu0  ;;  %v4954_v63 = vpop.f32.mrb[127].mxu1 }
0x1430   : > { %v5971_v33 = vmul.f32 -1.702, %v9518_v58  ;;  %v5973_v24 = vmul.f32 -1.702, %v9521_v47  ;;  %v4892_v38 = vadd.f32 %v4891_v40, %v9429_v34  ;;  %v4955_v37 = vadd.f32 %v4954_v63, %v9433_v12 }
0x1431   : > { %v5037_v52 = vmul.f32 1.442695, %v5970_v17  ;;  %v5041_v43 = vmul.f32 1.442695, %v5972_v48  ;;  %v5974_v54 = vmul.f32 -1.702, %v4890_v51 }
0x1432   : > { %v5039_v2 = vmul.f32 1.442695, %v5971_v33  ;;  %v5043_v59 = vmul.f32 1.442695, %v5973_v24  ;;  %v5976_v15 = vmul.f32 -1.702, %v4953_v36 }
0x1433   : > { %7285 = vpow2.f32 %v5037_v52  ;;  %v5045_v55 = vmul.f32 1.442695, %v5974_v54  ;;  %v5975_v10 = vmul.f32 -1.702, %v4892_v38  ;;  %v5977_v3 = vmul.f32 -1.702, %v4955_v37 }
0x1434   : > { %7287 = vpow2.f32 %v5041_v43  ;;  %v5049_v4 = vmul.f32 1.442695, %v5976_v15 }
0x1435   : > { %7289 = vpow2.f32 %v5039_v2  ;;  %v5047_v9 = vmul.f32 1.442695, %v5975_v10  ;;  %v5051_v29 = vmul.f32 1.442695, %v5977_v3 }
0x1436   : > { %7291 = vpow2.f32 %v5043_v59 }
0x1437   : > { %7293 = vpow2.f32 %v5045_v55 }
0x1438   : > { %7295 = vpow2.f32 %v5049_v4 }
0x1439   : > { %7297 = vpow2.f32 %v5047_v9 }
0x143a   : > { %7299 = vpow2.f32 %v5051_v29 }
0x143d   : > { %v7286_v34 = vpop.eup %7285 }
0x143e   : > { %v7288_v12 = vpop.eup %7287  ;;  %v5069_v11 = vadd.f32 1.0, %v7286_v34 }
0x143f   : > { %v7290_v49 = vpop.eup %7289  ;;  %v5071_v31 = vadd.f32 1.0, %v7288_v12 }
0x1440   : > { %v7292_v22 = vpop.eup %7291  ;;  %7301 = vrcp.f32 %v5069_v11  ;;  %v5070_v1 = vadd.f32 1.0, %v7290_v49 }
0x1441   : > { %v7294_v44 = vpop.eup %7293  ;;  %7303 = vrcp.f32 %v5071_v31  ;;  %v5072_v30 = vadd.f32 1.0, %v7292_v22 }
0x1442   : > { %v7296_v35 = vpop.eup %7295  ;;  %7305 = vrcp.f32 %v5070_v1  ;;  %v5073_v42 = vadd.f32 1.0, %v7294_v44 }
0x1443   : > { %v7298_v61 = vpop.eup %7297  ;;  %7307 = vrcp.f32 %v5072_v30  ;;  %v5075_v8 = vadd.f32 1.0, %v7296_v35 }
0x1444   : > { %v7300_v45 = vpop.eup %7299  ;;  %7309 = vrcp.f32 %v5073_v42  ;;  %v5074_v62 = vadd.f32 1.0, %v7298_v61 }
0x1445   : > { %7311 = vrcp.f32 %v5075_v8  ;;  %v5076_v14 = vadd.f32 1.0, %v7300_v45 }
0x1446   : > { %7313 = vrcp.f32 %v5074_v62 }
0x1447   : > { %7315 = vrcp.f32 %v5076_v14 }
0x144a   : > { %v7302_v53 = vpop.eup %7301 }
0x144b   : > { %v7304_v27 = vpop.eup %7303  ;;  %v5141_v18 = vmul.f32 %v7302_v53, %v9512_v26 }
0x144c   : > { %v7306_v13 = vpop.eup %7305  ;;  %v5143_v6 = vmul.f32 %v7304_v27, %v9515_v32  ;;  %v6043_v32 = vld [vmem:[%s9579_s16 + $0x1] ss:$0 sm:$0xff] }
0x144d   : > { %v7308_v39 = vpop.eup %7307  ;;  %v5142_v56 = vmul.f32 %v7306_v13, %v9518_v58 }
0x144e   : > { %v7310_v5 = vpop.eup %7309  ;;  %v5144_v41 = vmul.f32 %v7308_v39, %v9521_v47 }
0x144f   : > { %v7312_v28 = vpop.eup %7311  ;;  %v5145_v7 = vmul.f32 %v7310_v5, %v4890_v51 }
0x1450   : > { %v7314_v20 = vpop.eup %7313  ;;  %v5147_v57 = vmul.f32 %v7312_v28, %v4953_v36 }
0x1451   : > { %v7316_v16 = vpop.eup %7315  ;;  %v5146_v50 = vmul.f32 %v7314_v20, %v4892_v38  ;;  %v5157_v46 = vpack.c.bf16 %v5145_v7, %v5141_v18  ;;  %v5534_v7 = vld [vmem:[%s9580_s17] sm:$0x1] }
0x1452   : > { %v5148_v0 = vmul.f32 %v7316_v16, %v4955_v37  ;;  %v5159_v60 = vpack.c.bf16 %v5147_v57, %v5143_v6  ;;  %v5535_v6 = vld [vmem:[%s9581_s18] sm:$0x1] }
0x1453   : > { %v5158_v25 = vpack.c.bf16 %v5146_v50, %v5142_v56 }
0x1454   : > { %v5160_v21 = vpack.c.bf16 %v5148_v0, %v5144_v41  ;;  %v5553_v0 = vld [vmem:[%s9580_s17] sm:$0x1] }
0x1455   : > { %5472 = vmatprep.mubr.bf16.mxu0 %v5158_v25  ;;  %v5554_v25 = vld [vmem:[%s9581_s18] sm:$0x1] }
0x1456   : > { %5525 = vmatprep.mubr.bf16.mxu1 %v5160_v21  ;;  %5473 = vmatmul.mubr.bf16.gmra.mrb[132].mxu0 %v5157_v46 }
0x1457   : > { %5526 = vmatmul.mubr.bf16.gmra.mrb[136].mxu1 %v5159_v60 }
0x1476   : > { %v6305_v26 = vpop.f32.mrb[124].mxu0 }
0x1477   : > { %v6339_v17 = vpop.f32.mrb[128].mxu1  ;;  %v6306_v48 = vpop.f32.mrb[125].mxu0 }
0x1478   : > { %v6307_v58 = vadd.f32 %v6306_v48, %v6305_v26  ;;  %v6340_v51 = vpop.f32.mrb[129].mxu1  ;;  %v6308_v36 = vpop.f32.mrb[126].mxu0 }
0x1479   : > { %v6341_v40 = vadd.f32 %v6340_v51, %v6339_v17  ;;  %v6342_v47 = vpop.f32.mrb[130].mxu1  ;;  %v6309_v63 = vpop.f32.mrb[127].mxu0 }
0x147a   : > { %v5461_v33 = vadd.f32 %v6307_v58, %v6043_v32  ;;  %v6343_v24 = vpop.f32.mrb[131].mxu1 }
0x147c   : > { %v5514_v38 = vadd.f32 %v6341_v40, %v5461_v33 }
0x147e   : > { %v5532_v37 = vadd.f32 %v5514_v38, %v9150_v23 }
0x1480   : > { %v5537_v52 = vsel %vm5536_vm12, %v5532_v37, 0.0 }
0x1481   : > { %5538 = vadd.xlane.f32.xlu0 %v5537_v52 }
0x1491   : > { %v6311_v43 = vpop.f32.mrb[128].mxu0 }
0x1492   : > { %v6345_v54 = vpop.f32.mrb[132].mxu1  ;;  %v6312_v2 = vpop.f32.mrb[129].mxu0 }
0x1493   : > { %v6346_v59 = vpop.f32.mrb[133].mxu1  ;;  %v6314_v15 = vpop.f32.mrb[130].mxu0 }
0x1494   : > { %v6348_v55 = vpop.f32.mrb[134].mxu1  ;;  %v6315_v10 = vpop.f32.mrb[131].mxu0 }
0x1495   : > { %v6316_v3 = vadd.f32 %v6315_v10, %v6314_v15  ;;  %v6349_v4 = vpop.f32.mrb[135].mxu1 }
0x1496   : > { %v6350_v9 = vadd.f32 %v6349_v4, %v6348_v55 }
0x1497   : > { %v5470_v29 = vadd.f32 %v6316_v3, %v6043_v32 }
0x1499   : > { %v5523_v34 = vadd.f32 %v6350_v9, %v5470_v29 }
0x149b   : > { %v5533_v12 = vadd.f32 %v5523_v34, %v9156_v19 }
0x149d   : > { %v5555_v11 = vsel %vm5536_vm12, %v5533_v12, 0.0 }
0x149e   : > { %5556 = vadd.xlane.f32.xlu1 %v5555_v11 }
0x150e   : > { %v5539_v23 = vpop.xlane.xlu0 %5538 }
0x150f   : > { %v5540_v49 = vmul.f32 0.0078125, %v5539_v23 }
0x1511   : > { %v5541_v31 = vsub.f32 %v5532_v37, %v5540_v49 }
0x1513   : > { %v5542_v22 = vmul.f32 %v5541_v31, %v5541_v31 }
0x1515   : > { %v5543_v1 = vsel %vm5536_vm12, %v5542_v22, 0.0 }
0x1516   : > { %5544 = vadd.xlane.f32.xlu0 %v5543_v1 }
0x1529   : > { %v6317_v44 = vpop.f32.mrb[132].mxu0 }
0x152a   : > { %v6351_v30 = vpop.f32.mrb[136].mxu1  ;;  %v6318_v35 = vpop.f32.mrb[133].mxu0 }
0x152b   : > { %v6352_v42 = vpop.f32.mrb[137].mxu1  ;;  %v5557_v61 = vpop.xlane.xlu1 %5556 }
0x152c   : > { %v6354_v8 = vpop.f32.mrb[138].mxu1  ;;  %v5558_v45 = vmul.f32 0.0078125, %v5557_v61  ;;  %v6320_v62 = vpop.f32.mrb[134].mxu0 }
0x152d   : > { %v6321_v19 = vpop.f32.mrb[135].mxu0  ;;  %v6355_v14 = vpop.f32.mrb[139].mxu1 }
0x152e   : > { %v5559_v53 = vsub.f32 %v5533_v12, %v5558_v45 }
0x1530   : > { %v5560_v27 = vmul.f32 %v5559_v53, %v5559_v53 }
0x1532   : > { %v5561_v13 = vsel %vm5536_vm12, %v5560_v27, 0.0 }
0x1533   : > { %5562 = vadd.xlane.f32.xlu1 %v5561_v13 }
0x15a3   : > { %v5545_v39 = vpop.xlane.xlu0 %5544 }
0x15a4   : > { %v5546_v5 = vmul.f32 0.0078125, %v5545_v39 }
0x15a6   : > { %v5547_v28 = vadd.f32 1e-05, %v5546_v5 }
0x15a8   : > { %7317 = vrsqrt.f32 %v5547_v28 }
0x15b2   : > { %v7318_v18 = vpop.eup %7317 }
0x15b3   : > { %v5549_v20 = vmul.f32 %v7318_v18, %v5541_v31 }
0x15b5   : > { %v5550_v57 = vmul.f32 %v5549_v20, %v5534_v7 }
0x15b7   : > { %v5551_v16 = vadd.f32 %v5550_v57, %v5535_v6 }
0x15b9   : > { %5552 = vst [vmem:[%s605_s29] sm:$0x1] %v5551_v16 }
0x15c0   : > { %v5563_v56 = vpop.xlane.xlu1 %5562 }
0x15c1   : > { %v5564_v50 = vmul.f32 0.0078125, %v5563_v56 }
0x15c3   : > { %v5565_v46 = vadd.f32 1e-05, %v5564_v50 }
0x15c5   : > { %7319 = vrsqrt.f32 %v5565_v46 }
0x15cf   : > { %v7320_v41 = vpop.eup %7319 }
0x15d0   : > { %v5567_v60 = vmul.f32 %v7320_v41, %v5559_v53 }
0x15d2   : > { %v5568_v21 = vmul.f32 %v5567_v60, %v5553_v0 }
0x15d4   : > { %v5569_v26 = vadd.f32 %v5568_v21, %v5554_v25 }
0x15d6   : > { %6076 = vst [vmem:[%s605_s29 + $0x1] sm:$0x1] %v5569_v26 }
0x15d7 PF: > { %s29_s0 = sadd.s32 1, %s7327_s0  }
0x15d8   : > { %p26_p4 = scmp.ge.s32.totalorder %s29_s0, 4  }
0x15da   :  { %28 = sbr.rel (!%p26_p4) target bundleno = 5 (0x5), region = 139 }

</bundles_post_ra>
